<compile_context>
chip_gen: v7x
topology: tpu7x:2x2x1
jax: 0.10.0
libtpu: 0.0.40
codegen_flags: <defaults>
</compile_context>

<pallas_src>
import jax
import jax.numpy as jnp
from jax.experimental import pallas as pl
from jax.experimental.pallas import tpu as pltpu


def _round_up(v, m):
    return ((v + m - 1) // m) * m


def _pad_to(a, shape):
    """Zero-pad `a` up to `shape`; no copy if already that shape."""
    if tuple(a.shape) == tuple(shape):
        return a
    return jnp.pad(a, [(0, t - s) for s, t in zip(a.shape, shape)])


def _make_gcn_kernel(agg1_first, agg2_first, mm_dtype):
    """agg*_first / mm_dtype are static Python values baked into the kernel."""

    def kernel(adj_ref, x_ref, w1_ref, b1_ref, w2_ref, b2_ref, out_ref):
        adj = adj_ref[...]                                    # (G, N, N) mm_dtype
        # Degree (+1 self-loop).  adj is 0/1 so bf16 is exact; sum in f32.
        deg = jnp.sum(adj.astype(jnp.float32), axis=-1, keepdims=True) + 1.0
        inv_sqrt = jax.lax.rsqrt(deg)                         # (G, N, 1) f32, EUP

        def aggregate(s):
            # A_norm @ s == inv_sqrt * ((A + I) @ (inv_sqrt * s)); A_hat/A_norm
            # are never materialized.  One (N,F) broadcast, reused twice.
            scale = jnp.broadcast_to(inv_sqrt, s.shape)
            y = scale * s
            z = jnp.einsum('gik,gkf->gif', adj, y.astype(mm_dtype),
                           preferred_element_type=jnp.float32) + y
            return scale * z

        # aggregate(ones column): lets the bias fold exactly when we aggregate
        # BEFORE the dense layer:  A_norm (X W + 1 b) = (A_norm X) W + c b.
        if agg1_first or agg2_first:
            cz = jnp.einsum('gik,gkf->gif', adj, inv_sqrt.astype(mm_dtype),
                            preferred_element_type=jnp.float32) + inv_sqrt
            c = inv_sqrt * cz                                 # (G, N, 1) f32

        x = x_ref[...]                                        # (G, N, F) mm_dtype
        w1 = w1_ref[...]; b1 = b1_ref[...]                    # W mm_dtype, b f32
        w2 = w2_ref[...]; b2 = b2_ref[...]

        # --- GCN layer 1: relu(A_norm @ (x W1 + b1)) ---
        if agg1_first:   # aggregate on the narrower (input) width
            ax = aggregate(x.astype(jnp.float32))
            s1 = jnp.einsum('gnf,fh->gnh', ax.astype(mm_dtype), w1,
                            preferred_element_type=jnp.float32) + c * b1
        else:            # standard order: post-matmul width is the narrower one
            s1 = jnp.einsum('gnf,fh->gnh', x, w1,
                            preferred_element_type=jnp.float32) + b1
            s1 = aggregate(s1)
        h = jnp.maximum(s1, 0.0)       # relu; dropout(p=0) is the identity

        # --- GCN layer 2: A_norm @ (h W2 + b2), no activation ---
        if agg2_first:
            ah = aggregate(h)
            out = jnp.einsum('gnh,ho->gno', ah.astype(mm_dtype), w2,
                             preferred_element_type=jnp.float32) + c * b2
        else:
            s2 = jnp.einsum('gnh,ho->gno', h.astype(mm_dtype), w2,
                            preferred_element_type=jnp.float32) + b2
            out = aggregate(s2)

        out_ref[...] = out

    return kernel


def gcn_encoder(x, adj, w1, b1, w2, b2, *, matmul_dtype=jnp.bfloat16,
                graphs_per_step=8):
    """GCNEncoder forward.

    x: (N, IN_F) or (B, N, IN_F);  adj: (N, N) or (B, N, N) — no self-loops,
    the kernel adds +I (matching the PyTorch reference; if the input already
    contains self-loops the diagonal is double-counted, same as the reference).
    w1: (IN_F, HID_F) (transpose of nn.Linear.weight), b1: (HID_F,),
    w2: (HID_F, OUT_F), b2: (OUT_F,).
    """
    single = (x.ndim == 2)
    if single:
        x, adj = x[None], adj[None]

    B, N, in_f = x.shape
    hid_f = w1.shape[1]
    out_f = w2.shape[1]

    # Lane/MXU-dense padding: N (adj lane dim AND contraction dim of adj@y)
    # and every feature width to multiples of 128.
    NP = _round_up(N, 128)
    FP = _round_up(in_f, 128)
    HP = _round_up(hid_f, 128)
    OP = _round_up(out_f, 128)

    # Multiple graphs per grid step to amortize per-step overhead and fill the
    # MXU M dimension at small N.
    G = max(1, min(graphs_per_step, B))
    BP = _round_up(B, G)

    mm = matmul_dtype
    # Cast to the matmul dtype BEFORE padding (halves the padded adj copy in
    # HBM); _pad_to skips the copy entirely when the dims are already aligned.
    adj_p = _pad_to(adj.astype(mm), (BP, NP, NP))
    x_p = _pad_to(x.astype(mm), (BP, NP, FP))
    w1_p = _pad_to(w1.astype(mm), (FP, HP))
    w2_p = _pad_to(w2.astype(mm), (HP, OP))
    b1_p = _pad_to(jnp.reshape(b1, (1, -1)).astype(jnp.float32), (1, HP))
    b2_p = _pad_to(jnp.reshape(b2, (1, -1)).astype(jnp.float32), (1, OP))

    # Aggregate on the narrower padded side of each layer (the N^2*F adjacency
    # matmul dominates FLOPs).
    agg1_first = FP < HP
    agg2_first = HP < OP
    kernel = _make_gcn_kernel(agg1_first, agg2_first, mm)

    # Scoped-VMEM budget from the actual per-step footprint (defaults are
    # 16 MiB v5e / 32 MiB v6e,v7x — far below physical).
    mm_b = jnp.dtype(mm).itemsize
    est = (2 * G * NP * NP * mm_b               # adj, double-buffered
           + 2 * G * NP * FP * mm_b             # x, double-buffered
           + 2 * G * NP * OP * 4                # out (f32), double-buffered
           + 2 * (FP * HP + HP * OP) * mm_b     # weights
           + 2 * (HP + OP) * 4                  # biases
           + 4 * G * NP * max(FP, HP, OP) * 4   # f32 intermediates headroom
           + G * NP * NP * 4)                   # f32 temp for the deg reduce
    vmem_limit = int(min(max(2 * est, 32 * 1024 * 1024), 64 * 1024 * 1024))

    out = pl.pallas_call(
        kernel,
        out_shape=jax.ShapeDtypeStruct((BP, NP, OP), jnp.float32),
        grid=(BP // G,),
        in_specs=[
            pl.BlockSpec((G, NP, NP), lambda b: (b, 0, 0)),   # adj (per step)
            pl.BlockSpec((G, NP, FP), lambda b: (b, 0, 0)),   # x   (per step)
            pl.BlockSpec((FP, HP), lambda b: (0, 0)),         # W1  (shared)
            pl.BlockSpec((1, HP), lambda b: (0, 0)),          # b1  (shared)
            pl.BlockSpec((HP, OP), lambda b: (0, 0)),         # W2  (shared)
            pl.BlockSpec((1, OP), lambda b: (0, 0)),          # b2  (shared)
        ],
        out_specs=pl.BlockSpec((G, NP, OP), lambda b: (b, 0, 0)),
        compiler_params=pltpu.CompilerParams(
            dimension_semantics=("parallel",),
            vmem_limit_bytes=vmem_limit),
    )(adj_p, x_p, w1_p, b1_p, w2_p, b2_p)

    out = out[:B, :N, :out_f]
    return out[0] if single else out
    # TODO(synk): for N >~ 1-2k nodes, additionally tile the aggregation over
    # node-row/K blocks (grid=(B, N/TM, N/TK), f32 VMEM accumulator over the K
    # axis marked "arbitrary") so the adjacency block stays under v7x's 64 MiB
    # VMEM; this monolithic kernel targets the small/medium-N regime.


def gcn_encoder_ref(x, adj, w1, b1, w2, b2):
    """Pure-JAX f32 reference mirroring the PyTorch module (single graph)."""
    n = adj.shape[0]
    a_hat = adj + jnp.eye(n, dtype=adj.dtype)
    inv_sqrt = jnp.power(a_hat.sum(1), -0.5)
    a_norm = inv_sqrt[:, None] * a_hat * inv_sqrt[None, :]
    h = jnp.maximum(a_norm @ (x @ w1 + jnp.reshape(b1, (1, -1))), 0.0)
    return a_norm @ (h @ w2 + jnp.reshape(b2, (1, -1)))


if __name__ == "__main__":
    # Small shapes implied by the module: N nodes, feature dims in/hidden/out.
    B, N, IN_F, HID_F, OUT_F = 4, 16, 8, 32, 16

    key = jax.random.PRNGKey(0)
    k_adj, k_x, k_w1, k_b1, k_w2, k_b2 = jax.random.split(key, 6)

    # Random symmetric 0/1 adjacencies (self-loops added inside the kernel).
    a = (jax.random.uniform(k_adj, (B, N, N)) < 0.3).astype(jnp.float32)
    adj = jnp.maximum(a, jnp.swapaxes(a, -1, -2))
    x = jax.random.normal(k_x, (B, N, IN_F), dtype=jnp.float32)

    # Deterministic nn.Linear-style init (uniform +-1/sqrt(fan_in)).
    bound1 = 1.0 / (IN_F ** 0.5)
    w1 = jax.random.uniform(k_w1, (IN_F, HID_F), minval=-bound1, maxval=bound1)
    b1 = jax.random.uniform(k_b1, (HID_F,), minval=-bound1, maxval=bound1)
    bound2 = 1.0 / (HID_F ** 0.5)
    w2 = jax.random.uniform(k_w2, (HID_F, OUT_F), minval=-bound2, maxval=bound2)
    b2 = jax.random.uniform(k_b2, (OUT_F,), minval=-bound2, maxval=bound2)

    ref = jnp.stack([gcn_encoder_ref(x[i], adj[i], w1, b1, w2, b2)
                     for i in range(B)])

    # 1) Default bf16-MXU path (f32 accumulation) — bf16-appropriate tolerance.
    out_bf16 = jax.block_until_ready(gcn_encoder(x, adj, w1, b1, w2, b2))
    assert out_bf16.shape == (B, N, OUT_F)
    assert jnp.allclose(out_bf16, ref, atol=5e-2, rtol=5e-2), \
        "bf16-MXU path mismatch vs reference"

    # 2) f32-MXU fallback — tight tolerance; also the single-graph call path.
    out_f32 = jax.block_until_ready(
        gcn_encoder(x, adj, w1, b1, w2, b2, matmul_dtype=jnp.float32))
    assert jnp.allclose(out_f32, ref, atol=1e-4, rtol=1e-4), \
        "f32-MXU path mismatch vs reference"

    out_s = jax.block_until_ready(
        gcn_encoder(x[0], adj[0], w1, b1, w2, b2, matmul_dtype=jnp.float32))
    assert out_s.shape == (N, OUT_F)
    assert jnp.allclose(out_s, ref[0], atol=1e-4, rtol=1e-4), \
        "single-graph mismatch vs reference"

    # 3) Feature widths whose padded sizes trigger the aggregate-before-dense
    #    ordering (128 < 256 < 384): exercises the agg-first branches.
    HID2, OUT2 = 200, 300
    bA = 1.0 / (IN_F ** 0.5)
    w1b = jax.random.uniform(k_w1, (IN_F, HID2), minval=-bA, maxval=bA)
    b1b = jax.random.uniform(k_b1, (HID2,), minval=-bA, maxval=bA)
    bB = 1.0 / (HID2 ** 0.5)
    w2b = jax.random.uniform(k_w2, (HID2, OUT2), minval=-bB, maxval=bB)
    b2b = jax.random.uniform(k_b2, (OUT2,), minval=-bB, maxval=bB)
    out_af = jax.block_until_ready(
        gcn_encoder(x[:2], adj[:2], w1b, b1b, w2b, b2b,
                    matmul_dtype=jnp.float32))
    ref_af = jnp.stack([gcn_encoder_ref(x[i], adj[i], w1b, b1b, w2b, b2b)
                        for i in range(2)])
    assert jnp.allclose(out_af, ref_af, atol=1e-4, rtol=1e-4), \
        "aggregate-first ordering mismatch vs reference"

    print("KERNEL_OK")
</pallas_src>

<mosaic_0001>
module attributes {stable_mosaic.version = 11 : i64} {
  func.func @kernel(%arg0: i32, %arg1: memref<4x128x128xbf16, #tpu.memory_space<vmem>>, %arg2: memref<4x128x128xbf16, #tpu.memory_space<vmem>>, %arg3: memref<128x128xbf16, #tpu.memory_space<vmem>>, %arg4: memref<1x128xf32, #tpu.memory_space<vmem>>, %arg5: memref<128x128xbf16, #tpu.memory_space<vmem>>, %arg6: memref<1x128xf32, #tpu.memory_space<vmem>>, %arg7: memref<4x128x128xf32, #tpu.memory_space<vmem>>) attributes {dimension_semantics = [#tpu.dimension_semantics<parallel>], iteration_bounds = array<i64: 1>, scalar_prefetch = 0 : i64, scratch_operands = 0 : i64, tpu.core_type = #tpu.core_type<tc>, window_params = [{transform_indices = @transform_0, window_bounds = array<i64: 4, 128, 128>}, {transform_indices = @transform_1, window_bounds = array<i64: 4, 128, 128>}, {pipeline_mode = #tpu.pipeline_mode<synchronous>, transform_indices = @transform_2, window_bounds = array<i64: 128, 128>}, {pipeline_mode = #tpu.pipeline_mode<synchronous>, transform_indices = @transform_3, window_bounds = array<i64: 1, 128>}, {pipeline_mode = #tpu.pipeline_mode<synchronous>, transform_indices = @transform_4, window_bounds = array<i64: 128, 128>}, {pipeline_mode = #tpu.pipeline_mode<synchronous>, transform_indices = @transform_5, window_bounds = array<i64: 1, 128>}, {transform_indices = @transform_6, window_bounds = array<i64: 4, 128, 128>}]} {
    %c0 = arith.constant 0 : index
    %c0_0 = arith.constant 0 : index
    %c0_1 = arith.constant 0 : index
    %0 = vector.load %arg1[%c0, %c0_0, %c0_1] : memref<4x128x128xbf16, #tpu.memory_space<vmem>>, vector<4x128x128xbf16>
    %1 = arith.extf %0 : vector<4x128x128xbf16> to vector<4x128x128xf32>
    %cst = arith.constant dense<0.000000e+00> : vector<4x128xf32>
    %2 = vector.multi_reduction <add>, %1, %cst [2] : vector<4x128x128xf32> to vector<4x128xf32>
    %3 = vector.shape_cast %2 : vector<4x128xf32> to vector<4x128x1xf32>
    %cst_2 = arith.constant 1.000000e+00 : f32
    %4 = vector.broadcast %cst_2 : f32 to vector<4x128x1xf32>
    %5 = arith.addf %3, %4 : vector<4x128x1xf32>
    %6 = math.rsqrt %5 : vector<4x128x1xf32>
    %c0_3 = arith.constant 0 : index
    %c0_4 = arith.constant 0 : index
    %c0_5 = arith.constant 0 : index
    %7 = vector.load %arg2[%c0_3, %c0_4, %c0_5] : memref<4x128x128xbf16, #tpu.memory_space<vmem>>, vector<4x128x128xbf16>
    %c0_6 = arith.constant 0 : index
    %c0_7 = arith.constant 0 : index
    %8 = vector.load %arg3[%c0_6, %c0_7] : memref<128x128xbf16, #tpu.memory_space<vmem>>, vector<128x128xbf16>
    %c0_8 = arith.constant 0 : index
    %c0_9 = arith.constant 0 : index
    %9 = vector.load %arg4[%c0_8, %c0_9] : memref<1x128xf32, #tpu.memory_space<vmem>>, vector<1x128xf32>
    %c0_10 = arith.constant 0 : index
    %c0_11 = arith.constant 0 : index
    %10 = vector.load %arg5[%c0_10, %c0_11] : memref<128x128xbf16, #tpu.memory_space<vmem>>, vector<128x128xbf16>
    %c0_12 = arith.constant 0 : index
    %c0_13 = arith.constant 0 : index
    %11 = vector.load %arg6[%c0_12, %c0_13] : memref<1x128xf32, #tpu.memory_space<vmem>>, vector<1x128xf32>
    "tpu.trace_start"() <{level = 10 : i32, message = "gnf,fh->gnh"}> : () -> ()
    %cst_14 = arith.constant dense<0.000000e+00> : vector<4x128x128xf32>
    %12 = tpu.matmul %7, %8, %cst_14 {dimension_numbers = #tpu.dot_dimension_numbers<[2], [0], [0, 1], [1], [0, 0, 0, 1, 1, 1], [], []>} : vector<4x128x128xbf16>, vector<128x128xbf16>, vector<4x128x128xf32> -> vector<4x128x128xf32>
    "tpu.trace_stop"() : () -> ()
    %13 = vector.shape_cast %9 : vector<1x128xf32> to vector<1x1x128xf32>
    %14 = vector.broadcast %13 : vector<1x1x128xf32> to vector<4x128x128xf32>
    %15 = arith.addf %12, %14 : vector<4x128x128xf32>
    %16 = vector.shape_cast %6 : vector<4x128x1xf32> to vector<4x128x1xf32>
    %17 = vector.broadcast %16 : vector<4x128x1xf32> to vector<4x128x128xf32>
    %18 = arith.mulf %17, %15 : vector<4x128x128xf32>
    %19 = arith.truncf %18 : vector<4x128x128xf32> to vector<4x128x128xbf16>
    "tpu.trace_start"() <{level = 10 : i32, message = "gik,gkf->gif"}> : () -> ()
    %cst_15 = arith.constant dense<0.000000e+00> : vector<4x128x128xf32>
    %20 = tpu.matmul %0, %19, %cst_15 {dimension_numbers = #tpu.dot_dimension_numbers<[2], [1], [1], [2], [0, 0, 0, 1, 1, 2], [0], [0]>} : vector<4x128x128xbf16>, vector<4x128x128xbf16>, vector<4x128x128xf32> -> vector<4x128x128xf32>
    "tpu.trace_stop"() : () -> ()
    %21 = arith.addf %20, %18 : vector<4x128x128xf32>
    %22 = arith.mulf %17, %21 : vector<4x128x128xf32>
    %cst_16 = arith.constant 0.000000e+00 : f32
    %23 = vector.broadcast %cst_16 : f32 to vector<4x128x128xf32>
    %24 = arith.maximumf %22, %23 : vector<4x128x128xf32>
    %25 = arith.truncf %24 : vector<4x128x128xf32> to vector<4x128x128xbf16>
    "tpu.trace_start"() <{level = 10 : i32, message = "gnh,ho->gno"}> : () -> ()
    %cst_17 = arith.constant dense<0.000000e+00> : vector<4x128x128xf32>
    %26 = tpu.matmul %25, %10, %cst_17 {dimension_numbers = #tpu.dot_dimension_numbers<[2], [0], [0, 1], [1], [0, 0, 0, 1, 1, 1], [], []>} : vector<4x128x128xbf16>, vector<128x128xbf16>, vector<4x128x128xf32> -> vector<4x128x128xf32>
    "tpu.trace_stop"() : () -> ()
    %27 = vector.shape_cast %11 : vector<1x128xf32> to vector<1x1x128xf32>
    %28 = vector.broadcast %27 : vector<1x1x128xf32> to vector<4x128x128xf32>
    %29 = arith.addf %26, %28 : vector<4x128x128xf32>
    %30 = vector.shape_cast %6 : vector<4x128x1xf32> to vector<4x128x1xf32>
    %31 = vector.broadcast %30 : vector<4x128x1xf32> to vector<4x128x128xf32>
    %32 = arith.mulf %31, %29 : vector<4x128x128xf32>
    %33 = arith.truncf %32 : vector<4x128x128xf32> to vector<4x128x128xbf16>
    "tpu.trace_start"() <{level = 10 : i32, message = "gik,gkf->gif"}> : () -> ()
    %cst_18 = arith.constant dense<0.000000e+00> : vector<4x128x128xf32>
    %34 = tpu.matmul %0, %33, %cst_18 {dimension_numbers = #tpu.dot_dimension_numbers<[2], [1], [1], [2], [0, 0, 0, 1, 1, 2], [0], [0]>} : vector<4x128x128xbf16>, vector<4x128x128xbf16>, vector<4x128x128xf32> -> vector<4x128x128xf32>
    "tpu.trace_stop"() : () -> ()
    %35 = arith.addf %34, %32 : vector<4x128x128xf32>
    %36 = arith.mulf %31, %35 : vector<4x128x128xf32>
    %c0_19 = arith.constant 0 : index
    %c0_20 = arith.constant 0 : index
    %c0_21 = arith.constant 0 : index
    %37 = vector.load %arg7[%c0_19, %c0_20, %c0_21] : memref<4x128x128xf32, #tpu.memory_space<vmem>>, vector<4x128x128xf32>
    tpu.vector_store %arg7[%c0_19, %c0_20, %c0_21], %36 {strides = array<i32>} : memref<4x128x128xf32, #tpu.memory_space<vmem>>, vector<4x128x128xf32>,
    return
  }
  func.func @transform_0(%arg0: i32) -> (i32, i32, i32) {
    %c0_i32 = arith.constant 0 : i32
    %c0_i32_0 = arith.constant 0 : i32
    %c0_i32_1 = arith.constant 0 : i32
    return %arg0, %c0_i32, %c0_i32_0 : i32, i32, i32
  }
  func.func @transform_1(%arg0: i32) -> (i32, i32, i32) {
    %c0_i32 = arith.constant 0 : i32
    %c0_i32_0 = arith.constant 0 : i32
    %c0_i32_1 = arith.constant 0 : i32
    return %arg0, %c0_i32, %c0_i32_0 : i32, i32, i32
  }
  func.func @transform_2(%arg0: i32) -> (i32, i32) {
    %c0_i32 = arith.constant 0 : i32
    %c0_i32_0 = arith.constant 0 : i32
    %c0_i32_1 = arith.constant 0 : i32
    return %c0_i32, %c0_i32_0 : i32, i32
  }
  func.func @transform_3(%arg0: i32) -> (i32, i32) {
    %c0_i32 = arith.constant 0 : i32
    %c0_i32_0 = arith.constant 0 : i32
    %c0_i32_1 = arith.constant 0 : i32
    return %c0_i32, %c0_i32_0 : i32, i32
  }
  func.func @transform_4(%arg0: i32) -> (i32, i32) {
    %c0_i32 = arith.constant 0 : i32
    %c0_i32_0 = arith.constant 0 : i32
    %c0_i32_1 = arith.constant 0 : i32
    return %c0_i32, %c0_i32_0 : i32, i32
  }
  func.func @transform_5(%arg0: i32) -> (i32, i32) {
    %c0_i32 = arith.constant 0 : i32
    %c0_i32_0 = arith.constant 0 : i32
    %c0_i32_1 = arith.constant 0 : i32
    return %c0_i32, %c0_i32_0 : i32, i32
  }
  func.func @transform_6(%arg0: i32) -> (i32, i32, i32) {
    %c0_i32 = arith.constant 0 : i32
    %c0_i32_0 = arith.constant 0 : i32
    %c0_i32_1 = arith.constant 0 : i32
    return %arg0, %c0_i32, %c0_i32_0 : i32, i32, i32
  }
}

</mosaic_0001>

<bundles_post_ra>
// kernel: tpu_custom_call.1
= control target key start
LH: loop header
LB: loop body
LE: loop exit
PB: predicated region body
PF: predicated region fallthrough
CT: control target
= control target key end

     0   :  { %11 = vsyncpa [#allocation3], 0  ;;  %s5430_s0 = inlined_call_operand.hbm [shape: bf16[4,128,128], index: 0, kind: input, shape index: {}]   ;;  %s5431_s1 = inlined_call_operand.hbm [shape: bf16[4,128,128], index: 1, kind: input, shape index: {}]   ;;  %s5432_s2 = inlined_call_operand.hbm [shape: bf16[128,128], index: 2, kind: input, shape index: {}]   ;;  %s5433_s3 = inlined_call_operand.vmem [shape: f32[1,128], index: 3, kind: input, shape index: {}]   ;;  %s5434_s4 = inlined_call_operand.hbm [shape: bf16[128,128], index: 4, kind: input, shape index: {}]   ;;  %s5435_s5 = inlined_call_operand.vmem [shape: f32[1,128], index: 5, kind: input, shape index: {}]   ;;  %s5436_s6 = inlined_call_operand.hbm [shape: f32[4,128,128], index: 6, kind: output, shape index: {}]  }
   0x1   :  { %12 = vsyncpa [#allocation6], 0 }
   0x2   :  { %13 = vsyncpa [#allocation9], 0 }
   0x3   :  { %14 = vsyncpa [#allocation4], 0  ;;  %s4006_s21 = smov [#allocation5]   ;;  %s4007_s23 = smov [#allocation2]  }
   0x4   :  { %s32_s22 = sshll.u32 %s4006_s21, 4  ;;  %s20_s24 = sshll.u32 %s4007_s23, 4  ;;  %s33_s22 = int_to_ptr.vmem [resolvable:$true] %s32_s22  ;;  %s4050_s24 = int_to_ptr.vmem [resolvable:$true] %s20_s24 }
   0x5   :  { %s3888_s27 = scalar_lea.hbm %s5431_s1, 4096 }
   0x6   :  { %p3889_p0 = scmp.ne.s32.totalorder %s5431_s1, %s3888_s27  ;;  %p3892_p1 = scmp.lt.u32.totalorder %s3888_s27, %s5431_s1 }
   0x8   :  { %p3894_p2 = pnand %p3892_p1, %p3889_p0 }
   0xa   :  { %3897 = shalt.err (!%p3894_p2)
}
   0xb   :  { %s3898_s8 = scalar_lea.vmem %s33_s22, 4096  ;;  %p3903_p4 = scmp.lt.s32.totalorder %s33_s22, %s33_s22 }
   0xc   :  { %p3899_p3 = scmp.ne.s32.totalorder %s33_s22, %s3898_s8  ;;  %p3904_p5 = scmp.lt.s32.totalorder %s3898_s8, %s3898_s8 }
   0xe   :  { %p3905_p6 = por %p3904_p5, %p3903_p4 }
  0x10   :  { %p3906_p7 = pnand %p3905_p6, %p3899_p3 }
  0x12   :  { %3909 = shalt.err (!%p3906_p7)
}
  0x13   :  { %s4008_s9 = smov 64   ;;  %s4009_s10 = smov 4  }
  0x14   :  { %38 = dma.hbm_to_vmem [thread:$0]  %s5431_s1, 4096, %s33_s22, [#allocation6], %s4008_s9, %s4008_s9, %s4009_s10  }
  0x15   :  { %s3910_s15 = scalar_lea.hbm %s5430_s0, 4096 }
  0x16   :  { %p3911_p8 = scmp.ne.s32.totalorder %s5430_s0, %s3910_s15  ;;  %p3914_p9 = scmp.lt.u32.totalorder %s3910_s15, %s5430_s0 }
  0x18   :  { %p3916_p10 = pnand %p3914_p9, %p3911_p8 }
  0x1a   :  { %3919 = shalt.err (!%p3916_p10)
}
  0x1b   :  { %s3920_s20 = scalar_lea.vmem %s4050_s24, 4096  ;;  %p3925_p12 = scmp.lt.s32.totalorder %s4050_s24, %s4050_s24 }
  0x1c   :  { %p3921_p11 = scmp.ne.s32.totalorder %s4050_s24, %s3920_s20  ;;  %p3926_p13 = scmp.lt.s32.totalorder %s3920_s20, %s3920_s20 }
  0x1e   :  { %p3927_p0 = por %p3926_p13, %p3925_p12 }
  0x20   :  { %p3928_p1 = pnand %p3927_p0, %p3921_p11 }
  0x22   :  { %3931 = shalt.err (!%p3928_p1)
}
  0x23   :  { %26 = dma.hbm_to_vmem [thread:$0]  %s5430_s0, 4096, %s4050_s24, [#allocation3], %s4008_s9, %s4008_s9, %s4009_s10  }
  0x24   :  { %s4010_s22 = smov [#allocation7]   ;;  %s4011_s25 = smov [#allocation8]  }
  0x25   :  { %s44_s23 = sshll.u32 %s4010_s22, 4  ;;  %s58_s26 = sshll.u32 %s4011_s25, 4  ;;  %s45_s23 = int_to_ptr.vmem [resolvable:$true] %s44_s23  ;;  %s4087_s26 = int_to_ptr.vmem [resolvable:$true] %s58_s26 }
  0x26   :  { %s3932_s29 = scalar_lea.hbm %s5432_s2, 1024 }
  0x27   :  { %p3933_p2 = scmp.ne.s32.totalorder %s5432_s2, %s3932_s29  ;;  %p3936_p3 = scmp.lt.u32.totalorder %s3932_s29, %s5432_s2 }
  0x29   :  { %p3938_p4 = pnand %p3936_p3, %p3933_p2 }
  0x2b   :  { %3941 = shalt.err (!%p3938_p4)
}
  0x2c   :  { %s3942_s0 = scalar_lea.vmem %s45_s23, 1024  ;;  %p3947_p6 = scmp.lt.s32.totalorder %s45_s23, %s45_s23 }
  0x2d   :  { %p3943_p5 = scmp.ne.s32.totalorder %s45_s23, %s3942_s0  ;;  %p3948_p7 = scmp.lt.s32.totalorder %s3942_s0, %s3942_s0 }
  0x2f   :  { %p3949_p8 = por %p3948_p7, %p3947_p6 }
  0x31   :  { %p3950_p9 = pnand %p3949_p8, %p3943_p5 }
  0x33   :  { %3953 = shalt.err (!%p3950_p9)
}
  0x34   :  { %50 = dma.hbm_to_vmem [thread:$0]  %s5432_s2, 1024, %s45_s23, [#allocation6], %s4008_s9, %s4008_s9, %s4009_s10  }
  0x35   :  { %s3954_s15 = scalar_lea.hbm %s5434_s4, 1024 }
  0x36   :  { %p3955_p10 = scmp.ne.s32.totalorder %s5434_s4, %s3954_s15  ;;  %p3958_p11 = scmp.lt.u32.totalorder %s3954_s15, %s5434_s4 }
  0x38   :  { %p3960_p12 = pnand %p3958_p11, %p3955_p10 }
  0x3a   :  { %3963 = shalt.err (!%p3960_p12)
}
  0x3b   :  { %s3964_s20 = scalar_lea.vmem %s4087_s26, 1024  ;;  %p3969_p0 = scmp.lt.s32.totalorder %s4087_s26, %s4087_s26 }
  0x3c   :  { %p3965_p13 = scmp.ne.s32.totalorder %s4087_s26, %s3964_s20  ;;  %p3970_p1 = scmp.lt.s32.totalorder %s3964_s20, %s3964_s20 }
  0x3e   :  { %p3971_p2 = por %p3970_p1, %p3969_p0 }
  0x40   :  { %p3972_p3 = pnand %p3971_p2, %p3965_p13 }
  0x42   :  { %3975 = shalt.err (!%p3972_p3)
}
  0x43   :  { %64 = dma.hbm_to_vmem [thread:$0]  %s5434_s4, 1024, %s4087_s26, [#allocation9], %s4008_s9, %s4008_s9, %s4009_s10  }
  0x44   :  { %3998 = dma.done.wait [#allocation3], 4096  }
  0x45   :  { %3999 = vsyncadd [#allocation3], 4294963200 }
  0x46   :  { %4000 = dma.done.wait [#allocation6], 5120  }
  0x47   :  { %4001 = vsyncadd [#allocation6], 4294962176 }
  0x48   :  { %4002 = dma.done.wait [#allocation9], 1024  }
  0x49   :  { %4003 = vsyncadd [#allocation9], 4294966272  ;;  %v3622_v0 = vld [vmem:[#allocation7] sm:$0xff]   ;;  %v3623_v1 = vld [vmem:[#allocation7 + $0x8] sm:$0xff]  }
  0x4a   :  { %3197 = vmatprep.subr.bf16.mxu0 %v3622_v0  ;;  %v3624_v2 = vld [vmem:[#allocation7 + $0x10] sm:$0xff]   ;;  %v3625_v3 = vld [vmem:[#allocation7 + $0x18] sm:$0xff]   ;;  %v3630_v4 = vld [vmem:[#allocation5] sm:$0xff]  }
  0x4b   :  { %3198 = vmatpush3.bf16.msra.mxu0 %v3622_v0  ;;  %3213 = vmatprep.mubr.bf16.mxu0 %v3630_v4  ;;  %v3626_v5 = vld [vmem:[#allocation7 + $0x20] sm:$0xff]   ;;  %v3627_v6 = vld [vmem:[#allocation7 + $0x28] sm:$0xff]   ;;  %v3628_v7 = vld [vmem:[#allocation7 + $0x30] sm:$0xff]  }
  0x4c   :  { %3199 = vmatprep.subr.bf16.mxu0 %v3623_v1  ;;  %v4124_v8 = vld [vmem:[#allocation2] sm:$0xff]   ;;  %v3629_v9 = vld [vmem:[#allocation7 + $0x38] sm:$0xff]   ;;  %v4127_v11 = vld [vmem:[#allocation2 + $0x8] sm:$0xff]  }
  0x4d   :  { %v144_v10 = vunpack.c.l.bf16 %v4124_v8  ;;  %5661 = vst [vmem:[#allocation15_spill] sm:$0xff] %v4127_v11  ;;  %v146_v12 = vunpack.c.l.bf16 %v4127_v11  ;;  %v145_v13 = vunpack.c.h.bf16 %v4124_v8  ;;  %v147_v14 = vunpack.c.h.bf16 %v4127_v11  ;;  %v4132_v15 = vld [vmem:[#allocation2 + $0x10] sm:$0xff]   ;;  %v3631_v16 = vld [vmem:[#allocation5 + $0x8] sm:$0xff]   ;;  %v4136_v20 = vld [vmem:[#allocation2 + $0x18] sm:$0xff]   ;;  %3293 = vmatprep.mubr.bf16.mxu1 %v4124_v8 }
  0x4e   :  { %5662 = vst [vmem:[#allocation16_spill] sm:$0xff] %v4132_v15  ;;  %v3632_v17 = vld [vmem:[#allocation5 + $0x10] sm:$0xff]   ;;  %v148_v18 = vunpack.c.l.bf16 %v4132_v15  ;;  %v149_v19 = vunpack.c.h.bf16 %v4132_v15  ;;  %5663 = vst [vmem:[#allocation17_spill] sm:$0xff] %v4136_v20  ;;  %v150_v21 = vunpack.c.l.bf16 %v4136_v20  ;;  %v151_v22 = vunpack.c.h.bf16 %v4136_v20  ;;  %v4140_v23 = vld [vmem:[#allocation2 + $0x20] sm:$0xff]  }
  0x4f   :  { %3200 = vmatpush3.bf16.msra.mxu0 %v3623_v1  ;;  %208 = vadd.xlane.f32.xlu0 %v144_v10  ;;  %5664 = vst [vmem:[#allocation18_spill] sm:$0xff] %v4140_v23  ;;  %v3633_v24 = vld [vmem:[#allocation5 + $0x18] sm:$0xff]   ;;  %v3634_v25 = vld [vmem:[#allocation5 + $0x20] sm:$0xff]   ;;  %v152_v26 = vunpack.c.l.bf16 %v4140_v23  ;;  %v153_v27 = vunpack.c.h.bf16 %v4140_v23  ;;  %v4144_v28 = vld [vmem:[#allocation2 + $0x28] sm:$0xff]  }
  0x50   :  { %3201 = vmatprep.subr.bf16.mxu0 %v3624_v2  ;;  %212 = vadd.xlane.f32.xlu1 %v146_v12  ;;  %5665 = vst [vmem:[#allocation19_spill] sm:$0xff] %v4144_v28  ;;  %v154_v29 = vunpack.c.l.bf16 %v4144_v28  ;;  %v155_v30 = vunpack.c.h.bf16 %v4144_v28  ;;  %v4148_v31 = vld [vmem:[#allocation2 + $0x30] sm:$0xff]   ;;  %v3635_v32 = vld [vmem:[#allocation5 + $0x28] sm:$0xff]   ;;  %v94_v36 = vld [vmem:[#allocation2 + $0x38] sm:$0xff]  }
  0x51   :  { %5666 = vst [vmem:[#allocation20_spill] sm:$0xff] %v4148_v31  ;;  %v156_v33 = vunpack.c.l.bf16 %v4148_v31  ;;  %v3636_v34 = vld [vmem:[#allocation5 + $0x30] sm:$0xff]   ;;  %v157_v35 = vunpack.c.h.bf16 %v4148_v31  ;;  %v158_v37 = vunpack.c.l.bf16 %v94_v36  ;;  %v96_v38 = vld [vmem:[#allocation2 + $0x40] sm:$0xff]   ;;  %v159_v39 = vunpack.c.h.bf16 %v94_v36  ;;  %v3637_v40 = vld [vmem:[#allocation5 + $0x38] sm:$0xff]  }
  0x52   :  { %v3638_v41 = vld [vmem:[#allocation5 + $0x40] sm:$0xff]   ;;  %v98_v42 = vld [vmem:[#allocation2 + $0x48] sm:$0xff]   ;;  %v160_v43 = vunpack.c.l.bf16 %v96_v38  ;;  %v161_v44 = vunpack.c.h.bf16 %v96_v38  ;;  %v100_v47 = vld [vmem:[#allocation2 + $0x50] sm:$0xff]  }
  0x53   :  { %3202 = vmatpush3.bf16.msra.mxu0 %v3624_v2  ;;  %210 = vadd.xlane.f32.xlu0 %v145_v13  ;;  %v162_v45 = vunpack.c.l.bf16 %v98_v42  ;;  %v163_v46 = vunpack.c.h.bf16 %v98_v42  ;;  %v3639_v48 = vld [vmem:[#allocation5 + $0x48] sm:$0xff]   ;;  %v164_v49 = vunpack.c.l.bf16 %v100_v47  ;;  %v3640_v50 = vld [vmem:[#allocation5 + $0x50] sm:$0xff]   ;;  %v165_v51 = vunpack.c.h.bf16 %v100_v47  ;;  %v102_v52 = vld [vmem:[#allocation2 + $0x58] sm:$0xff]  }
  0x54   :  { %3203 = vmatprep.subr.bf16.mxu0 %v3625_v3  ;;  %214 = vadd.xlane.f32.xlu1 %v147_v14  ;;  %v166_v53 = vunpack.c.l.bf16 %v102_v52  ;;  %v167_v54 = vunpack.c.h.bf16 %v102_v52  ;;  %v104_v55 = vld [vmem:[#allocation2 + $0x60] sm:$0xff]   ;;  %v3641_v56 = vld [vmem:[#allocation5 + $0x58] sm:$0xff]   ;;  %v106_v60 = vld [vmem:[#allocation2 + $0x68] sm:$0xff]  }
  0x55   :  { %v168_v57 = vunpack.c.l.bf16 %v104_v55  ;;  %v3642_v58 = vld [vmem:[#allocation5 + $0x60] sm:$0xff]   ;;  %v169_v59 = vunpack.c.h.bf16 %v104_v55  ;;  %v170_v61 = vunpack.c.l.bf16 %v106_v60  ;;  %v171_v62 = vunpack.c.h.bf16 %v106_v60  ;;  %v108_v63 = vld [vmem:[#allocation2 + $0x70] sm:$0xff]   ;;  %v3643_v0 = vld [vmem:[#allocation5 + $0x68] sm:$0xff]  }
  0x56   :  { %v172_v1 = vunpack.c.l.bf16 %v108_v63  ;;  %v3644_v2 = vld [vmem:[#allocation5 + $0x70] sm:$0xff]   ;;  %v110_v4 = vld [vmem:[#allocation2 + $0x78] sm:$0xff]   ;;  %v3647_v12 = vld [vmem:[#allocation5 + $0x80] sm:$0xff]  }
  0x57   :  { %3204 = vmatpush3.bf16.msra.mxu0 %v3625_v3  ;;  %216 = vadd.xlane.f32.xlu0 %v148_v18  ;;  %v173_v3 = vunpack.c.h.bf16 %v108_v63  ;;  %v114_v14 = vld [vmem:[#allocation2 + $0x88] sm:$0xff]   ;;  %v116_v18 = vld [vmem:[#allocation2 + $0x90] sm:$0xff]   ;;  %v3660_v47 = vld [vmem:[#allocation5 + $0xb8] sm:$0xff]  }
  0x58   :  { %3205 = vmatprep.subr.bf16.mxu0 %v3626_v5  ;;  %218 = vadd.xlane.f32.xlu1 %v149_v19  ;;  %v3648_v19 = vld [vmem:[#allocation5 + $0x88] sm:$0xff]   ;;  %v124_v38 = vld [vmem:[#allocation2 + $0xb0] sm:$0xff]   ;;  %v3668_v63 = vld [vmem:[#allocation5 + $0xd8] sm:$0xff]  }
  0x59   :  { %v189_v42 = vunpack.c.h.bf16 %v124_v38  ;;  %v3664_v55 = vld [vmem:[#allocation5 + $0xc8] sm:$0xff]  }
  0x5b   :  { %3206 = vmatpush3.bf16.msra.mxu0 %v3626_v5  ;;  %220 = vadd.xlane.f32.xlu0 %v150_v21  ;;  %v174_v5 = vunpack.c.l.bf16 %v110_v4  ;;  %v180_v21 = vunpack.c.l.bf16 %v116_v18 }
  0x5c   :  { %3207 = vmatprep.subr.bf16.mxu0 %v3627_v6  ;;  %222 = vadd.xlane.f32.xlu1 %v151_v22  ;;  %v3651_v22 = vld [vmem:[#allocation5 + $0x90] sm:$0xff]  }
  0x5f   :  { %3208 = vmatpush3.bf16.msra.mxu0 %v3627_v6  ;;  %224 = vadd.xlane.f32.xlu0 %v152_v26  ;;  %v175_v6 = vunpack.c.h.bf16 %v110_v4 }
  0x60   :  { %3209 = vmatprep.subr.bf16.mxu0 %v3628_v7  ;;  %226 = vadd.xlane.f32.xlu1 %v153_v27 }
  0x63   :  { %3210 = vmatpush3.bf16.msra.mxu0 %v3628_v7  ;;  %228 = vadd.xlane.f32.xlu0 %v154_v29  ;;  %v112_v7 = vld [vmem:[#allocation2 + $0x80] sm:$0xff]  }
  0x64   :  { %3211 = vmatprep.subr.bf16.mxu0 %v3629_v9  ;;  %230 = vadd.xlane.f32.xlu1 %v155_v30  ;;  %v176_v10 = vunpack.c.l.bf16 %v112_v7  ;;  %v177_v13 = vunpack.c.h.bf16 %v112_v7  ;;  %v120_v29 = vld [vmem:[#allocation2 + $0xa0] sm:$0xff]   ;;  %v3652_v30 = vld [vmem:[#allocation5 + $0x98] sm:$0xff]   ;;  %v3672_v7 = vld [vmem:[#allocation5 + $0xe8] sm:$0xff]  }
  0x67   :  { %3212 = vmatpush3.bf16.msra.mxu0 %v3629_v9  ;;  %232 = vadd.xlane.f32.xlu0 %v156_v33  ;;  %v3645_v9 = vld [vmem:[#allocation5 + $0x78] sm:$0xff]   ;;  %v3655_v33 = vld [vmem:[#allocation5 + $0xa0] sm:$0xff]  }
  0x68   :  { %234 = vadd.xlane.f32.xlu1 %v157_v35  ;;  %v122_v35 = vld [vmem:[#allocation2 + $0xa8] sm:$0xff]  }
  0x69   :  { %v186_v36 = vunpack.c.l.bf16 %v122_v35 }
  0x6a   :  { %3214 = vmatmul.mubr.bf16.vlgmr.msra.gmra.mrb[0].mxu0 %v3631_v16  ;;  %v178_v16 = vunpack.c.l.bf16 %v114_v14 }
  0x6b   :  { %3217 = vmatprep.mubr.bf16.mxu0 %v3632_v17  ;;  %236 = vadd.xlane.f32.xlu0 %v158_v37  ;;  %v179_v17 = vunpack.c.h.bf16 %v114_v14  ;;  %v187_v37 = vunpack.c.h.bf16 %v122_v35 }
  0x6c   :  { %238 = vadd.xlane.f32.xlu1 %v159_v39  ;;  %v3656_v39 = vld [vmem:[#allocation5 + $0xa8] sm:$0xff]  }
  0x6f   :  { %240 = vadd.xlane.f32.xlu0 %v160_v43  ;;  %v126_v43 = vld [vmem:[#allocation2 + $0xb8] sm:$0xff]  }
  0x70   :  { %242 = vadd.xlane.f32.xlu1 %v161_v44  ;;  %v190_v44 = vunpack.c.l.bf16 %v126_v43 }
  0x72   :  { %3218 = vmatmul.mubr.bf16.gmra.mrb[4].mxu0 %v3633_v24  ;;  %v181_v24 = vunpack.c.h.bf16 %v116_v18 }
  0x73   :  { %3221 = vmatprep.mubr.bf16.mxu0 %v3634_v25  ;;  %244 = vadd.xlane.f32.xlu0 %v162_v45  ;;  %v118_v25 = vld [vmem:[#allocation2 + $0x98] sm:$0xff]   ;;  %v191_v45 = vunpack.c.h.bf16 %v126_v43 }
  0x74   :  { %246 = vadd.xlane.f32.xlu1 %v163_v46  ;;  %v182_v26 = vunpack.c.l.bf16 %v118_v25  ;;  %v183_v27 = vunpack.c.h.bf16 %v118_v25  ;;  %v128_v46 = vld [vmem:[#allocation2 + $0xc0] sm:$0xff]  }
  0x77   :  { %248 = vadd.xlane.f32.xlu0 %v164_v49  ;;  %v3663_v49 = vld [vmem:[#allocation5 + $0xc0] sm:$0xff]  }
  0x78   :  { %250 = vadd.xlane.f32.xlu1 %v165_v51  ;;  %v130_v51 = vld [vmem:[#allocation2 + $0xc8] sm:$0xff]  }
  0x79   :  { %v194_v52 = vunpack.c.l.bf16 %v130_v51 }
  0x7a   :  { %3222 = vmatmul.mubr.bf16.gmra.mrb[8].mxu0 %v3635_v32  ;;  %v184_v32 = vunpack.c.l.bf16 %v120_v29 }
  0x7b   :  { %3225 = vmatprep.mubr.bf16.mxu0 %v3636_v34  ;;  %252 = vadd.xlane.f32.xlu0 %v166_v53  ;;  %v185_v34 = vunpack.c.h.bf16 %v120_v29  ;;  %v195_v53 = vunpack.c.h.bf16 %v130_v51 }
  0x7c   :  { %254 = vadd.xlane.f32.xlu1 %v167_v54  ;;  %v132_v54 = vld [vmem:[#allocation2 + $0xd0] sm:$0xff]  }
  0x7f   :  { %256 = vadd.xlane.f32.xlu0 %v168_v57  ;;  %v3667_v57 = vld [vmem:[#allocation5 + $0xd0] sm:$0xff]  }
  0x80   :  { %258 = vadd.xlane.f32.xlu1 %v169_v59  ;;  %v134_v59 = vld [vmem:[#allocation2 + $0xd8] sm:$0xff]  }
  0x81   :  { %v198_v60 = vunpack.c.l.bf16 %v134_v59 }
  0x82   :  { %3226 = vmatmul.mubr.bf16.gmra.mrb[12].mxu0 %v3637_v40  ;;  %v188_v40 = vunpack.c.l.bf16 %v124_v38 }
  0x83   :  { %3229 = vmatprep.mubr.bf16.mxu0 %v3638_v41  ;;  %260 = vadd.xlane.f32.xlu0 %v170_v61  ;;  %v3659_v41 = vld [vmem:[#allocation5 + $0xb0] sm:$0xff]   ;;  %v199_v61 = vunpack.c.h.bf16 %v134_v59 }
  0x84   :  { %262 = vadd.xlane.f32.xlu1 %v171_v62  ;;  %v136_v62 = vld [vmem:[#allocation2 + $0xe0] sm:$0xff]  }
  0x87   :  { %264 = vadd.xlane.f32.xlu0 %v172_v1  ;;  %v3671_v1 = vld [vmem:[#allocation5 + $0xe0] sm:$0xff]  }
  0x88   :  { %266 = vadd.xlane.f32.xlu1 %v173_v3  ;;  %v138_v3 = vld [vmem:[#allocation2 + $0xe8] sm:$0xff]  }
  0x89   :  { %v202_v4 = vunpack.c.l.bf16 %v138_v3 }
  0x8a   :  { %3230 = vmatmul.mubr.bf16.gmra.mrb[16].mxu0 %v3639_v48  ;;  %v192_v48 = vunpack.c.l.bf16 %v128_v46 }
  0x8b   :  { %3233 = vmatprep.mubr.bf16.mxu0 %v3640_v50  ;;  %268 = vadd.xlane.f32.xlu0 %v174_v5  ;;  %v193_v50 = vunpack.c.h.bf16 %v128_v46  ;;  %v203_v5 = vunpack.c.h.bf16 %v138_v3 }
  0x8c   :  { %270 = vadd.xlane.f32.xlu1 %v175_v6  ;;  %v140_v6 = vld [vmem:[#allocation2 + $0xf0] sm:$0xff]  }
  0x8f   :  { %272 = vadd.xlane.f32.xlu0 %v176_v10  ;;  %v3675_v10 = vld [vmem:[#allocation5 + $0xf0] sm:$0xff]  }
  0x90   :  { %274 = vadd.xlane.f32.xlu1 %v177_v13  ;;  %v142_v13 = vld [vmem:[#allocation2 + $0xf8] sm:$0xff]  }
  0x91   :  { %v206_v14 = vunpack.c.l.bf16 %v142_v13 }
  0x92   :  { %3234 = vmatmul.mubr.bf16.gmra.mrb[20].mxu0 %v3641_v56  ;;  %v196_v56 = vunpack.c.l.bf16 %v132_v54 }
  0x93   :  { %3237 = vmatprep.mubr.bf16.mxu0 %v3642_v58  ;;  %276 = vadd.xlane.f32.xlu0 %v178_v16  ;;  %v197_v58 = vunpack.c.h.bf16 %v132_v54  ;;  %v207_v16 = vunpack.c.h.bf16 %v142_v13 }
  0x94   :  { %278 = vadd.xlane.f32.xlu1 %v179_v17  ;;  %v3676_v17 = vld [vmem:[#allocation5 + $0xf8] sm:$0xff]  }
  0x97   :  { %280 = vadd.xlane.f32.xlu0 %v180_v21 }
  0x98   :  { %282 = vadd.xlane.f32.xlu1 %v181_v24 }
  0x9a   :  { %3238 = vmatmul.mubr.bf16.gmra.mrb[24].mxu0 %v3643_v0  ;;  %v200_v0 = vunpack.c.l.bf16 %v136_v62 }
  0x9b   :  { %3241 = vmatprep.mubr.bf16.mxu0 %v3644_v2  ;;  %284 = vadd.xlane.f32.xlu0 %v182_v26  ;;  %v201_v2 = vunpack.c.h.bf16 %v136_v62 }
  0x9c   :  { %286 = vadd.xlane.f32.xlu1 %v183_v27 }
  0x9f   :  { %288 = vadd.xlane.f32.xlu0 %v184_v32 }
  0xa0   :  { %290 = vadd.xlane.f32.xlu1 %v185_v34 }
  0xa2   :  { %3242 = vmatmul.mubr.bf16.gmra.mrb[28].mxu0 %v3645_v9  ;;  %v204_v9 = vunpack.c.l.bf16 %v140_v6 }
  0xa3   :  { %3245 = vmatprep.mubr.bf16.mxu0 %v3647_v12  ;;  %292 = vadd.xlane.f32.xlu0 %v186_v36  ;;  %v205_v12 = vunpack.c.h.bf16 %v140_v6 }
  0xa4   :  { %294 = vadd.xlane.f32.xlu1 %v187_v37 }
  0xa7   :  { %296 = vadd.xlane.f32.xlu0 %v188_v40 }
  0xa8   :  { %298 = vadd.xlane.f32.xlu1 %v189_v42 }
  0xaa   :  { %3246 = vmatmul.mubr.bf16.gmra.mrb[32].mxu0 %v3648_v19 }
  0xab   :  { %3249 = vmatprep.mubr.bf16.mxu0 %v3651_v22  ;;  %300 = vadd.xlane.f32.xlu0 %v190_v44 }
  0xac   :  { %302 = vadd.xlane.f32.xlu1 %v191_v45 }
  0xaf   :  { %304 = vadd.xlane.f32.xlu0 %v192_v48 }
  0xb0   :  { %306 = vadd.xlane.f32.xlu1 %v193_v50 }
  0xb2   :  { %3250 = vmatmul.mubr.bf16.gmra.mrb[36].mxu0 %v3652_v30 }
  0xb3   :  { %3253 = vmatprep.mubr.bf16.mxu0 %v3655_v33  ;;  %308 = vadd.xlane.f32.xlu0 %v194_v52 }
  0xb4   :  { %310 = vadd.xlane.f32.xlu1 %v195_v53 }
  0xb7   :  { %312 = vadd.xlane.f32.xlu0 %v196_v56 }
  0xb8   :  { %314 = vadd.xlane.f32.xlu1 %v197_v58 }
  0xba   :  { %3254 = vmatmul.mubr.bf16.gmra.mrb[40].mxu0 %v3656_v39 }
  0xbb   :  { %3257 = vmatprep.mubr.bf16.mxu0 %v3659_v41  ;;  %316 = vadd.xlane.f32.xlu0 %v198_v60 }
  0xbc   :  { %318 = vadd.xlane.f32.xlu1 %v199_v61 }
  0xbf   :  { %320 = vadd.xlane.f32.xlu0 %v200_v0 }
  0xc0   :  { %322 = vadd.xlane.f32.xlu1 %v201_v2 }
  0xc2   :  { %3258 = vmatmul.mubr.bf16.gmra.mrb[44].mxu0 %v3660_v47 }
  0xc3   :  { %3261 = vmatprep.mubr.bf16.mxu0 %v3663_v49  ;;  %324 = vadd.xlane.f32.xlu0 %v202_v4 }
  0xc4   :  { %326 = vadd.xlane.f32.xlu1 %v203_v5 }
  0xc7   :  { %328 = vadd.xlane.f32.xlu0 %v204_v9 }
  0xc8   :  { %330 = vadd.xlane.f32.xlu1 %v205_v12 }
  0xca   :  { %3262 = vmatmul.mubr.bf16.gmra.mrb[48].mxu0 %v3664_v55 }
  0xcb   :  { %3265 = vmatprep.mubr.bf16.mxu0 %v3667_v57  ;;  %332 = vadd.xlane.f32.xlu0 %v206_v14  ;;  %v4186_v57 = vld [vmem:[%s5433_s3] ss:$0 sm:$0xff] }
  0xcc   :  { %334 = vadd.xlane.f32.xlu1 %v207_v16 }
  0xd2   :  { %3266 = vmatmul.mubr.bf16.gmra.mrb[52].mxu0 %v3668_v63 }
  0xd3   :  { %3269 = vmatprep.mubr.bf16.mxu0 %v3671_v1 }
  0xda   :  { %3270 = vmatmul.mubr.bf16.gmra.mrb[56].mxu0 %v3672_v7 }
  0xdb   :  { %3273 = vmatprep.mubr.bf16.mxu0 %v3675_v10 }
  0xdc   :  { %v209_v18 = vpop.xlane.xlu0 %208 }
  0xdd   :  { %v213_v19 = vpop.xlane.xlu1 %212  ;;  %v336_v48 = vadd.f32 1.0, %v209_v18 }
  0xde   :  { %v338_v49 = vadd.f32 1.0, %v213_v19 }
  0xe0   :  { %v211_v22 = vpop.xlane.xlu0 %210 }
  0xe1   :  { %v215_v21 = vpop.xlane.xlu1 %214  ;;  %v337_v45 = vadd.f32 1.0, %v211_v22 }
  0xe2   :  { %3274 = vmatmul.mubr.bf16.gmra.mrb[60].mxu0 %v3676_v17  ;;  %v339_v47 = vadd.f32 1.0, %v215_v21 }
  0xe3   :  { %3734 = vrsqrt.f32 %v337_v45 }
  0xe4   :  { %v217_v25 = vpop.xlane.xlu0 %216  ;;  %3736 = vrsqrt.f32 %v339_v47 }
  0xe5   :  { %v219_v24 = vpop.xlane.xlu1 %218  ;;  %3738 = vrsqrt.f32 %v336_v48  ;;  %v340_v52 = vadd.f32 1.0, %v217_v25 }
  0xe6   :  { %3740 = vrsqrt.f32 %v338_v49  ;;  %v341_v53 = vadd.f32 1.0, %v219_v24 }
  0xe7   :  { %3742 = vrsqrt.f32 %v340_v52 }
  0xe8   :  { %v221_v27 = vpop.xlane.xlu0 %220  ;;  %3744 = vrsqrt.f32 %v341_v53 }
  0xe9   :  { %v223_v26 = vpop.xlane.xlu1 %222  ;;  %v342_v56 = vadd.f32 1.0, %v221_v27 }
  0xea   :  { %v343_v54 = vadd.f32 1.0, %v223_v26 }
  0xec   :  { %v225_v30 = vpop.xlane.xlu0 %224  ;;  %3746 = vrsqrt.f32 %v343_v54 }
  0xed   :  { %v227_v29 = vpop.xlane.xlu1 %226  ;;  %v4190_v61 = vpop.eup %3734  ;;  %3748 = vrsqrt.f32 %v342_v56  ;;  %v344_v1 = vadd.f32 1.0, %v225_v30 }
  0xee   :  { %v4193_v0 = vpop.eup %3736  ;;  %v345_v7 = vadd.f32 1.0, %v227_v29 }
  0xef   :  { %v4196_v4 = vpop.eup %3738  ;;  %3750 = vrsqrt.f32 %v344_v1 }
  0xf0   :  { %v229_v33 = vpop.xlane.xlu0 %228  ;;  %v4202_v10 = vpop.eup %3740  ;;  %3752 = vrsqrt.f32 %v345_v7 }
  0xf1   :  { %v231_v32 = vpop.xlane.xlu1 %230  ;;  %5667 = vst [vmem:[#allocation21_spill] sm:$0xff] %v4202_v10  ;;  %v346_v18 = vadd.f32 1.0, %v229_v33  ;;  %v4220_v24 = vpop.eup %3742  ;;  %v3694_v33 = vld [vmem:[#allocation8] sm:$0xff]  }
  0xf2   :  { %v347_v12 = vadd.f32 1.0, %v231_v32  ;;  %v4222_v26 = vpop.eup %3744  ;;  %3405 = vmatprep.subr.bf16.mxu0 %v3694_v33 }
  0xf3   :  { %5668 = vst [vmem:[#allocation22_spill] sm:$0xff] %v4222_v26  ;;  %3406 = vmatpush3.bf16.msra.mxu0 %v3694_v33 }
  0xf4   :  { %v4155_v35 = vpop.xlane.xlu0 %232  ;;  %3754 = vrsqrt.f32 %v347_v12 }
  0xf5   :  { %v4153_v34 = vpop.xlane.xlu1 %234  ;;  %3756 = vrsqrt.f32 %v346_v18  ;;  %v348_v47 = vadd.f32 1.0, %v4155_v35 }
  0xf6   :  { %v4229_v45 = vpop.eup %3746  ;;  %v349_v54 = vadd.f32 1.0, %v4153_v34 }
  0xf7   :  { %5669 = vst [vmem:[#allocation23_spill] sm:$0xff] %v4229_v45  ;;  %3758 = vrsqrt.f32 %v348_v47 }
  0xf8   :  { %v4159_v37 = vpop.xlane.xlu0 %236  ;;  %3760 = vrsqrt.f32 %v349_v54 }
  0xf9   :  { %v4157_v36 = vpop.xlane.xlu1 %238  ;;  %v350_v34 = vadd.f32 1.0, %v4159_v37 }
  0xfc   :  { %v4163_v39 = vpop.xlane.xlu0 %240 }
  0xfd   :  { %v4161_v38 = vpop.xlane.xlu1 %242 }
  0xfe   :  { %v353_v47 = vadd.f32 1.0, %v4161_v38 }
 0x100   :  { %v4167_v41 = vpop.xlane.xlu0 %244 }
 0x101   :  { %v4165_v40 = vpop.xlane.xlu1 %246 }
 0x104   :  { %v4171_v43 = vpop.xlane.xlu0 %248 }
 0x105   :  { %v4169_v42 = vpop.xlane.xlu1 %250 }
 0x108   :  { %v4175_v46 = vpop.xlane.xlu0 %252 }
 0x109   :  { %v4173_v44 = vpop.xlane.xlu1 %254 }
 0x10c   :  { %v4179_v51 = vpop.xlane.xlu0 %256 }
 0x10d   :  { %v4177_v50 = vpop.xlane.xlu1 %258 }
 0x110   :  { %v4188_v59 = vpop.xlane.xlu0 %260 }
 0x111   :  { %v4181_v55 = vpop.xlane.xlu1 %262 }
 0x114   :  { %v4213_v17 = vpop.xlane.xlu0 %264 }
 0x115   :  { %v4200_v9 = vpop.xlane.xlu1 %266 }
 0x118   :  { %v4236_v56 = vpop.xlane.xlu0 %268 }
 0x119   :  { %v4227_v32 = vpop.xlane.xlu1 %270 }
 0x13d   :  { %v3215_v58 = vpop.f32.mrb[0].mxu0 }
 0x13e   :  { %v842_v60 = vpop.f32.mrb[1].mxu0  ;;  %v851_v5 = vadd.f32 %v3215_v58, %v4186_v57  ;;  %v4238_v58 = vpop.eup %3748 }
 0x13f   :  { %v843_v62 = vadd.f32 %v4186_v57, %v842_v60  ;;  %v3216_v63 = vpop.f32.mrb[2].mxu0  ;;  %v351_v60 = vadd.f32 1.0, %v4157_v36 }
 0x140   :  { %v854_v2 = vadd.f32 %v3216_v63, %v4186_v57  ;;  %v845_v3 = vpop.f32.mrb[3].mxu0  ;;  %v4216_v19 = vmul.f32 %v4202_v10, %v851_v5  ;;  %v4258_v5 = vpop.eup %3750 }
 0x141   :  { %v846_v6 = vadd.f32 %v4186_v57, %v845_v3  ;;  %v4205_v13 = vmul.f32 %v4196_v4, %v843_v62  ;;  %v4256_v3 = vpop.xlane.xlu1 %274  ;;  %5670 = vst [vmem:[#allocation24_spill] sm:$0xff] %v4258_v5  ;;  %3762 = vrsqrt.f32 %v351_v60  ;;  %v4260_v7 = vpop.eup %3752  ;;  %v354_v60 = vadd.f32 1.0, %v4167_v41 }
 0x142   :  { %v4208_v14 = vmul.f32 %v4193_v0, %v854_v2  ;;  %5671 = vst [vmem:[#allocation25_spill] sm:$0xff] %v4260_v7  ;;  %3764 = vrsqrt.f32 %v350_v34 }
 0x143   :  { %v4211_v16 = vmul.f32 %v4190_v61, %v846_v6 }
 0x144   :  { %v1162_v30 = vpack.c.bf16 %v4208_v14, %v4216_v19 }
 0x145   :  { %v3219_v21 = vpop.f32.mrb[4].mxu0  ;;  %v1161_v22 = vpack.c.bf16 %v4211_v16, %v4205_v13  ;;  %v4286_v54 = vpop.xlane.xlu1 %278 }
 0x146   :  { %v858_v25 = vpop.f32.mrb[5].mxu0  ;;  %v867_v52 = vadd.f32 %v3219_v21, %v4186_v57  ;;  %v4265_v21 = vpop.xlane.xlu0 %272 }
 0x147   :  { %v859_v27 = vadd.f32 %v4186_v57, %v858_v25  ;;  %v3220_v29 = vpop.f32.mrb[6].mxu0  ;;  %3277 = vmatprep.subr.bf16.mxu1 %v1161_v22  ;;  %v352_v25 = vadd.f32 1.0, %v4163_v39 }
 0x148   :  { %v870_v48 = vadd.f32 %v3220_v29, %v4186_v57  ;;  %v861_v49 = vpop.f32.mrb[7].mxu0  ;;  %3278 = vmatpush3.bf16.msra.mxu1 %v1161_v22  ;;  %v4252_v1 = vmul.f32 %v4238_v58, %v867_v52  ;;  %v4267_v22 = vpop.eup %3754 }
 0x149   :  { %v862_v53 = vadd.f32 %v4186_v57, %v861_v49  ;;  %3279 = vmatprep.subr.bf16.mxu1 %v1162_v30  ;;  %v4242_v35 = vmul.f32 %v4220_v24, %v859_v27  ;;  %5672 = vst [vmem:[#allocation26_spill] sm:$0xff] %v4267_v22  ;;  %v355_v49 = vadd.f32 1.0, %v4165_v40  ;;  %3766 = vrsqrt.f32 %v352_v25  ;;  %v3695_v25 = vld [vmem:[#allocation8 + $0x8] sm:$0xff]  }
 0x14a   :  { %v4245_v62 = vmul.f32 %v4229_v45, %v870_v48  ;;  %v4274_v48 = vpop.eup %3756  ;;  %3768 = vrsqrt.f32 %v353_v47  ;;  %3407 = vmatprep.subr.bf16.mxu0 %v3695_v25 }
 0x14b   :  { %v4248_v63 = vmul.f32 %v4222_v26, %v862_v53  ;;  %3770 = vrsqrt.f32 %v355_v49  ;;  %3408 = vmatpush3.bf16.msra.mxu0 %v3695_v25 }
 0x14c   :  { %3280 = vmatpush3.bf16.msra.mxu1 %v1162_v30  ;;  %v1164_v18 = vpack.c.bf16 %v4245_v62, %v4252_v1  ;;  %3772 = vrsqrt.f32 %v354_v60  ;;  %v359_v60 = vadd.f32 1.0, %v4173_v44 }
 0x14d   :  { %v3223_v2 = vpop.f32.mrb[8].mxu0  ;;  %v1163_v36 = vpack.c.bf16 %v4248_v63, %v4242_v35 }
 0x14e   :  { %v874_v6 = vpop.f32.mrb[9].mxu0  ;;  %v883_v30 = vadd.f32 %v3223_v2, %v4186_v57  ;;  %v4294_v2 = vpop.xlane.xlu0 %276 }
 0x14f   :  { %v875_v12 = vadd.f32 %v4186_v57, %v874_v6  ;;  %v3224_v37 = vpop.f32.mrb[10].mxu0  ;;  %3281 = vmatprep.subr.bf16.mxu1 %v1163_v36 }
 0x150   :  { %v886_v27 = vadd.f32 %v3224_v37, %v4186_v57  ;;  %v877_v29 = vpop.f32.mrb[11].mxu0  ;;  %3282 = vmatpush3.bf16.msra.mxu1 %v1163_v36  ;;  %v4290_v38 = vmul.f32 %v4274_v48, %v883_v30  ;;  %v4296_v36 = vpop.eup %3758 }
 0x151   :  { %v878_v33 = vadd.f32 %v4186_v57, %v877_v29  ;;  %3283 = vmatprep.subr.bf16.mxu1 %v1164_v18  ;;  %v4278_v52 = vmul.f32 %v4258_v5, %v875_v12  ;;  %5673 = vst [vmem:[#allocation27_spill] sm:$0xff] %v4296_v36  ;;  %v4298_v12 = vpop.eup %3760  ;;  %v356_v29 = vadd.f32 1.0, %v4171_v43 }
 0x152   :  { %v4281_v39 = vmul.f32 %v4267_v22, %v886_v27  ;;  %5674 = vst [vmem:[#allocation28_spill] sm:$0xff] %v4298_v12  ;;  %v4303_v27 = vpop.eup %3762 }
 0x153   :  { %v4284_v53 = vmul.f32 %v4260_v7, %v878_v33  ;;  %5675 = vst [vmem:[#allocation29_spill] sm:$0xff] %v4303_v27  ;;  %v4310_v7 = vpop.xlane.xlu1 %282  ;;  %v4312_v22 = vpop.eup %3764  ;;  %3774 = vrsqrt.f32 %v356_v29 }
 0x154   :  { %3284 = vmatpush3.bf16.msra.mxu1 %v1164_v18  ;;  %v1166_v18 = vpack.c.bf16 %v4281_v39, %v4290_v38  ;;  %5676 = vst [vmem:[#allocation30_spill] sm:$0xff] %v4312_v22  ;;  %v4332_v25 = vpop.eup %3766 }
 0x155   :  { %v3227_v40 = vpop.f32.mrb[12].mxu0  ;;  %v1165_v34 = vpack.c.bf16 %v4284_v53, %v4278_v52  ;;  %5681 = vst [vmem:[#allocation35_spill] sm:$0xff] %v4332_v25 }
 0x156   :  { %v890_v6 = vpop.f32.mrb[13].mxu0  ;;  %v899_v47 = vadd.f32 %v3227_v40, %v4186_v57 }
 0x157   :  { %v891_v37 = vadd.f32 %v4186_v57, %v890_v6  ;;  %v3228_v41 = vpop.f32.mrb[14].mxu0  ;;  %3285 = vmatprep.subr.bf16.mxu1 %v1165_v34  ;;  %v357_v6 = vadd.f32 1.0, %v4169_v42  ;;  %v358_v42 = vadd.f32 1.0, %v4175_v46 }
 0x158   :  { %v902_v30 = vadd.f32 %v3228_v41, %v4186_v57  ;;  %v893_v33 = vpop.f32.mrb[15].mxu0  ;;  %3286 = vmatpush3.bf16.msra.mxu1 %v1165_v34  ;;  %v4324_v41 = vpop.xlane.xlu0 %280 }
 0x159   :  { %v894_v49 = vadd.f32 %v4186_v57, %v893_v33  ;;  %3287 = vmatprep.subr.bf16.mxu1 %v1166_v18  ;;  %v4316_v43 = vmul.f32 %v4296_v36, %v891_v37  ;;  %v4328_v33 = vmul.f32 %v4312_v22, %v899_v47  ;;  %3776 = vrsqrt.f32 %v357_v6  ;;  %v3696_v47 = vld [vmem:[#allocation8 + $0x10] sm:$0xff]   ;;  %v3697_v6 = vld [vmem:[#allocation8 + $0x18] sm:$0xff]  }
 0x15a   :  { %v4319_v34 = vmul.f32 %v4303_v27, %v902_v30  ;;  %3778 = vrsqrt.f32 %v359_v60  ;;  %3409 = vmatprep.subr.bf16.mxu0 %v3696_v47 }
 0x15b   :  { %5677 = vst [vmem:[#allocation31_spill] sm:$0xff] %v4316_v43  ;;  %v4322_v40 = vmul.f32 %v4298_v12, %v894_v49  ;;  %5680 = vst [vmem:[#allocation34_spill] sm:$0xff] %v4328_v33  ;;  %v4334_v49 = vpop.eup %3768  ;;  %3780 = vrsqrt.f32 %v358_v42  ;;  %v363_v42 = vadd.f32 1.0, %v4181_v55  ;;  %3410 = vmatpush3.bf16.msra.mxu0 %v3696_v47  ;;  %v3698_v47 = vld [vmem:[#allocation8 + $0x20] sm:$0xff]  }
 0x15c   :  { %5678 = vst [vmem:[#allocation32_spill] sm:$0xff] %v4319_v34  ;;  %3288 = vmatpush3.bf16.msra.mxu1 %v1166_v18  ;;  %5682 = vst [vmem:[#allocation36_spill] sm:$0xff] %v4334_v49  ;;  %v1168_v46 = vpack.c.bf16 %v4319_v34, %v4328_v33  ;;  %v4339_v18 = vpop.xlane.xlu1 %286  ;;  %v4341_v27 = vpop.eup %3770  ;;  %3411 = vmatprep.subr.bf16.mxu0 %v3697_v6 }
 0x15d   :  { %5679 = vst [vmem:[#allocation33_spill] sm:$0xff] %v4322_v40  ;;  %v3231_v44 = vpop.f32.mrb[16].mxu0  ;;  %v1167_v37 = vpack.c.bf16 %v4322_v40, %v4316_v43  ;;  %5683 = vst [vmem:[#allocation37_spill] sm:$0xff] %v4341_v27  ;;  %v360_v40 = vadd.f32 1.0, %v4179_v51  ;;  %v361_v43 = vadd.f32 1.0, %v4177_v50  ;;  %v4348_v34 = vpop.xlane.xlu0 %284  ;;  %v362_v50 = vadd.f32 1.0, %v4188_v59 }
 0x15e   :  { %v906_v30 = vpop.f32.mrb[17].mxu0  ;;  %v4350_v33 = vpop.eup %3772 }
 0x15f   :  { %v907_v12 = vadd.f32 %v4186_v57, %v906_v30  ;;  %v3232_v29 = vpop.f32.mrb[18].mxu0  ;;  %3289 = vmatprep.subr.bf16.mxu1 %v1167_v37  ;;  %v915_v30 = vadd.f32 %v3231_v44, %v4186_v57  ;;  %3782 = vrsqrt.f32 %v360_v40  ;;  %3412 = vmatpush3.bf16.msra.mxu0 %v3697_v6 }
 0x160   :  { %v918_v60 = vadd.f32 %v3232_v29, %v4186_v57  ;;  %v909_v36 = vpop.f32.mrb[19].mxu0  ;;  %3290 = vmatpush3.bf16.msra.mxu1 %v1167_v37  ;;  %3784 = vrsqrt.f32 %v361_v43  ;;  %v4368_v29 = vpop.xlane.xlu1 %290  ;;  %3413 = vmatprep.subr.bf16.mxu0 %v3698_v47 }
 0x161   :  { %v910_v22 = vadd.f32 %v4186_v57, %v909_v36  ;;  %3291 = vmatprep.subr.bf16.mxu1 %v1168_v46  ;;  %v4354_v51 = vmul.f32 %v4332_v25, %v907_v12  ;;  %v4364_v36 = vmul.f32 %v4350_v33, %v915_v30  ;;  %3786 = vrsqrt.f32 %v363_v42  ;;  %v4378_v30 = vpop.xlane.xlu0 %288 }
 0x162   :  { %v4357_v37 = vmul.f32 %v4341_v27, %v918_v60  ;;  %v4370_v60 = vpop.eup %3774  ;;  %3788 = vrsqrt.f32 %v362_v50  ;;  %v364_v42 = vadd.f32 1.0, %v4213_v17  ;;  %v365_v25 = vadd.f32 1.0, %v4200_v9 }
 0x163   :  { %v4360_v44 = vmul.f32 %v4334_v49, %v910_v22  ;;  %5686 = vst [vmem:[#allocation40_spill] sm:$0xff] %v4370_v60  ;;  %v4372_v40 = vpop.eup %3776  ;;  %v3699_v49 = vld [vmem:[#allocation8 + $0x28] sm:$0xff]   ;;  %v367_v50 = vadd.f32 1.0, %v4227_v32  ;;  %3414 = vmatpush3.bf16.msra.mxu0 %v3698_v47  ;;  %v366_v9 = vadd.f32 1.0, %v4236_v56 }
 0x164   :  { %5684 = vst [vmem:[#allocation38_spill] sm:$0xff] %v4357_v37  ;;  %3292 = vmatpush3.bf16.msra.mxu1 %v1168_v46  ;;  %5687 = vst [vmem:[#allocation41_spill] sm:$0xff] %v4372_v40  ;;  %v1170_v43 = vpack.c.bf16 %v4357_v37, %v4364_v36  ;;  %v4380_v27 = vpop.eup %3778  ;;  %3415 = vmatprep.subr.bf16.mxu0 %v3699_v49  ;;  %3790 = vrsqrt.f32 %v364_v42 }
 0x165   :  { %5685 = vst [vmem:[#allocation39_spill] sm:$0xff] %v4360_v44  ;;  %v3235_v55 = vpop.f32.mrb[20].mxu0  ;;  %v1169_v12 = vpack.c.bf16 %v4360_v44, %v4354_v51  ;;  %5688 = vst [vmem:[#allocation42_spill] sm:$0xff] %v4380_v27  ;;  %v4388_v37 = vpop.eup %3780  ;;  %3792 = vrsqrt.f32 %v365_v25 }
 0x166   :  { %v922_v22 = vpop.f32.mrb[21].mxu0  ;;  %5689 = vst [vmem:[#allocation43_spill] sm:$0xff] %v4388_v37  ;;  %3794 = vrsqrt.f32 %v367_v50 }
 0x167   :  { %v923_v59 = vadd.f32 %v4186_v57, %v922_v22  ;;  %v3236_v46 = vpop.f32.mrb[22].mxu0  ;;  %3294 = vmatmul.mubr.bf16.vlgmr.msra.gmra.mrb[0].mxu1 %v4127_v11  ;;  %3309 = vmatprep.subr.bf16.mxu1 %v1169_v12  ;;  %v931_v22 = vadd.f32 %v3235_v55, %v4186_v57  ;;  %v4400_v55 = vpop.xlane.xlu1 %294  ;;  %3796 = vrsqrt.f32 %v366_v9 }
 0x168   :  { %v934_v6 = vadd.f32 %v3236_v46, %v4186_v57  ;;  %v925_v44 = vpop.f32.mrb[23].mxu0  ;;  %3310 = vmatpush3.bf16.msra.mxu1 %v1169_v12  ;;  %3297 = vmatprep.mubr.bf16.mxu1 %v4132_v15 }
 0x169   :  { %v926_v11 = vadd.f32 %v4186_v57, %v925_v44  ;;  %3311 = vmatprep.subr.bf16.mxu1 %v1170_v43  ;;  %v4392_v17 = vmul.f32 %v4370_v60, %v923_v59  ;;  %v4404_v44 = vmul.f32 %v4388_v37, %v931_v22  ;;  %v4408_v59 = vpop.xlane.xlu0 %292  ;;  %3416 = vmatpush3.bf16.msra.mxu0 %v3699_v49  ;;  %v3701_v22 = vld [vmem:[#allocation8 + $0x38] sm:$0xff]  }
 0x16a   :  { %v4395_v12 = vmul.f32 %v4380_v27, %v934_v6  ;;  %v3700_v6 = vld [vmem:[#allocation8 + $0x30] sm:$0xff]   ;;  %v368_v27 = vadd.f32 1.0, %v4265_v21  ;;  %v371_v21 = vadd.f32 1.0, %v4286_v54 }
 0x16b   :  { %v4398_v46 = vmul.f32 %v4372_v40, %v926_v11  ;;  %v4410_v11 = vpop.eup %3782  ;;  %v4426_v60 = vpop.xlane.xlu1 %298  ;;  %3417 = vmatprep.subr.bf16.mxu0 %v3700_v6 }
 0x16c   :  { %5690 = vst [vmem:[#allocation44_spill] sm:$0xff] %v4395_v12  ;;  %3312 = vmatpush3.bf16.msra.mxu1 %v1170_v43  ;;  %5692 = vst [vmem:[#allocation46_spill] sm:$0xff] %v4410_v11  ;;  %v4412_v42 = vpop.eup %3784  ;;  %v1172_v25 = vpack.c.bf16 %v4395_v12, %v4404_v44  ;;  %3798 = vrsqrt.f32 %v368_v27 }
 0x16d   :  { %5691 = vst [vmem:[#allocation45_spill] sm:$0xff] %v4398_v46  ;;  %v3239_v32 = vpop.f32.mrb[24].mxu0  ;;  %v1171_v47 = vpack.c.bf16 %v4398_v46, %v4392_v17  ;;  %5693 = vst [vmem:[#allocation47_spill] sm:$0xff] %v4412_v42  ;;  %v4418_v40 = vpop.eup %3786  ;;  %v369_v46 = vadd.f32 1.0, %v4256_v3  ;;  %3418 = vmatpush3.bf16.msra.mxu0 %v3700_v6  ;;  %v370_v3 = vadd.f32 1.0, %v4294_v2 }
 0x16e   :  { %v938_v15 = vpop.f32.mrb[25].mxu0  ;;  %5694 = vst [vmem:[#allocation48_spill] sm:$0xff] %v4418_v40  ;;  %v4428_v12 = vpop.eup %3788  ;;  %3419 = vmatprep.subr.bf16.mxu0 %v3701_v22 }
 0x16f   :  { %v939_v56 = vadd.f32 %v4186_v57, %v938_v15  ;;  %v3240_v43 = vpop.f32.mrb[26].mxu0  ;;  %3298 = vmatmul.mubr.bf16.gmra.mrb[4].mxu1 %v4136_v20  ;;  %3313 = vmatprep.subr.bf16.mxu1 %v1171_v47  ;;  %v947_v15 = vadd.f32 %v3239_v32, %v4186_v57  ;;  %5695 = vst [vmem:[#allocation49_spill] sm:$0xff] %v4428_v12  ;;  %3800 = vrsqrt.f32 %v369_v46  ;;  %v4456_v46 = vpop.xlane.xlu1 %302 }
 0x170   :  { %v950_v50 = vadd.f32 %v3240_v43, %v4186_v57  ;;  %v941_v49 = vpop.f32.mrb[27].mxu0  ;;  %3314 = vmatpush3.bf16.msra.mxu1 %v1171_v47  ;;  %3301 = vmatprep.mubr.bf16.mxu1 %v4140_v23  ;;  %v4440_v43 = vpop.xlane.xlu0 %296  ;;  %3802 = vrsqrt.f32 %v371_v21 }
 0x171   :  { %v942_v20 = vadd.f32 %v4186_v57, %v941_v49  ;;  %3315 = vmatprep.subr.bf16.mxu1 %v1172_v25  ;;  %v4432_v9 = vmul.f32 %v4410_v11, %v939_v56  ;;  %v4444_v49 = vmul.f32 %v4428_v12, %v947_v15  ;;  %v4448_v56 = vpop.eup %3790  ;;  %3420 = vmatpush3.bf16.msra.mxu0 %v3701_v22  ;;  %3804 = vrsqrt.f32 %v370_v3 }
 0x172   :  { %v4435_v47 = vmul.f32 %v4418_v40, %v950_v50  ;;  %5697 = vst [vmem:[#allocation51_spill] sm:$0xff] %v4448_v56  ;;  %v4450_v50 = vpop.eup %3792  ;;  %v372_v15 = vadd.f32 1.0, %v4324_v41  ;;  %v375_v3 = vadd.f32 1.0, %v4339_v18  ;;  %v4471_v41 = vld [vmem:[#allocation2 + $0x38] sm:$0xff]  }
 0x173   :  { %v4438_v32 = vmul.f32 %v4412_v42, %v942_v20  ;;  %5698 = vst [vmem:[#allocation52_spill] sm:$0xff] %v4450_v50  ;;  %v373_v42 = vadd.f32 1.0, %v4310_v7  ;;  %5701 = vst [vmem:[#allocation55_spill] sm:$0xff] %v4471_v41  ;;  %v374_v7 = vadd.f32 1.0, %v4348_v34 }
 0x174   :  { %3316 = vmatpush3.bf16.msra.mxu1 %v1172_v25  ;;  %v1174_v2 = vpack.c.bf16 %v4435_v47, %v4444_v49  ;;  %v4458_v25 = vpop.eup %3794  ;;  %v4466_v40 = vpop.xlane.xlu0 %300  ;;  %3806 = vrsqrt.f32 %v372_v15 }
 0x175   :  { %5696 = vst [vmem:[#allocation50_spill] sm:$0xff] %v4438_v32  ;;  %v3243_v54 = vpop.f32.mrb[28].mxu0  ;;  %v1173_v6 = vpack.c.bf16 %v4438_v32, %v4432_v9  ;;  %5699 = vst [vmem:[#allocation53_spill] sm:$0xff] %v4458_v25  ;;  %v4468_v32 = vpop.eup %3796  ;;  %3808 = vrsqrt.f32 %v373_v42 }
 0x176   :  { %v954_v20 = vpop.f32.mrb[29].mxu0  ;;  %5700 = vst [vmem:[#allocation54_spill] sm:$0xff] %v4468_v32  ;;  %3810 = vrsqrt.f32 %v375_v3 }
 0x177   :  { %v955_v27 = vadd.f32 %v4186_v57, %v954_v20  ;;  %v3244_v23 = vpop.f32.mrb[30].mxu0  ;;  %3302 = vmatmul.mubr.bf16.gmra.mrb[8].mxu1 %v4144_v28  ;;  %3317 = vmatprep.subr.bf16.mxu1 %v1173_v6  ;;  %v963_v20 = vadd.f32 %v3243_v54, %v4186_v57  ;;  %3812 = vrsqrt.f32 %v374_v7  ;;  %v4513_v7 = vld [vmem:[#allocation2 + $0x48] sm:$0xff]  }
 0x178   :  { %v966_v22 = vadd.f32 %v3244_v23, %v4186_v57  ;;  %v957_v21 = vpop.f32.mrb[31].mxu0  ;;  %3318 = vmatpush3.bf16.msra.mxu1 %v1173_v6  ;;  %3305 = vmatprep.mubr.bf16.mxu1 %v4148_v31  ;;  %5710 = vst [vmem:[#allocation64_spill] sm:$0xff] %v4513_v7 }
 0x179   :  { %v958_v28 = vadd.f32 %v4186_v57, %v957_v21  ;;  %3319 = vmatprep.subr.bf16.mxu1 %v1174_v2  ;;  %v4474_v23 = vmul.f32 %v4448_v56, %v955_v27  ;;  %v4482_v21 = vld [vmem:[#allocation2 + $0x40] sm:$0xff]   ;;  %v4486_v31 = vmul.f32 %v4468_v32, %v963_v20  ;;  %v4490_v56 = vpop.xlane.xlu1 %306  ;;  %v377_v32 = vadd.f32 1.0, %v4368_v29 }
 0x17a   :  { %v4477_v6 = vmul.f32 %v4458_v25, %v966_v22  ;;  %5705 = vst [vmem:[#allocation59_spill] sm:$0xff] %v4482_v21  ;;  %v4492_v22 = vpop.eup %3798  ;;  %v376_v25 = vadd.f32 1.0, %v4378_v30  ;;  %v378_v29 = vadd.f32 1.0, %v4408_v59 }
 0x17b   :  { %5702 = vst [vmem:[#allocation56_spill] sm:$0xff] %v4474_v23  ;;  %v4480_v54 = vmul.f32 %v4450_v50, %v958_v28  ;;  %5706 = vst [vmem:[#allocation60_spill] sm:$0xff] %v4492_v22  ;;  %v4494_v50 = vpop.eup %3800 }
 0x17c   :  { %5703 = vst [vmem:[#allocation57_spill] sm:$0xff] %v4477_v6  ;;  %3320 = vmatpush3.bf16.msra.mxu1 %v1174_v2  ;;  %5707 = vst [vmem:[#allocation61_spill] sm:$0xff] %v4494_v50  ;;  %v1176_v42 = vpack.c.bf16 %v4477_v6, %v4486_v31  ;;  %v4500_v2 = vpop.xlane.xlu0 %304  ;;  %v4502_v20 = vpop.eup %3802  ;;  %3814 = vrsqrt.f32 %v376_v25 }
 0x17d   :  { %5704 = vst [vmem:[#allocation58_spill] sm:$0xff] %v4480_v54  ;;  %v3247_v18 = vpop.f32.mrb[32].mxu0  ;;  %v1175_v27 = vpack.c.bf16 %v4480_v54, %v4474_v23  ;;  %5708 = vst [vmem:[#allocation62_spill] sm:$0xff] %v4502_v20  ;;  %v4510_v6 = vpop.eup %3804  ;;  %v379_v23 = vadd.f32 1.0, %v4400_v55  ;;  %3816 = vrsqrt.f32 %v377_v32 }
 0x17e   :  { %v970_v28 = vpop.f32.mrb[33].mxu0  ;;  %5709 = vst [vmem:[#allocation63_spill] sm:$0xff] %v4510_v6 }
 0x17f   :  { %v971_v15 = vadd.f32 %v4186_v57, %v970_v28  ;;  %v3248_v34 = vpop.f32.mrb[34].mxu0  ;;  %3306 = vmatmul.mubr.bf16.gmra.mrb[12].mxu1 %v4471_v41  ;;  %3321 = vmatprep.subr.bf16.mxu1 %v1175_v27  ;;  %v979_v28 = vadd.f32 %v3247_v18, %v4186_v57  ;;  %v4524_v18 = vpop.xlane.xlu1 %310  ;;  %3818 = vrsqrt.f32 %v379_v23 }
 0x180   :  { %v982_v3 = vadd.f32 %v3248_v34, %v4186_v57  ;;  %v973_v54 = vpop.f32.mrb[35].mxu0  ;;  %3322 = vmatpush3.bf16.msra.mxu1 %v1175_v27  ;;  %3325 = vmatprep.mubr.bf16.mxu1 %v4482_v21  ;;  %v4534_v21 = vpop.xlane.xlu0 %308  ;;  %3820 = vrsqrt.f32 %v378_v29  ;;  %v383_v29 = vadd.f32 1.0, %v4456_v46 }
 0x181   :  { %v974_v41 = vadd.f32 %v4186_v57, %v973_v54  ;;  %3323 = vmatprep.subr.bf16.mxu1 %v1176_v42  ;;  %v4516_v30 = vmul.f32 %v4492_v22, %v971_v15  ;;  %v4526_v54 = vld [vmem:[#allocation2 + $0x50] sm:$0xff]   ;;  %v4530_v55 = vmul.f32 %v4510_v6, %v979_v28  ;;  %v380_v28 = vadd.f32 1.0, %v4440_v43  ;;  %v4557_v43 = vld [vmem:[#allocation2 + $0x58] sm:$0xff]  }
 0x182   :  { %v4519_v27 = vmul.f32 %v4502_v20, %v982_v3  ;;  %5714 = vst [vmem:[#allocation68_spill] sm:$0xff] %v4526_v54  ;;  %5719 = vst [vmem:[#allocation73_spill] sm:$0xff] %v4557_v43 }
 0x183   :  { %5711 = vst [vmem:[#allocation65_spill] sm:$0xff] %v4516_v30  ;;  %v4522_v34 = vmul.f32 %v4494_v50, %v974_v41  ;;  %v4536_v41 = vpop.eup %3806  ;;  %v4552_v6 = vpop.xlane.xlu1 %314  ;;  %3822 = vrsqrt.f32 %v380_v28 }
 0x184   :  { %5712 = vst [vmem:[#allocation66_spill] sm:$0xff] %v4519_v27  ;;  %3324 = vmatpush3.bf16.msra.mxu1 %v1176_v42  ;;  %5715 = vst [vmem:[#allocation69_spill] sm:$0xff] %v4536_v41  ;;  %v4538_v20 = vpop.eup %3808  ;;  %v1178_v32 = vpack.c.bf16 %v4519_v27, %v4530_v55 }
 0x185   :  { %5713 = vst [vmem:[#allocation67_spill] sm:$0xff] %v4522_v34  ;;  %v3251_v15 = vpop.f32.mrb[36].mxu0  ;;  %v1177_v3 = vpack.c.bf16 %v4522_v34, %v4516_v30  ;;  %5716 = vst [vmem:[#allocation70_spill] sm:$0xff] %v4538_v20  ;;  %v4544_v42 = vpop.eup %3810 }
 0x186   :  { %v986_v50 = vpop.f32.mrb[37].mxu0  ;;  %5717 = vst [vmem:[#allocation71_spill] sm:$0xff] %v4544_v42  ;;  %v4554_v27 = vpop.eup %3812 }
 0x187   :  { %v987_v25 = vadd.f32 %v4186_v57, %v986_v50  ;;  %v3252_v59 = vpop.f32.mrb[38].mxu0  ;;  %3326 = vmatmul.mubr.bf16.vlgmr.msra.gmra.mrb[16].mxu1 %v4513_v7  ;;  %3341 = vmatprep.subr.bf16.mxu1 %v1177_v3  ;;  %v995_v50 = vadd.f32 %v3251_v15, %v4186_v57  ;;  %v381_v7 = vadd.f32 1.0, %v4426_v60  ;;  %5718 = vst [vmem:[#allocation72_spill] sm:$0xff] %v4554_v27  ;;  %v4568_v60 = vld [vmem:[#allocation2 + $0x60] sm:$0xff]  }
 0x188   :  { %v998_v34 = vadd.f32 %v3252_v59, %v4186_v57  ;;  %v989_v23 = vpop.f32.mrb[39].mxu0  ;;  %3342 = vmatpush3.bf16.msra.mxu1 %v1177_v3  ;;  %3329 = vmatprep.mubr.bf16.mxu1 %v4526_v54  ;;  %5723 = vst [vmem:[#allocation77_spill] sm:$0xff] %v4568_v60  ;;  %v382_v54 = vadd.f32 1.0, %v4466_v40 }
 0x189   :  { %v990_v22 = vadd.f32 %v4186_v57, %v989_v23  ;;  %3343 = vmatprep.subr.bf16.mxu1 %v1178_v32  ;;  %v4560_v59 = vmul.f32 %v4536_v41, %v987_v25  ;;  %v313_v23 = vpop.xlane.xlu0 %312  ;;  %v4572_v46 = vmul.f32 %v4554_v27, %v995_v50  ;;  %3824 = vrsqrt.f32 %v381_v7  ;;  %v319_v7 = vpop.xlane.xlu1 %318 }
 0x18a   :  { %v4563_v3 = vmul.f32 %v4544_v42, %v998_v34  ;;  %v4576_v34 = vpop.eup %3814  ;;  %3826 = vrsqrt.f32 %v383_v29  ;;  %v384_v50 = vadd.f32 1.0, %v4500_v2  ;;  %v385_v41 = vadd.f32 1.0, %v4490_v56 }
 0x18b   :  { %5720 = vst [vmem:[#allocation74_spill] sm:$0xff] %v4560_v59  ;;  %v4566_v15 = vmul.f32 %v4538_v20, %v990_v22  ;;  %5724 = vst [vmem:[#allocation78_spill] sm:$0xff] %v4576_v34  ;;  %v4578_v20 = vpop.eup %3816  ;;  %3828 = vrsqrt.f32 %v382_v54  ;;  %v387_v54 = vadd.f32 1.0, %v4524_v18  ;;  %v386_v56 = vadd.f32 1.0, %v4534_v21 }
 0x18c   :  { %5721 = vst [vmem:[#allocation75_spill] sm:$0xff] %v4563_v3  ;;  %3344 = vmatpush3.bf16.msra.mxu1 %v1178_v32  ;;  %5725 = vst [vmem:[#allocation79_spill] sm:$0xff] %v4578_v20  ;;  %v1180_v40 = vpack.c.bf16 %v4563_v3, %v4572_v46  ;;  %v4584_v32 = vpop.eup %3818  ;;  %3830 = vrsqrt.f32 %v384_v50 }
 0x18d   :  { %5722 = vst [vmem:[#allocation76_spill] sm:$0xff] %v4566_v15  ;;  %v3255_v30 = vpop.f32.mrb[40].mxu0  ;;  %v1179_v25 = vpack.c.bf16 %v4566_v15, %v4560_v59  ;;  %5726 = vst [vmem:[#allocation80_spill] sm:$0xff] %v4584_v32  ;;  %v317_v3 = vpop.xlane.xlu0 %316  ;;  %v4595_v59 = vld [vmem:[#allocation2 + $0x68] sm:$0xff]   ;;  %3832 = vrsqrt.f32 %v385_v41 }
 0x18e   :  { %v1002_v22 = vpop.f32.mrb[41].mxu0  ;;  %v4592_v27 = vpop.eup %3820  ;;  %5728 = vst [vmem:[#allocation82_spill] sm:$0xff] %v4595_v59  ;;  %3834 = vrsqrt.f32 %v387_v54 }
 0x18f   :  { %v1003_v42 = vadd.f32 %v4186_v57, %v1002_v22  ;;  %v3256_v28 = vpop.f32.mrb[42].mxu0  ;;  %3330 = vmatmul.mubr.bf16.gmra.mrb[20].mxu1 %v4557_v43  ;;  %3345 = vmatprep.subr.bf16.mxu1 %v1179_v25  ;;  %v1011_v22 = vadd.f32 %v3255_v30, %v4186_v57  ;;  %5727 = vst [vmem:[#allocation81_spill] sm:$0xff] %v4592_v27  ;;  %3836 = vrsqrt.f32 %v386_v56 }
 0x190   :  { %v1014_v29 = vadd.f32 %v3256_v28, %v4186_v57  ;;  %v1005_v15 = vpop.f32.mrb[43].mxu0  ;;  %3346 = vmatpush3.bf16.msra.mxu1 %v1179_v25  ;;  %3333 = vmatprep.mubr.bf16.mxu1 %v4568_v60  ;;  %v323_v60 = vpop.xlane.xlu1 %322 }
 0x191   :  { %v1006_v43 = vadd.f32 %v4186_v57, %v1005_v15  ;;  %3347 = vmatprep.subr.bf16.mxu1 %v1180_v40  ;;  %v4598_v2 = vmul.f32 %v4576_v34, %v1003_v42  ;;  %v4606_v15 = vld [vmem:[#allocation2 + $0x70] sm:$0xff]   ;;  %v4610_v28 = vmul.f32 %v4592_v27, %v1011_v22  ;;  %v321_v41 = vpop.xlane.xlu0 %320  ;;  %v388_v22 = vadd.f32 1.0, %v313_v23 }
 0x192   :  { %v4601_v25 = vmul.f32 %v4584_v32, %v1014_v29  ;;  %5732 = vst [vmem:[#allocation86_spill] sm:$0xff] %v4606_v15  ;;  %v4614_v29 = vpop.eup %3822 }
 0x193   :  { %5729 = vst [vmem:[#allocation83_spill] sm:$0xff] %v4598_v2  ;;  %v4604_v30 = vmul.f32 %v4578_v20, %v1006_v43  ;;  %5733 = vst [vmem:[#allocation87_spill] sm:$0xff] %v4614_v29  ;;  %v4616_v20 = vpop.eup %3824  ;;  %3838 = vrsqrt.f32 %v388_v22 }
 0x194   :  { %5730 = vst [vmem:[#allocation84_spill] sm:$0xff] %v4601_v25  ;;  %3348 = vmatpush3.bf16.msra.mxu1 %v1180_v40  ;;  %5734 = vst [vmem:[#allocation88_spill] sm:$0xff] %v4616_v20  ;;  %v1182_v21 = vpack.c.bf16 %v4601_v25, %v4610_v28  ;;  %v4622_v40 = vpop.eup %3826  ;;  %v391_v25 = vadd.f32 1.0, %v319_v7 }
 0x195   :  { %5731 = vst [vmem:[#allocation85_spill] sm:$0xff] %v4604_v30  ;;  %v3259_v18 = vpop.f32.mrb[44].mxu0  ;;  %v1181_v42 = vpack.c.bf16 %v4604_v30, %v4598_v2  ;;  %5735 = vst [vmem:[#allocation89_spill] sm:$0xff] %v4622_v40  ;;  %v4629_v27 = vpop.eup %3828  ;;  %v4631_v2 = vld [vmem:[#allocation2 + $0x78] sm:$0xff]  }
 0x196   :  { %v1018_v43 = vpop.f32.mrb[45].mxu0  ;;  %5736 = vst [vmem:[#allocation90_spill] sm:$0xff] %v4629_v27  ;;  %5737 = vst [vmem:[#allocation91_spill] sm:$0xff] %v4631_v2 }
 0x197   :  { %v1019_v50 = vadd.f32 %v4186_v57, %v1018_v43  ;;  %v3260_v32 = vpop.f32.mrb[46].mxu0  ;;  %3334 = vmatmul.mubr.bf16.gmra.mrb[24].mxu1 %v4595_v59  ;;  %3349 = vmatprep.subr.bf16.mxu1 %v1181_v42  ;;  %v1027_v43 = vadd.f32 %v3259_v18, %v4186_v57  ;;  %v389_v59 = vadd.f32 1.0, %v4552_v6  ;;  %v327_v18 = vpop.xlane.xlu1 %326  ;;  %v390_v6 = vadd.f32 1.0, %v317_v3 }
 0x198   :  { %v1030_v30 = vadd.f32 %v3260_v32, %v4186_v57  ;;  %v1021_v54 = vpop.f32.mrb[47].mxu0  ;;  %3350 = vmatpush3.bf16.msra.mxu1 %v1181_v42  ;;  %3337 = vmatprep.mubr.bf16.mxu1 %v4606_v15  ;;  %v4642_v42 = vld [vmem:[#allocation2 + $0x80] sm:$0xff]   ;;  %v325_v15 = vpop.xlane.xlu0 %324 }
 0x199   :  { %v1022_v34 = vadd.f32 %v4186_v57, %v1021_v54  ;;  %3351 = vmatprep.subr.bf16.mxu1 %v1182_v21  ;;  %v4634_v23 = vmul.f32 %v4614_v29, %v1019_v50  ;;  %5741 = vst [vmem:[#allocation95_spill] sm:$0xff] %v4642_v42  ;;  %v4645_v54 = vmul.f32 %v4629_v27, %v1027_v43  ;;  %3840 = vrsqrt.f32 %v389_v59 }
 0x19a   :  { %v4637_v32 = vmul.f32 %v4622_v40, %v1030_v30  ;;  %v4649_v30 = vpop.eup %3830  ;;  %3842 = vrsqrt.f32 %v391_v25  ;;  %v393_v29 = vadd.f32 1.0, %v323_v60  ;;  %v394_v60 = vadd.f32 1.0, %v325_v15 }
 0x19b   :  { %5738 = vst [vmem:[#allocation92_spill] sm:$0xff] %v4634_v23  ;;  %v4640_v56 = vmul.f32 %v4616_v20, %v1022_v34  ;;  %5742 = vst [vmem:[#allocation96_spill] sm:$0xff] %v4649_v30  ;;  %v4651_v20 = vpop.eup %3832  ;;  %3844 = vrsqrt.f32 %v390_v6 }
 0x19c   :  { %5739 = vst [vmem:[#allocation93_spill] sm:$0xff] %v4637_v32  ;;  %3352 = vmatpush3.bf16.msra.mxu1 %v1182_v21  ;;  %5743 = vst [vmem:[#allocation97_spill] sm:$0xff] %v4651_v20  ;;  %v1184_v59 = vpack.c.bf16 %v4637_v32, %v4645_v54  ;;  %v4657_v3 = vpop.eup %3834  ;;  %v392_v21 = vadd.f32 1.0, %v321_v41  ;;  %v395_v32 = vadd.f32 1.0, %v327_v18 }
 0x19d   :  { %5740 = vst [vmem:[#allocation94_spill] sm:$0xff] %v4640_v56  ;;  %v3263_v7 = vpop.f32.mrb[48].mxu0  ;;  %v1183_v50 = vpack.c.bf16 %v4640_v56, %v4634_v23  ;;  %5744 = vst [vmem:[#allocation98_spill] sm:$0xff] %v4657_v3  ;;  %v4663_v27 = vpop.eup %3836  ;;  %v4665_v23 = vld [vmem:[#allocation2 + $0x88] sm:$0xff]  }
 0x19e   :  { %v1034_v34 = vpop.f32.mrb[49].mxu0  ;;  %v1043_v25 = vadd.f32 %v3263_v7, %v4186_v57  ;;  %5745 = vst [vmem:[#allocation99_spill] sm:$0xff] %v4663_v27  ;;  %5746 = vst [vmem:[#allocation100_spill] sm:$0xff] %v4665_v23  ;;  %v329_v7 = vpop.xlane.xlu0 %328  ;;  %3846 = vrsqrt.f32 %v392_v21 }
 0x19f   :  { %v1035_v40 = vadd.f32 %v4186_v57, %v1034_v34  ;;  %v3264_v22 = vpop.f32.mrb[50].mxu0  ;;  %3338 = vmatmul.mubr.bf16.gmra.mrb[28].mxu1 %v4631_v2  ;;  %3353 = vmatprep.subr.bf16.mxu1 %v1183_v50  ;;  %v331_v2 = vpop.xlane.xlu1 %330  ;;  %3848 = vrsqrt.f32 %v393_v29  ;;  %v396_v21 = vadd.f32 1.0, %v329_v7 }
 0x1a0   :  { %v1046_v43 = vadd.f32 %v3264_v22, %v4186_v57  ;;  %v1037_v56 = vpop.f32.mrb[51].mxu0  ;;  %3354 = vmatpush3.bf16.msra.mxu1 %v1183_v50  ;;  %3357 = vmatprep.mubr.bf16.mxu1 %v4642_v42  ;;  %v4676_v22 = vld [vmem:[#allocation2 + $0x90] sm:$0xff]   ;;  %v4683_v42 = vpop.eup %3838  ;;  %3850 = vrsqrt.f32 %v395_v32 }
 0x1a1   :  { %v1038_v34 = vadd.f32 %v4186_v57, %v1037_v56  ;;  %3355 = vmatprep.subr.bf16.mxu1 %v1184_v59  ;;  %v4668_v41 = vmul.f32 %v4649_v30, %v1035_v40  ;;  %5750 = vst [vmem:[#allocation104_spill] sm:$0xff] %v4676_v22  ;;  %v4679_v56 = vmul.f32 %v4663_v27, %v1043_v25  ;;  %5751 = vst [vmem:[#allocation105_spill] sm:$0xff] %v4683_v42 }
 0x1a2   :  { %v4671_v6 = vmul.f32 %v4657_v3, %v1046_v43  ;;  %3852 = vrsqrt.f32 %v394_v60  ;;  %v333_v30 = vpop.xlane.xlu0 %332 }
 0x1a3   :  { %5747 = vst [vmem:[#allocation101_spill] sm:$0xff] %v4668_v41  ;;  %v4674_v50 = vmul.f32 %v4651_v20, %v1038_v34  ;;  %v4685_v34 = vpop.eup %3840  ;;  %v335_v29 = vpop.xlane.xlu1 %334  ;;  %3854 = vrsqrt.f32 %v396_v21 }
 0x1a4   :  { %5748 = vst [vmem:[#allocation102_spill] sm:$0xff] %v4671_v6  ;;  %3356 = vmatpush3.bf16.msra.mxu1 %v1184_v59  ;;  %5752 = vst [vmem:[#allocation106_spill] sm:$0xff] %v4685_v34  ;;  %v1186_v15 = vpack.c.bf16 %v4671_v6, %v4679_v56  ;;  %v4691_v59 = vpop.eup %3842  ;;  %v399_v6 = vadd.f32 1.0, %v335_v29 }
 0x1a5   :  { %5749 = vst [vmem:[#allocation103_spill] sm:$0xff] %v4674_v50  ;;  %v3267_v18 = vpop.f32.mrb[52].mxu0  ;;  %v1185_v40 = vpack.c.bf16 %v4674_v50, %v4668_v41  ;;  %5753 = vst [vmem:[#allocation107_spill] sm:$0xff] %v4691_v59  ;;  %v4697_v27 = vpop.eup %3844  ;;  %v4699_v41 = vld [vmem:[#allocation2 + $0x98] sm:$0xff]  }
 0x1a6   :  { %v1050_v43 = vpop.f32.mrb[53].mxu0  ;;  %5754 = vst [vmem:[#allocation108_spill] sm:$0xff] %v4697_v27  ;;  %5755 = vst [vmem:[#allocation109_spill] sm:$0xff] %v4699_v41 }
 0x1a7   :  { %v1051_v20 = vadd.f32 %v4186_v57, %v1050_v43  ;;  %v3268_v3 = vpop.f32.mrb[54].mxu0  ;;  %3358 = vmatmul.mubr.bf16.vlgmr.msra.gmra.mrb[32].mxu1 %v4665_v23  ;;  %3373 = vmatprep.subr.bf16.mxu1 %v1185_v40  ;;  %v1059_v43 = vadd.f32 %v3267_v18, %v4186_v57  ;;  %v397_v23 = vadd.f32 1.0, %v331_v2  ;;  %v4710_v18 = vld [vmem:[#allocation2 + $0xa0] sm:$0xff]  }
 0x1a8   :  { %v1062_v25 = vadd.f32 %v3268_v3, %v4186_v57  ;;  %v1053_v32 = vpop.f32.mrb[55].mxu0  ;;  %3374 = vmatpush3.bf16.msra.mxu1 %v1185_v40  ;;  %3361 = vmatprep.mubr.bf16.mxu1 %v4676_v22  ;;  %5757 = vst [vmem:[#allocation111_spill] sm:$0xff] %v4710_v18  ;;  %v4717_v29 = vpop.eup %3846 }
 0x1a9   :  { %v1054_v50 = vadd.f32 %v4186_v57, %v1053_v32  ;;  %3375 = vmatprep.subr.bf16.mxu1 %v1186_v15  ;;  %v4702_v7 = vmul.f32 %v4683_v42, %v1051_v20  ;;  %v398_v57 = vadd.f32 1.0, %v333_v30  ;;  %v4713_v2 = vmul.f32 %v4697_v27, %v1059_v43  ;;  %5758 = vst [vmem:[#allocation112_spill] sm:$0xff] %v4717_v29  ;;  %v4719_v32 = vpop.eup %3848 }
 0x1aa   :  { %v4705_v3 = vmul.f32 %v4691_v59, %v1062_v25  ;;  %3856 = vrsqrt.f32 %v397_v23  ;;  %5759 = vst [vmem:[#allocation113_spill] sm:$0xff] %v4719_v32  ;;  %v4727_v21 = vpop.eup %3850 }
 0x1ab   :  { %v4708_v60 = vmul.f32 %v4685_v34, %v1054_v50  ;;  %3858 = vrsqrt.f32 %v399_v6  ;;  %v3876_v50 = vld [vmem:[%s5433_s3] ss:$0 sm:$0xff]  ;;  %5760 = vst [vmem:[#allocation114_spill] sm:$0xff] %v4727_v21 }
 0x1ac   :  { %3376 = vmatpush3.bf16.msra.mxu1 %v1186_v15  ;;  %v1188_v23 = vpack.c.bf16 %v4705_v3, %v4713_v2  ;;  %3860 = vrsqrt.f32 %v398_v57  ;;  %v4730_v59 = vpop.eup %3852 }
 0x1ad   :  { %5756 = vst [vmem:[#allocation110_spill] sm:$0xff] %v4708_v60  ;;  %v3271_v40 = vpop.f32.mrb[56].mxu0  ;;  %v1187_v20 = vpack.c.bf16 %v4708_v60, %v4702_v7  ;;  %5761 = vst [vmem:[#allocation115_spill] sm:$0xff] %v4730_v59 }
 0x1ae   :  { %v1066_v25 = vpop.f32.mrb[57].mxu0  ;;  %v1075_v22 = vadd.f32 %v3876_v50, %v3271_v40 }
 0x1af   :  { %v1067_v30 = vadd.f32 %v3876_v50, %v1066_v25  ;;  %v3272_v15 = vpop.f32.mrb[58].mxu0  ;;  %3362 = vmatmul.mubr.bf16.gmra.mrb[36].mxu1 %v4699_v41  ;;  %3377 = vmatprep.subr.bf16.mxu1 %v1187_v20  ;;  %v4732_v25 = vld [vmem:[#allocation2 + $0xa8] sm:$0xff]  }
 0x1b0   :  { %v1078_v43 = vadd.f32 %v3876_v50, %v3272_v15  ;;  %v1069_v6 = vpop.f32.mrb[59].mxu0  ;;  %3378 = vmatpush3.bf16.msra.mxu1 %v1187_v20  ;;  %3365 = vmatprep.mubr.bf16.mxu1 %v4710_v18  ;;  %5762 = vst [vmem:[#allocation116_spill] sm:$0xff] %v4732_v25  ;;  %v4743_v15 = vld [vmem:[#allocation2 + $0xb0] sm:$0xff]   ;;  %v4746_v40 = vmul.f32 %v4730_v59, %v1075_v22  ;;  %v4750_v18 = vpop.eup %3854 }
 0x1b1   :  { %v1070_v34 = vadd.f32 %v3876_v50, %v1069_v6  ;;  %3379 = vmatprep.subr.bf16.mxu1 %v1188_v23  ;;  %v4735_v41 = vmul.f32 %v4717_v29, %v1067_v30  ;;  %5766 = vst [vmem:[#allocation120_spill] sm:$0xff] %v4743_v15 }
 0x1b2   :  { %v4738_v60 = vmul.f32 %v4727_v21, %v1078_v43 }
 0x1b3   :  { %5763 = vst [vmem:[#allocation117_spill] sm:$0xff] %v4735_v41  ;;  %v4741_v57 = vmul.f32 %v4719_v32, %v1070_v34 }
 0x1b4   :  { %5764 = vst [vmem:[#allocation118_spill] sm:$0xff] %v4738_v60  ;;  %3380 = vmatpush3.bf16.msra.mxu1 %v1188_v23  ;;  %v4752_v29 = vpop.eup %3856  ;;  %v1190_v34 = vpack.c.bf16 %v4738_v60, %v4746_v40 }
 0x1b5   :  { %5765 = vst [vmem:[#allocation119_spill] sm:$0xff] %v4741_v57  ;;  %v3275_v20 = vpop.f32.mrb[60].mxu0  ;;  %v1189_v6 = vpack.c.bf16 %v4741_v57, %v4735_v41  ;;  %5767 = vst [vmem:[#allocation121_spill] sm:$0xff] %v4752_v29  ;;  %v4757_v23 = vpop.eup %3858 }
 0x1b6   :  { %v1082_v30 = vpop.f32.mrb[61].mxu0  ;;  %5768 = vst [vmem:[#allocation122_spill] sm:$0xff] %v4757_v23  ;;  %v1091_v57 = vadd.f32 %v3876_v50, %v3275_v20  ;;  %v4760_v41 = vpop.eup %3860 }
 0x1b7   :  { %v1083_v43 = vadd.f32 %v3876_v50, %v1082_v30  ;;  %v3276_v21 = vpop.f32.mrb[62].mxu0  ;;  %3366 = vmatmul.mubr.bf16.gmra.mrb[40].mxu1 %v4732_v25  ;;  %3381 = vmatprep.subr.bf16.mxu1 %v1189_v6  ;;  %v4762_v30 = vld [vmem:[#allocation2 + $0xb8] sm:$0xff]  }
 0x1b8   :  { %v1094_v22 = vadd.f32 %v3876_v50, %v3276_v21  ;;  %v1085_v32 = vpop.f32.mrb[63].mxu0  ;;  %3382 = vmatpush3.bf16.msra.mxu1 %v1189_v6  ;;  %3369 = vmatprep.mubr.bf16.mxu1 %v4743_v15  ;;  %5769 = vst [vmem:[#allocation123_spill] sm:$0xff] %v4762_v30  ;;  %v4773_v21 = vld [vmem:[#allocation2 + $0xc0] sm:$0xff]   ;;  %v4776_v20 = vmul.f32 %v4760_v41, %v1091_v57  ;;  %v4786_v6 = vld [vmem:[#allocation2 + $0xd0] sm:$0xff]   ;;  %v4790_v57 = vld [vmem:[#allocation2 + $0xd8] sm:$0xff]  }
 0x1b9   :  { %v1086_v59 = vadd.f32 %v3876_v50, %v1085_v32  ;;  %3383 = vmatprep.subr.bf16.mxu1 %v1190_v34  ;;  %v4765_v25 = vmul.f32 %v4750_v18, %v1083_v43  ;;  %5771 = vst [vmem:[#allocation125_spill] sm:$0xff] %v4773_v21  ;;  %5773 = vst [vmem:[#allocation127_spill] sm:$0xff] %v4786_v6  ;;  %v4792_v43 = vld [vmem:[#allocation2 + $0xe0] sm:$0xff]  }
 0x1ba   :  { %v4768_v42 = vmul.f32 %v4757_v23, %v1094_v22  ;;  %5774 = vst [vmem:[#allocation128_spill] sm:$0xff] %v4790_v57  ;;  %5775 = vst [vmem:[#allocation129_spill] sm:$0xff] %v4792_v43  ;;  %v4798_v22 = vld [vmem:[#allocation2 + $0xf0] sm:$0xff]  }
 0x1bb   :  { %v4771_v60 = vmul.f32 %v4752_v29, %v1086_v59  ;;  %v4784_v59 = vld [vmem:[#allocation2 + $0xc8] sm:$0xff]   ;;  %5777 = vst [vmem:[#allocation131_spill] sm:$0xff] %v4798_v22 }
 0x1bc   :  { %3384 = vmatpush3.bf16.msra.mxu1 %v1190_v34  ;;  %v1192_v50 = vpack.c.bf16 %v4768_v42, %v4776_v20  ;;  %5772 = vst [vmem:[#allocation126_spill] sm:$0xff] %v4784_v59  ;;  %v4796_v34 = vld [vmem:[#allocation2 + $0xe8] sm:$0xff]  }
 0x1bd   :  { %5770 = vst [vmem:[#allocation124_spill] sm:$0xff] %v4771_v60  ;;  %v1191_v32 = vpack.c.bf16 %v4771_v60, %v4765_v25  ;;  %5776 = vst [vmem:[#allocation130_spill] sm:$0xff] %v4796_v34 }
 0x1bf   :  { %3370 = vmatmul.mubr.bf16.gmra.mrb[44].mxu1 %v4762_v30  ;;  %3385 = vmatprep.subr.bf16.mxu1 %v1191_v32 }
 0x1c0   :  { %3386 = vmatpush3.bf16.msra.mxu1 %v1191_v32  ;;  %3389 = vmatprep.mubr.bf16.mxu1 %v4773_v21  ;;  %v4802_v32 = vld [vmem:[#allocation2 + $0xf8] sm:$0xff]  }
 0x1c1   :  { %3387 = vmatprep.subr.bf16.mxu1 %v1192_v50  ;;  %5778 = vst [vmem:[#allocation132_spill] sm:$0xff] %v4802_v32 }
 0x1c4   :  { %3388 = vmatpush3.bf16.msra.mxu1 %v1192_v50 }
 0x1c7   :  { %3390 = vmatmul.mubr.bf16.vlgmr.msra.gmra.mrb[48].mxu1 %v4784_v59 }
 0x1c8   :  { %3393 = vmatprep.mubr.bf16.mxu1 %v4786_v6 }
 0x1cf   :  { %3394 = vmatmul.mubr.bf16.gmra.mrb[52].mxu1 %v4790_v57 }
 0x1d0   :  { %3397 = vmatprep.mubr.bf16.mxu1 %v4792_v43 }
 0x1d7   :  { %3398 = vmatmul.mubr.bf16.gmra.mrb[56].mxu1 %v4796_v34 }
 0x1d8   :  { %3401 = vmatprep.mubr.bf16.mxu1 %v4798_v22 }
 0x1df   :  { %3402 = vmatmul.mubr.bf16.gmra.mrb[60].mxu1 %v4802_v32 }
 0x1e0   :  { %3501 = vmatprep.mubr.bf16.mxu1 %v4124_v8 }
 0x23a   :  { %v3295_v50 = vpop.f32.mrb[0].mxu1 }
 0x23b   :  { %v1284_v6 = vadd.f32 %v3295_v50, %v4216_v19  ;;  %v1275_v57 = vpop.f32.mrb[1].mxu1 }
 0x23c   :  { %v1276_v43 = vadd.f32 %v1275_v57, %v4205_v13  ;;  %v3296_v59 = vpop.f32.mrb[2].mxu1 }
 0x23d   :  { %v1775_v21 = vmul.f32 %v4202_v10, %v1284_v6  ;;  %v1287_v30 = vadd.f32 %v3296_v59, %v4208_v14  ;;  %v1278_v34 = vpop.f32.mrb[3].mxu1 }
 0x23e   :  { %v1773_v22 = vmul.f32 %v4196_v4, %v1276_v43  ;;  %v1279_v15 = vadd.f32 %v1278_v34, %v4211_v16 }
 0x23f   :  { %v1776_v32 = vmul.f32 %v4193_v0, %v1287_v30  ;;  %v1839_v29 = vmax.f32 %v1775_v21, 0.0 }
 0x240   :  { %v1774_v8 = vmul.f32 %v4190_v61, %v1279_v15  ;;  %v1837_v19 = vmax.f32 %v1773_v22, 0.0 }
 0x241   :  { %v1840_v23 = vmax.f32 %v1776_v32, 0.0 }
 0x242   :  { %v1838_v50 = vmax.f32 %v1774_v8, 0.0  ;;  %v3299_v60 = vpop.f32.mrb[4].mxu1 }
 0x243   :  { %v1902_v13 = vpack.c.bf16 %v1840_v23, %v1839_v29  ;;  %v1300_v57 = vadd.f32 %v3299_v60, %v4252_v1  ;;  %v1291_v6 = vpop.f32.mrb[5].mxu1 }
 0x244   :  { %v1292_v14 = vadd.f32 %v1291_v6, %v4242_v35  ;;  %v3300_v59 = vpop.f32.mrb[6].mxu1  ;;  %v1901_v10 = vpack.c.bf16 %v1838_v50, %v1837_v19 }
 0x245   :  { %v1779_v43 = vmul.f32 %v4238_v58, %v1300_v57  ;;  %v1303_v16 = vadd.f32 %v3300_v59, %v4245_v62  ;;  %v1294_v30 = vpop.f32.mrb[7].mxu1  ;;  %v5779_v59 = vld [vmem:[#allocation26_spill] sm:$0xff] }
 0x246   :  { %v1777_v15 = vmul.f32 %v4220_v24, %v1292_v14  ;;  %v1295_v21 = vadd.f32 %v1294_v30, %v4248_v63  ;;  %3421 = vmatprep.mubr.bf16.mxu0 %v1901_v10 }
 0x247   :  { %v1780_v34 = vmul.f32 %v4229_v45, %v1303_v16  ;;  %3422 = vmatmul.mubr.bf16.vlgmr.msra.gmra.mrb[64].mxu0 %v1902_v13  ;;  %v1843_v60 = vmax.f32 %v1779_v43, 0.0 }
 0x248   :  { %v1778_v1 = vmul.f32 %v4222_v26, %v1295_v21  ;;  %v1841_v35 = vmax.f32 %v1777_v15, 0.0 }
 0x249   :  { %v1844_v29 = vmax.f32 %v1780_v34, 0.0 }
 0x24a   :  { %v1842_v23 = vmax.f32 %v1778_v1, 0.0  ;;  %v3303_v22 = vpop.f32.mrb[8].mxu1  ;;  %v5781_v1 = vld [vmem:[#allocation34_spill] sm:$0xff] }
 0x24b   :  { %v1316_v32 = vadd.f32 %v3303_v22, %v4290_v38  ;;  %v1307_v8 = vpop.f32.mrb[9].mxu1  ;;  %v1904_v62 = vpack.c.bf16 %v1844_v29, %v1843_v60  ;;  %v5780_v38 = vld [vmem:[#allocation25_spill] sm:$0xff] }
 0x24c   :  { %v1308_v19 = vadd.f32 %v1307_v8, %v4278_v52  ;;  %v3304_v50 = vpop.f32.mrb[10].mxu1  ;;  %v1903_v57 = vpack.c.bf16 %v1842_v23, %v1841_v35  ;;  %v5782_v35 = vld [vmem:[#allocation31_spill] sm:$0xff] }
 0x24d   :  { %v1783_v10 = vmul.f32 %v4274_v48, %v1316_v32  ;;  %v1319_v63 = vadd.f32 %v3304_v50, %v4281_v39  ;;  %v1310_v13 = vpop.f32.mrb[11].mxu1 }
 0x24e   :  { %v1781_v6 = vmul.f32 %v4258_v5, %v1308_v19  ;;  %v1311_v14 = vadd.f32 %v1310_v13, %v4284_v53  ;;  %3425 = vmatprep.mubr.bf16.mxu0 %v1903_v57  ;;  %v5783_v53 = vld [vmem:[#allocation30_spill] sm:$0xff]  ;;  %v5784_v19 = vld [vmem:[#allocation32_spill] sm:$0xff]  ;;  %v5785_v57 = vld [vmem:[#allocation27_spill] sm:$0xff] }
 0x24f   :  { %v1784_v43 = vmul.f32 %v5779_v59, %v1319_v63  ;;  %3426 = vmatmul.mubr.bf16.gmra.mrb[68].mxu0 %v1904_v62  ;;  %v1847_v30 = vmax.f32 %v1783_v10, 0.0  ;;  %v5786_v10 = vld [vmem:[#allocation33_spill] sm:$0xff] }
 0x250   :  { %v1782_v16 = vmul.f32 %v5780_v38, %v1311_v14  ;;  %v1845_v52 = vmax.f32 %v1781_v6, 0.0  ;;  %v5787_v6 = vld [vmem:[#allocation29_spill] sm:$0xff] }
 0x251   :  { %v1848_v15 = vmax.f32 %v1784_v43, 0.0  ;;  %v5788_v43 = vld [vmem:[#allocation28_spill] sm:$0xff] }
 0x252   :  { %v1846_v21 = vmax.f32 %v1782_v16, 0.0  ;;  %v3307_v34 = vpop.f32.mrb[12].mxu1 }
 0x253   :  { %v1332_v60 = vadd.f32 %v3307_v34, %v5781_v1  ;;  %v1323_v29 = vpop.f32.mrb[13].mxu1  ;;  %v1906_v39 = vpack.c.bf16 %v1848_v15, %v1847_v30 }
 0x254   :  { %v1324_v23 = vadd.f32 %v1323_v29, %v5782_v35  ;;  %v3308_v22 = vpop.f32.mrb[14].mxu1  ;;  %v1905_v32 = vpack.c.bf16 %v1846_v21, %v1845_v52 }
 0x255   :  { %v1787_v8 = vmul.f32 %v5783_v53, %v1332_v60  ;;  %v1335_v50 = vadd.f32 %v3308_v22, %v5784_v19  ;;  %v1326_v62 = vpop.f32.mrb[15].mxu1  ;;  %v5789_v19 = vld [vmem:[#allocation38_spill] sm:$0xff] }
 0x256   :  { %v1785_v63 = vmul.f32 %v5785_v57, %v1324_v23  ;;  %v1327_v13 = vadd.f32 %v1326_v62, %v5786_v10  ;;  %3429 = vmatprep.mubr.bf16.mxu0 %v1905_v32  ;;  %v5790_v62 = vld [vmem:[#allocation35_spill] sm:$0xff] }
 0x257   :  { %v1788_v14 = vmul.f32 %v5787_v6, %v1335_v50  ;;  %3430 = vmatmul.mubr.bf16.gmra.mrb[72].mxu0 %v1906_v39  ;;  %v1851_v30 = vmax.f32 %v1787_v8, 0.0  ;;  %v5791_v8 = vld [vmem:[#allocation39_spill] sm:$0xff] }
 0x258   :  { %v1786_v16 = vmul.f32 %v5788_v43, %v1327_v13  ;;  %v1849_v34 = vmax.f32 %v1785_v63, 0.0  ;;  %v5792_v63 = vld [vmem:[#allocation37_spill] sm:$0xff] }
 0x259   :  { %v1852_v15 = vmax.f32 %v1788_v14, 0.0 }
 0x25a   :  { %v1850_v1 = vmax.f32 %v1786_v16, 0.0  ;;  %v3327_v52 = vpop.f32.mrb[16].mxu1 }
 0x25b   :  { %v1429_v21 = vadd.f32 %v3327_v52, %v4364_v36  ;;  %v1420_v60 = vpop.f32.mrb[17].mxu1  ;;  %v1908_v29 = vpack.c.bf16 %v1852_v15, %v1851_v30  ;;  %v5793_v36 = vld [vmem:[#allocation36_spill] sm:$0xff] }
 0x25c   :  { %v1421_v35 = vadd.f32 %v1420_v60, %v4354_v51  ;;  %v3328_v23 = vpop.f32.mrb[18].mxu1  ;;  %v1907_v22 = vpack.c.bf16 %v1850_v1, %v1849_v34 }
 0x25d   :  { %v1791_v32 = vmul.f32 %v4350_v33, %v1429_v21  ;;  %v1432_v50 = vadd.f32 %v3328_v23, %v5789_v19  ;;  %v1423_v39 = vpop.f32.mrb[19].mxu1 }
 0x25e   :  { %v1789_v10 = vmul.f32 %v5790_v62, %v1421_v35  ;;  %v1424_v13 = vadd.f32 %v1423_v39, %v5791_v8  ;;  %3433 = vmatprep.mubr.bf16.mxu0 %v1907_v22  ;;  %v5794_v39 = vld [vmem:[#allocation44_spill] sm:$0xff] }
 0x25f   :  { %v1792_v14 = vmul.f32 %v5792_v63, %v1432_v50  ;;  %3434 = vmatmul.mubr.bf16.gmra.mrb[76].mxu0 %v1908_v29  ;;  %v1855_v30 = vmax.f32 %v1791_v32, 0.0  ;;  %v5795_v8 = vld [vmem:[#allocation40_spill] sm:$0xff]  ;;  %v5796_v32 = vld [vmem:[#allocation45_spill] sm:$0xff] }
 0x260   :  { %v1790_v16 = vmul.f32 %v5793_v36, %v1424_v13  ;;  %v1853_v51 = vmax.f32 %v1789_v10, 0.0  ;;  %v5797_v10 = vld [vmem:[#allocation42_spill] sm:$0xff] }
 0x261   :  { %v1856_v15 = vmax.f32 %v1792_v14, 0.0 }
 0x262   :  { %v1854_v52 = vmax.f32 %v1790_v16, 0.0  ;;  %v3331_v34 = vpop.f32.mrb[20].mxu1 }
 0x263   :  { %v1445_v1 = vadd.f32 %v3331_v34, %v4404_v44  ;;  %v1436_v21 = vpop.f32.mrb[21].mxu1  ;;  %v1910_v60 = vpack.c.bf16 %v1856_v15, %v1855_v30  ;;  %v5798_v44 = vld [vmem:[#allocation41_spill] sm:$0xff] }
 0x264   :  { %v1437_v23 = vadd.f32 %v1436_v21, %v4392_v17  ;;  %v3332_v35 = vpop.f32.mrb[22].mxu1  ;;  %v1909_v19 = vpack.c.bf16 %v1854_v52, %v1853_v51 }
 0x265   :  { %v1795_v22 = vmul.f32 %v4388_v37, %v1445_v1  ;;  %v1448_v50 = vadd.f32 %v3332_v35, %v5794_v39  ;;  %v1439_v29 = vpop.f32.mrb[23].mxu1 }
 0x266   :  { %v1793_v13 = vmul.f32 %v5795_v8, %v1437_v23  ;;  %v1440_v14 = vadd.f32 %v1439_v29, %v5796_v32  ;;  %3437 = vmatprep.mubr.bf16.mxu0 %v1909_v19 }
 0x267   :  { %v1796_v16 = vmul.f32 %v5797_v10, %v1448_v50  ;;  %3438 = vmatmul.mubr.bf16.gmra.mrb[80].mxu0 %v1910_v60  ;;  %v1859_v30 = vmax.f32 %v1795_v22, 0.0  ;;  %v5799_v22 = vld [vmem:[#allocation50_spill] sm:$0xff] }
 0x268   :  { %v1794_v34 = vmul.f32 %v5798_v44, %v1440_v14  ;;  %v1857_v17 = vmax.f32 %v1793_v13, 0.0  ;;  %v5800_v13 = vld [vmem:[#allocation48_spill] sm:$0xff] }
 0x269   :  { %v1860_v15 = vmax.f32 %v1796_v16, 0.0 }
 0x26a   :  { %v1858_v21 = vmax.f32 %v1794_v34, 0.0  ;;  %v3335_v51 = vpop.f32.mrb[24].mxu1 }
 0x26b   :  { %v1461_v52 = vadd.f32 %v3335_v51, %v4444_v49  ;;  %v1452_v1 = vpop.f32.mrb[25].mxu1  ;;  %v1912_v35 = vpack.c.bf16 %v1860_v15, %v1859_v30  ;;  %v5801_v49 = vld [vmem:[#allocation47_spill] sm:$0xff] }
 0x26c   :  { %v1453_v39 = vadd.f32 %v1452_v1, %v4432_v9  ;;  %v3336_v23 = vpop.f32.mrb[26].mxu1  ;;  %v1911_v37 = vpack.c.bf16 %v1858_v21, %v1857_v17 }
 0x26d   :  { %v1799_v19 = vmul.f32 %v4428_v12, %v1461_v52  ;;  %v1464_v50 = vadd.f32 %v3336_v23, %v4435_v47  ;;  %v1455_v60 = vpop.f32.mrb[27].mxu1  ;;  %v5802_v52 = vld [vmem:[#allocation56_spill] sm:$0xff]  ;;  %v5805_v12 = vld [vmem:[#allocation51_spill] sm:$0xff] }
 0x26e   :  { %v1797_v29 = vmul.f32 %v4410_v11, %v1453_v39  ;;  %v1456_v32 = vadd.f32 %v1455_v60, %v5799_v22  ;;  %3441 = vmatprep.mubr.bf16.mxu0 %v1911_v37  ;;  %v5803_v60 = vld [vmem:[#allocation54_spill] sm:$0xff]  ;;  %v5804_v22 = vld [vmem:[#allocation57_spill] sm:$0xff] }
 0x26f   :  { %v1800_v14 = vmul.f32 %v5800_v13, %v1464_v50  ;;  %3442 = vmatmul.mubr.bf16.gmra.mrb[84].mxu0 %v1912_v35  ;;  %v1863_v34 = vmax.f32 %v1799_v19, 0.0  ;;  %v5806_v19 = vld [vmem:[#allocation58_spill] sm:$0xff] }
 0x270   :  { %v1798_v16 = vmul.f32 %v5801_v49, %v1456_v32  ;;  %v1861_v9 = vmax.f32 %v1797_v29, 0.0  ;;  %v5807_v29 = vld [vmem:[#allocation53_spill] sm:$0xff] }
 0x271   :  { %v1864_v30 = vmax.f32 %v1800_v14, 0.0 }
 0x272   :  { %v1862_v15 = vmax.f32 %v1798_v16, 0.0  ;;  %v3339_v17 = vpop.f32.mrb[28].mxu1 }
 0x273   :  { %v1477_v21 = vadd.f32 %v3339_v17, %v4486_v31  ;;  %v1468_v51 = vpop.f32.mrb[29].mxu1  ;;  %v1914_v47 = vpack.c.bf16 %v1864_v30, %v1863_v34  ;;  %v5808_v31 = vld [vmem:[#allocation52_spill] sm:$0xff] }
 0x274   :  { %v1469_v1 = vadd.f32 %v1468_v51, %v5802_v52  ;;  %v3340_v39 = vpop.f32.mrb[30].mxu1  ;;  %v1913_v23 = vpack.c.bf16 %v1862_v15, %v1861_v9 }
 0x275   :  { %v1803_v37 = vmul.f32 %v5803_v60, %v1477_v21  ;;  %v1480_v50 = vadd.f32 %v3340_v39, %v5804_v22  ;;  %v1471_v35 = vpop.f32.mrb[31].mxu1  ;;  %v5809_v22 = vld [vmem:[#allocation65_spill] sm:$0xff] }
 0x276   :  { %v1801_v32 = vmul.f32 %v5805_v12, %v1469_v1  ;;  %v1472_v14 = vadd.f32 %v1471_v35, %v5806_v19  ;;  %3445 = vmatprep.mubr.bf16.mxu0 %v1913_v23  ;;  %v5810_v35 = vld [vmem:[#allocation63_spill] sm:$0xff]  ;;  %v5811_v19 = vld [vmem:[#allocation66_spill] sm:$0xff] }
 0x277   :  { %v1804_v16 = vmul.f32 %v5807_v29, %v1480_v50  ;;  %3446 = vmatmul.mubr.bf16.gmra.mrb[88].mxu0 %v1914_v47  ;;  %v1867_v34 = vmax.f32 %v1803_v37, 0.0  ;;  %v5812_v29 = vld [vmem:[#allocation60_spill] sm:$0xff]  ;;  %v5813_v37 = vld [vmem:[#allocation67_spill] sm:$0xff] }
 0x278   :  { %v1802_v17 = vmul.f32 %v5808_v31, %v1472_v14  ;;  %v1865_v51 = vmax.f32 %v1801_v32, 0.0  ;;  %v5814_v32 = vld [vmem:[#allocation62_spill] sm:$0xff] }
 0x279   :  { %v1868_v30 = vmax.f32 %v1804_v16, 0.0 }
 0x27a   :  { %v1866_v52 = vmax.f32 %v1802_v17, 0.0  ;;  %v3359_v9 = vpop.f32.mrb[32].mxu1 }
 0x27b   :  { %v1574_v15 = vadd.f32 %v3359_v9, %v4530_v55  ;;  %v1565_v21 = vpop.f32.mrb[33].mxu1  ;;  %v1916_v39 = vpack.c.bf16 %v1868_v30, %v1867_v34  ;;  %v5815_v55 = vld [vmem:[#allocation61_spill] sm:$0xff] }
 0x27c   :  { %v1566_v60 = vadd.f32 %v1565_v21, %v5809_v22  ;;  %v3360_v1 = vpop.f32.mrb[34].mxu1  ;;  %v1915_v12 = vpack.c.bf16 %v1866_v52, %v1865_v51 }
 0x27d   :  { %v1807_v23 = vmul.f32 %v5810_v35, %v1574_v15  ;;  %v1577_v50 = vadd.f32 %v3360_v1, %v5811_v19  ;;  %v1568_v47 = vpop.f32.mrb[35].mxu1  ;;  %v5816_v19 = vld [vmem:[#allocation74_spill] sm:$0xff] }
 0x27e   :  { %v1805_v14 = vmul.f32 %v5812_v29, %v1566_v60  ;;  %v1569_v16 = vadd.f32 %v1568_v47, %v5813_v37  ;;  %3449 = vmatprep.mubr.bf16.mxu0 %v1915_v12  ;;  %v5817_v47 = vld [vmem:[#allocation72_spill] sm:$0xff]  ;;  %v5818_v37 = vld [vmem:[#allocation75_spill] sm:$0xff] }
 0x27f   :  { %v1808_v17 = vmul.f32 %v5814_v32, %v1577_v50  ;;  %3450 = vmatmul.mubr.bf16.gmra.mrb[92].mxu0 %v1916_v39  ;;  %v1871_v34 = vmax.f32 %v1807_v23, 0.0  ;;  %v5819_v32 = vld [vmem:[#allocation69_spill] sm:$0xff]  ;;  %v5820_v23 = vld [vmem:[#allocation76_spill] sm:$0xff] }
 0x280   :  { %v1806_v9 = vmul.f32 %v5815_v55, %v1569_v16  ;;  %v1869_v21 = vmax.f32 %v1805_v14, 0.0  ;;  %v5821_v14 = vld [vmem:[#allocation71_spill] sm:$0xff] }
 0x281   :  { %v1872_v30 = vmax.f32 %v1808_v17, 0.0 }
 0x282   :  { %v1870_v22 = vmax.f32 %v1806_v9, 0.0  ;;  %v3363_v51 = vpop.f32.mrb[36].mxu1 }
 0x283   :  { %v1590_v52 = vadd.f32 %v3363_v51, %v4572_v46  ;;  %v1581_v15 = vpop.f32.mrb[37].mxu1  ;;  %v1918_v1 = vpack.c.bf16 %v1872_v30, %v1871_v34  ;;  %v5822_v46 = vld [vmem:[#allocation70_spill] sm:$0xff] }
 0x284   :  { %v1582_v35 = vadd.f32 %v1581_v15, %v5816_v19  ;;  %v3364_v60 = vpop.f32.mrb[38].mxu1  ;;  %v1917_v29 = vpack.c.bf16 %v1870_v22, %v1869_v21 }
 0x285   :  { %v1811_v12 = vmul.f32 %v5817_v47, %v1590_v52  ;;  %v1593_v50 = vadd.f32 %v3364_v60, %v5818_v37  ;;  %v1584_v39 = vpop.f32.mrb[39].mxu1  ;;  %v5823_v37 = vld [vmem:[#allocation83_spill] sm:$0xff] }
 0x286   :  { %v1809_v16 = vmul.f32 %v5819_v32, %v1582_v35  ;;  %v1585_v17 = vadd.f32 %v1584_v39, %v5820_v23  ;;  %3453 = vmatprep.mubr.bf16.mxu0 %v1917_v29  ;;  %v5824_v39 = vld [vmem:[#allocation81_spill] sm:$0xff]  ;;  %v5825_v23 = vld [vmem:[#allocation84_spill] sm:$0xff] }
 0x287   :  { %v1812_v9 = vmul.f32 %v5821_v14, %v1593_v50  ;;  %3454 = vmatmul.mubr.bf16.gmra.mrb[96].mxu0 %v1918_v1  ;;  %v1875_v34 = vmax.f32 %v1811_v12, 0.0  ;;  %v5826_v14 = vld [vmem:[#allocation78_spill] sm:$0xff]  ;;  %v5827_v12 = vld [vmem:[#allocation85_spill] sm:$0xff] }
 0x288   :  { %v1810_v51 = vmul.f32 %v5822_v46, %v1585_v17  ;;  %v1873_v15 = vmax.f32 %v1809_v16, 0.0  ;;  %v5828_v16 = vld [vmem:[#allocation80_spill] sm:$0xff] }
 0x289   :  { %v1876_v30 = vmax.f32 %v1812_v9, 0.0 }
 0x28a   :  { %v1874_v19 = vmax.f32 %v1810_v51, 0.0  ;;  %v3367_v21 = vpop.f32.mrb[40].mxu1 }
 0x28b   :  { %v1606_v22 = vadd.f32 %v3367_v21, %v4610_v28  ;;  %v1597_v52 = vpop.f32.mrb[41].mxu1  ;;  %v1920_v60 = vpack.c.bf16 %v1876_v30, %v1875_v34  ;;  %v5829_v28 = vld [vmem:[#allocation79_spill] sm:$0xff] }
 0x28c   :  { %v1598_v47 = vadd.f32 %v1597_v52, %v5823_v37  ;;  %v3368_v35 = vpop.f32.mrb[42].mxu1  ;;  %v1919_v32 = vpack.c.bf16 %v1874_v19, %v1873_v15 }
 0x28d   :  { %v1815_v29 = vmul.f32 %v5824_v39, %v1606_v22  ;;  %v1609_v50 = vadd.f32 %v3368_v35, %v5825_v23  ;;  %v1600_v1 = vpop.f32.mrb[43].mxu1  ;;  %v5830_v23 = vld [vmem:[#allocation92_spill] sm:$0xff] }
 0x28e   :  { %v1813_v17 = vmul.f32 %v5826_v14, %v1598_v47  ;;  %v1601_v9 = vadd.f32 %v1600_v1, %v5827_v12  ;;  %3457 = vmatprep.mubr.bf16.mxu0 %v1919_v32  ;;  %v5831_v1 = vld [vmem:[#allocation90_spill] sm:$0xff]  ;;  %v5832_v12 = vld [vmem:[#allocation93_spill] sm:$0xff] }
 0x28f   :  { %v1816_v51 = vmul.f32 %v5828_v16, %v1609_v50  ;;  %3458 = vmatmul.mubr.bf16.gmra.mrb[100].mxu0 %v1920_v60  ;;  %v1879_v34 = vmax.f32 %v1815_v29, 0.0  ;;  %v5833_v16 = vld [vmem:[#allocation87_spill] sm:$0xff]  ;;  %v5834_v29 = vld [vmem:[#allocation94_spill] sm:$0xff] }
 0x290   :  { %v1814_v21 = vmul.f32 %v5829_v28, %v1601_v9  ;;  %v1877_v52 = vmax.f32 %v1813_v17, 0.0  ;;  %v5835_v17 = vld [vmem:[#allocation89_spill] sm:$0xff] }
 0x291   :  { %v1880_v30 = vmax.f32 %v1816_v51, 0.0 }
 0x292   :  { %v1878_v37 = vmax.f32 %v1814_v21, 0.0  ;;  %v3371_v15 = vpop.f32.mrb[44].mxu1 }
 0x293   :  { %v1622_v19 = vadd.f32 %v3371_v15, %v4645_v54  ;;  %v1613_v22 = vpop.f32.mrb[45].mxu1  ;;  %v1922_v35 = vpack.c.bf16 %v1880_v30, %v1879_v34  ;;  %v5836_v54 = vld [vmem:[#allocation88_spill] sm:$0xff] }
 0x294   :  { %v1614_v39 = vadd.f32 %v1613_v22, %v5830_v23  ;;  %v3372_v47 = vpop.f32.mrb[46].mxu1  ;;  %v1921_v14 = vpack.c.bf16 %v1878_v37, %v1877_v52 }
 0x295   :  { %v1819_v32 = vmul.f32 %v5831_v1, %v1622_v19  ;;  %v1625_v50 = vadd.f32 %v3372_v47, %v5832_v12  ;;  %v1616_v60 = vpop.f32.mrb[47].mxu1  ;;  %v5837_v12 = vld [vmem:[#allocation101_spill] sm:$0xff] }
 0x296   :  { %v1817_v9 = vmul.f32 %v5833_v16, %v1614_v39  ;;  %v1617_v51 = vadd.f32 %v1616_v60, %v5834_v29  ;;  %3461 = vmatprep.mubr.bf16.mxu0 %v1921_v14  ;;  %v5838_v60 = vld [vmem:[#allocation99_spill] sm:$0xff]  ;;  %v5839_v29 = vld [vmem:[#allocation102_spill] sm:$0xff] }
 0x297   :  { %v1820_v21 = vmul.f32 %v5835_v17, %v1625_v50  ;;  %3462 = vmatmul.mubr.bf16.gmra.mrb[104].mxu0 %v1922_v35  ;;  %v1883_v34 = vmax.f32 %v1819_v32, 0.0  ;;  %v5840_v17 = vld [vmem:[#allocation96_spill] sm:$0xff]  ;;  %v5841_v32 = vld [vmem:[#allocation103_spill] sm:$0xff] }
 0x298   :  { %v1818_v15 = vmul.f32 %v5836_v54, %v1617_v51  ;;  %v1881_v22 = vmax.f32 %v1817_v9, 0.0  ;;  %v5842_v9 = vld [vmem:[#allocation98_spill] sm:$0xff] }
 0x299   :  { %v1884_v30 = vmax.f32 %v1820_v21, 0.0 }
 0x29a   :  { %v1882_v23 = vmax.f32 %v1818_v15, 0.0  ;;  %v3391_v52 = vpop.f32.mrb[48].mxu1 }
 0x29b   :  { %v1719_v37 = vadd.f32 %v3391_v52, %v4679_v56  ;;  %v1710_v19 = vpop.f32.mrb[49].mxu1  ;;  %v1924_v47 = vpack.c.bf16 %v1884_v30, %v1883_v34  ;;  %v5843_v56 = vld [vmem:[#allocation97_spill] sm:$0xff] }
 0x29c   :  { %v1711_v1 = vadd.f32 %v1710_v19, %v5837_v12  ;;  %v3392_v39 = vpop.f32.mrb[50].mxu1  ;;  %v1923_v16 = vpack.c.bf16 %v1882_v23, %v1881_v22 }
 0x29d   :  { %v1823_v14 = vmul.f32 %v5838_v60, %v1719_v37  ;;  %v1722_v50 = vadd.f32 %v3392_v39, %v5839_v29  ;;  %v1713_v35 = vpop.f32.mrb[51].mxu1 }
 0x29e   :  { %v1821_v51 = vmul.f32 %v5840_v17, %v1711_v1  ;;  %v1714_v21 = vadd.f32 %v1713_v35, %v5841_v32  ;;  %3465 = vmatprep.mubr.bf16.mxu0 %v1923_v16  ;;  %v5844_v35 = vld [vmem:[#allocation105_spill] sm:$0xff] }
 0x29f   :  { %v1824_v15 = vmul.f32 %v5842_v9, %v1722_v50  ;;  %3466 = vmatmul.mubr.bf16.gmra.mrb[108].mxu0 %v1924_v47  ;;  %v1887_v34 = vmax.f32 %v1823_v14, 0.0  ;;  %v5845_v14 = vld [vmem:[#allocation110_spill] sm:$0xff] }
 0x2a0   :  { %v1822_v52 = vmul.f32 %v5843_v56, %v1714_v21  ;;  %v1885_v19 = vmax.f32 %v1821_v51, 0.0  ;;  %v5846_v51 = vld [vmem:[#allocation107_spill] sm:$0xff] }
 0x2a1   :  { %v1888_v30 = vmax.f32 %v1824_v15, 0.0 }
 0x2a2   :  { %v1886_v12 = vmax.f32 %v1822_v52, 0.0  ;;  %v3395_v22 = vpop.f32.mrb[52].mxu1 }
 0x2a3   :  { %v1735_v23 = vadd.f32 %v3395_v22, %v4713_v2  ;;  %v1726_v37 = vpop.f32.mrb[53].mxu1  ;;  %v1926_v39 = vpack.c.bf16 %v1888_v30, %v1887_v34  ;;  %v5847_v2 = vld [vmem:[#allocation106_spill] sm:$0xff] }
 0x2a4   :  { %v1727_v29 = vadd.f32 %v1726_v37, %v4702_v7  ;;  %v3396_v1 = vpop.f32.mrb[54].mxu1  ;;  %v1925_v60 = vpack.c.bf16 %v1886_v12, %v1885_v19  ;;  %v5848_v37 = vld [vmem:[#allocation117_spill] sm:$0xff] }
 0x2a5   :  { %v1827_v16 = vmul.f32 %v4697_v27, %v1735_v23  ;;  %v1738_v50 = vadd.f32 %v3396_v1, %v4705_v3  ;;  %v1729_v47 = vpop.f32.mrb[55].mxu1 }
 0x2a6   :  { %v1825_v32 = vmul.f32 %v5844_v35, %v1727_v29  ;;  %v1730_v21 = vadd.f32 %v1729_v47, %v5845_v14  ;;  %3469 = vmatprep.mubr.bf16.mxu0 %v1925_v60  ;;  %v5849_v47 = vld [vmem:[#allocation115_spill] sm:$0xff]  ;;  %v5850_v14 = vld [vmem:[#allocation118_spill] sm:$0xff] }
 0x2a7   :  { %v1828_v15 = vmul.f32 %v5846_v51, %v1738_v50  ;;  %3470 = vmatmul.mubr.bf16.gmra.mrb[112].mxu0 %v1926_v39  ;;  %v1891_v34 = vmax.f32 %v1827_v16, 0.0  ;;  %v5851_v51 = vld [vmem:[#allocation112_spill] sm:$0xff]  ;;  %v5852_v16 = vld [vmem:[#allocation119_spill] sm:$0xff] }
 0x2a8   :  { %v1826_v52 = vmul.f32 %v5847_v2, %v1730_v21  ;;  %v1889_v7 = vmax.f32 %v1825_v32, 0.0  ;;  %v5853_v32 = vld [vmem:[#allocation114_spill] sm:$0xff] }
 0x2a9   :  { %v1892_v30 = vmax.f32 %v1828_v15, 0.0 }
 0x2aa   :  { %v1890_v22 = vmax.f32 %v1826_v52, 0.0  ;;  %v3399_v19 = vpop.f32.mrb[56].mxu1 }
 0x2ab   :  { %v1751_v12 = vadd.f32 %v3399_v19, %v4746_v40  ;;  %v1742_v23 = vpop.f32.mrb[57].mxu1  ;;  %v1928_v3 = vpack.c.bf16 %v1892_v30, %v1891_v34  ;;  %v5854_v40 = vld [vmem:[#allocation113_spill] sm:$0xff] }
 0x2ac   :  { %v1743_v1 = vadd.f32 %v1742_v23, %v5848_v37  ;;  %v3400_v29 = vpop.f32.mrb[58].mxu1  ;;  %v1927_v27 = vpack.c.bf16 %v1890_v22, %v1889_v7 }
 0x2ad   :  { %v1831_v60 = vmul.f32 %v5849_v47, %v1751_v12  ;;  %v1754_v50 = vadd.f32 %v3400_v29, %v5850_v14  ;;  %v1745_v39 = vpop.f32.mrb[59].mxu1 }
 0x2ae   :  { %v1829_v21 = vmul.f32 %v5851_v51, %v1743_v1  ;;  %v1746_v15 = vadd.f32 %v1745_v39, %v5852_v16  ;;  %3473 = vmatprep.mubr.bf16.mxu0 %v1927_v27 }
 0x2af   :  { %v1832_v52 = vmul.f32 %v5853_v32, %v1754_v50  ;;  %3474 = vmatmul.mubr.bf16.gmra.mrb[116].mxu0 %v1928_v3  ;;  %v1895_v34 = vmax.f32 %v1831_v60, 0.0  ;;  %v5855_v60 = vld [vmem:[#allocation124_spill] sm:$0xff] }
 0x2b0   :  { %v1830_v19 = vmul.f32 %v5854_v40, %v1746_v15  ;;  %v1893_v23 = vmax.f32 %v1829_v21, 0.0  ;;  %v5856_v21 = vld [vmem:[#allocation122_spill] sm:$0xff] }
 0x2b1   :  { %v1896_v30 = vmax.f32 %v1832_v52, 0.0 }
 0x2b2   :  { %v1894_v37 = vmax.f32 %v1830_v19, 0.0  ;;  %v3403_v7 = vpop.f32.mrb[60].mxu1 }
 0x2b3   :  { %v1767_v22 = vadd.f32 %v3403_v7, %v4776_v20  ;;  %v1758_v12 = vpop.f32.mrb[61].mxu1  ;;  %v1930_v29 = vpack.c.bf16 %v1896_v30, %v1895_v34  ;;  %v5857_v20 = vld [vmem:[#allocation121_spill] sm:$0xff] }
 0x2b4   :  { %v1759_v14 = vadd.f32 %v1758_v12, %v4765_v25  ;;  %v3404_v1 = vpop.f32.mrb[62].mxu1  ;;  %v1929_v47 = vpack.c.bf16 %v1894_v37, %v1893_v23 }
 0x2b5   :  { %v1835_v27 = vmul.f32 %v4760_v41, %v1767_v22  ;;  %v1770_v50 = vadd.f32 %v3404_v1, %v4768_v42  ;;  %v1761_v3 = vpop.f32.mrb[63].mxu1  ;;  %v4937_v42 = vld [vmem:[%s5435_s5] ss:$0 sm:$0xff]  ;;  %s4012_s5 = smov [#allocation10]  }
 0x2b6   :  { %v1833_v39 = vmul.f32 %v4750_v18, %v1759_v14  ;;  %v1762_v16 = vadd.f32 %v1761_v3, %v5855_v60  ;;  %3477 = vmatprep.mubr.bf16.mxu0 %v1929_v47  ;;  %v5858_v60 = vld [vmem:[#allocation21_spill] sm:$0xff]  ;;  %s2893_s23 = sshll.u32 %s4012_s5, 4  ;;  %s2894_s23 = int_to_ptr.vmem [resolvable:$true] %s2893_s23 }
 0x2b7   :  { %v1836_v15 = vmul.f32 %v5856_v21, %v1770_v50  ;;  %3478 = vmatmul.mubr.bf16.gmra.mrb[120].mxu0 %v1930_v29  ;;  %v1899_v19 = vmax.f32 %v1835_v27, 0.0  ;;  %s3976_s25 = scalar_lea.vmem %s2894_s23, 8192  ;;  %p3981_p5 = scmp.lt.s32.totalorder %s2894_s23, %s2894_s23 }
 0x2b8   :  { %v1834_v52 = vmul.f32 %v5857_v20, %v1762_v16  ;;  %v1897_v25 = vmax.f32 %v1833_v39, 0.0  ;;  %p3977_p4 = scmp.ne.s32.totalorder %s2894_s23, %s3976_s25  ;;  %p3982_p6 = scmp.lt.s32.totalorder %s3976_s25, %s3976_s25 }
 0x2b9   :  { %v1900_v34 = vmax.f32 %v1836_v15, 0.0 }
 0x2ba   :  { %v1898_v30 = vmax.f32 %v1834_v52, 0.0  ;;  %p3983_p7 = por %p3982_p6, %p3981_p5 }
 0x2bb   :  { %v1932_v23 = vpack.c.bf16 %v1900_v34, %v1899_v19 }
 0x2bc   :  { %v1931_v37 = vpack.c.bf16 %v1898_v30, %v1897_v25  ;;  %p3984_p8 = pnand %p3983_p7, %p3977_p4 }
 0x2be   :  { %3481 = vmatprep.mubr.bf16.mxu0 %v1931_v37 }
 0x2bf   :  { %3482 = vmatmul.mubr.bf16.gmra.mrb[124].mxu0 %v1932_v23 }
 0x31a   :  { %v3423_v7 = vpop.f32.mrb[64].mxu0 }
 0x31b   :  { %v2021_v47 = vpop.f32.mrb[65].mxu0  ;;  %v2030_v1 = vadd.f32 %v3423_v7, %v4937_v42 }
 0x31c   :  { %v2022_v22 = vadd.f32 %v4937_v42, %v2021_v47  ;;  %v3424_v12 = vpop.f32.mrb[66].mxu0 }
 0x31d   :  { %v2033_v29 = vadd.f32 %v3424_v12, %v4937_v42  ;;  %v2024_v14 = vpop.f32.mrb[67].mxu0  ;;  %v4953_v16 = vmul.f32 %v5858_v60, %v2030_v1 }
 0x31e   :  { %v2025_v27 = vadd.f32 %v4937_v42, %v2024_v14  ;;  %v4944_v50 = vmul.f32 %v4196_v4, %v2022_v22 }
 0x31f   :  { %v4947_v3 = vmul.f32 %v4193_v0, %v2033_v29 }
 0x320   :  { %v4950_v39 = vmul.f32 %v4190_v61, %v2025_v27 }
 0x321   :  { %v2341_v30 = vpack.c.bf16 %v4947_v3, %v4953_v16 }
 0x322   :  { %v3427_v15 = vpop.f32.mrb[68].mxu0  ;;  %v2340_v52 = vpack.c.bf16 %v4950_v39, %v4944_v50 }
 0x323   :  { %v2037_v19 = vpop.f32.mrb[69].mxu0  ;;  %v2046_v7 = vadd.f32 %v3427_v15, %v4937_v42 }
 0x324   :  { %v2038_v34 = vadd.f32 %v4937_v42, %v2037_v19  ;;  %v3428_v25 = vpop.f32.mrb[70].mxu0  ;;  %3485 = vmatprep.subr.bf16.mxu1 %v2340_v52 }
 0x325   :  { %v2049_v23 = vadd.f32 %v3428_v25, %v4937_v42  ;;  %v2040_v37 = vpop.f32.mrb[71].mxu0  ;;  %3486 = vmatpush3.bf16.msra.mxu1 %v2340_v52  ;;  %v4973_v14 = vmul.f32 %v4238_v58, %v2046_v7 }
 0x326   :  { %v2041_v47 = vadd.f32 %v4937_v42, %v2040_v37  ;;  %3487 = vmatprep.subr.bf16.mxu1 %v2341_v30  ;;  %v4964_v22 = vmul.f32 %v4220_v24, %v2038_v34 }
 0x327   :  { %v4967_v12 = vmul.f32 %v4229_v45, %v2049_v23 }
 0x328   :  { %v4970_v29 = vmul.f32 %v4222_v26, %v2041_v47 }
 0x329   :  { %3488 = vmatpush3.bf16.msra.mxu1 %v2341_v30  ;;  %v2343_v34 = vpack.c.bf16 %v4967_v12, %v4973_v14 }
 0x32a   :  { %v3431_v1 = vpop.f32.mrb[72].mxu0  ;;  %v2342_v27 = vpack.c.bf16 %v4970_v29, %v4964_v22 }
 0x32b   :  { %v2053_v15 = vpop.f32.mrb[73].mxu0  ;;  %v2062_v30 = vadd.f32 %v3431_v1, %v4937_v42 }
 0x32c   :  { %v2054_v52 = vadd.f32 %v4937_v42, %v2053_v15  ;;  %v3432_v19 = vpop.f32.mrb[74].mxu0  ;;  %3489 = vmatprep.subr.bf16.mxu1 %v2342_v27 }
 0x32d   :  { %v2065_v25 = vadd.f32 %v3432_v19, %v4937_v42  ;;  %v2056_v23 = vpop.f32.mrb[75].mxu0  ;;  %3490 = vmatpush3.bf16.msra.mxu1 %v2342_v27  ;;  %v4993_v26 = vmul.f32 %v4274_v48, %v2062_v30 }
 0x32e   :  { %v2057_v37 = vadd.f32 %v4937_v42, %v2056_v23  ;;  %3491 = vmatprep.subr.bf16.mxu1 %v2343_v34  ;;  %v4984_v7 = vmul.f32 %v4258_v5, %v2054_v52 }
 0x32f   :  { %v4987_v47 = vmul.f32 %v5779_v59, %v2065_v25 }
 0x330   :  { %v4990_v15 = vmul.f32 %v5780_v38, %v2057_v37 }
 0x331   :  { %3492 = vmatpush3.bf16.msra.mxu1 %v2343_v34  ;;  %v2345_v52 = vpack.c.bf16 %v4987_v47, %v4993_v26 }
 0x332   :  { %5859 = vst [vmem:[#allocation34_spill] sm:$0xff] %v4990_v15  ;;  %v3435_v19 = vpop.f32.mrb[76].mxu0  ;;  %v2344_v1 = vpack.c.bf16 %v4990_v15, %v4984_v7 }
 0x333   :  { %v2069_v27 = vpop.f32.mrb[77].mxu0  ;;  %v2078_v34 = vadd.f32 %v3435_v19, %v4937_v42 }
 0x334   :  { %v2070_v23 = vadd.f32 %v4937_v42, %v2069_v27  ;;  %v3436_v45 = vpop.f32.mrb[78].mxu0  ;;  %3493 = vmatprep.subr.bf16.mxu1 %v2344_v1 }
 0x335   :  { %v2081_v25 = vadd.f32 %v3436_v45, %v4937_v42  ;;  %v2072_v37 = vpop.f32.mrb[79].mxu0  ;;  %3494 = vmatpush3.bf16.msra.mxu1 %v2344_v1  ;;  %v5013_v15 = vmul.f32 %v5783_v53, %v2078_v34 }
 0x336   :  { %v2073_v30 = vadd.f32 %v4937_v42, %v2072_v37  ;;  %3495 = vmatprep.subr.bf16.mxu1 %v2345_v52  ;;  %v5004_v38 = vmul.f32 %v5785_v57, %v2070_v23 }
 0x337   :  { %v5007_v59 = vmul.f32 %v5787_v6, %v2081_v25 }
 0x338   :  { %v5010_v27 = vmul.f32 %v5788_v43, %v2073_v30 }
 0x339   :  { %3496 = vmatpush3.bf16.msra.mxu1 %v2345_v52  ;;  %v2347_v23 = vpack.c.bf16 %v5007_v59, %v5013_v15 }
 0x33a   :  { %5860 = vst [vmem:[#allocation31_spill] sm:$0xff] %v5010_v27  ;;  %v3439_v45 = vpop.f32.mrb[80].mxu0  ;;  %v2346_v19 = vpack.c.bf16 %v5010_v27, %v5004_v38 }
 0x33b   :  { %v2085_v1 = vpop.f32.mrb[81].mxu0  ;;  %v2094_v52 = vadd.f32 %v3439_v45, %v4937_v42 }
 0x33c   :  { %v2086_v37 = vadd.f32 %v4937_v42, %v2085_v1  ;;  %v3440_v5 = vpop.f32.mrb[82].mxu0  ;;  %3497 = vmatprep.subr.bf16.mxu1 %v2346_v19 }
 0x33d   :  { %v2097_v25 = vadd.f32 %v3440_v5, %v4937_v42  ;;  %v2088_v30 = vpop.f32.mrb[83].mxu0  ;;  %3498 = vmatpush3.bf16.msra.mxu1 %v2346_v19  ;;  %v5033_v27 = vmul.f32 %v4350_v33, %v2094_v52  ;;  %v5864_v52 = vld [vmem:[#allocation16_spill] sm:$0xff] }
 0x33e   :  { %v2089_v34 = vadd.f32 %v4937_v42, %v2088_v30  ;;  %3499 = vmatprep.subr.bf16.mxu1 %v2347_v23  ;;  %v5024_v43 = vmul.f32 %v5790_v62, %v2086_v37  ;;  %v5863_v37 = vld [vmem:[#allocation15_spill] sm:$0xff] }
 0x33f   :  { %v5027_v6 = vmul.f32 %v5792_v63, %v2097_v25 }
 0x340   :  { %v5030_v1 = vmul.f32 %v5793_v36, %v2089_v34 }
 0x341   :  { %5861 = vst [vmem:[#allocation30_spill] sm:$0xff] %v5027_v6  ;;  %3500 = vmatpush3.bf16.msra.mxu1 %v2347_v23  ;;  %v2349_v25 = vpack.c.bf16 %v5027_v6, %v5033_v27 }
 0x342   :  { %5862 = vst [vmem:[#allocation32_spill] sm:$0xff] %v5030_v1  ;;  %v3443_v5 = vpop.f32.mrb[84].mxu0  ;;  %v2348_v45 = vpack.c.bf16 %v5030_v1, %v5024_v43 }
 0x343   :  { %v2101_v19 = vpop.f32.mrb[85].mxu0  ;;  %v2110_v36 = vadd.f32 %v3443_v5, %v4937_v42 }
 0x344   :  { %v2102_v30 = vadd.f32 %v4937_v42, %v2101_v19  ;;  %v3444_v57 = vpop.f32.mrb[86].mxu0  ;;  %3502 = vmatmul.mubr.bf16.vlgmr.msra.gmra.mrb[64].mxu1 %v5863_v37  ;;  %3517 = vmatprep.subr.bf16.mxu1 %v2348_v45 }
 0x345   :  { %v2113_v34 = vadd.f32 %v3444_v57, %v4937_v42  ;;  %v2104_v23 = vpop.f32.mrb[87].mxu0  ;;  %3518 = vmatpush3.bf16.msra.mxu1 %v2348_v45  ;;  %3505 = vmatprep.mubr.bf16.mxu1 %v5864_v52  ;;  %v5867_v57 = vld [vmem:[#allocation43_spill] sm:$0xff] }
 0x346   :  { %v2105_v63 = vadd.f32 %v4937_v42, %v2104_v23  ;;  %3519 = vmatprep.subr.bf16.mxu1 %v2349_v25  ;;  %v5046_v19 = vmul.f32 %v5795_v8, %v2102_v30  ;;  %v5055_v62 = vmul.f32 %v5867_v57, %v2110_v36  ;;  %v5868_v30 = vld [vmem:[#allocation17_spill] sm:$0xff]  ;;  %v5869_v36 = vld [vmem:[#allocation18_spill] sm:$0xff] }
 0x347   :  { %v5049_v37 = vmul.f32 %v5797_v10, %v2113_v34 }
 0x348   :  { %v5052_v1 = vmul.f32 %v5798_v44, %v2105_v63 }
 0x349   :  { %5865 = vst [vmem:[#allocation33_spill] sm:$0xff] %v5049_v37  ;;  %3520 = vmatpush3.bf16.msra.mxu1 %v2349_v25  ;;  %v2351_v34 = vpack.c.bf16 %v5049_v37, %v5055_v62 }
 0x34a   :  { %5866 = vst [vmem:[#allocation38_spill] sm:$0xff] %v5052_v1  ;;  %v3447_v45 = vpop.f32.mrb[88].mxu0  ;;  %v2350_v5 = vpack.c.bf16 %v5052_v1, %v5046_v19 }
 0x34b   :  { %v2117_v52 = vpop.f32.mrb[89].mxu0  ;;  %v2126_v44 = vadd.f32 %v3447_v45, %v4937_v42 }
 0x34c   :  { %v2118_v23 = vadd.f32 %v4937_v42, %v2117_v52  ;;  %v3448_v6 = vpop.f32.mrb[90].mxu0  ;;  %3506 = vmatmul.mubr.bf16.gmra.mrb[68].mxu1 %v5868_v30  ;;  %3521 = vmatprep.subr.bf16.mxu1 %v2350_v5 }
 0x34d   :  { %v2129_v63 = vadd.f32 %v3448_v6, %v4937_v42  ;;  %v2120_v25 = vpop.f32.mrb[91].mxu0  ;;  %3522 = vmatpush3.bf16.msra.mxu1 %v2350_v5  ;;  %3509 = vmatprep.mubr.bf16.mxu1 %v5869_v36  ;;  %v5873_v6 = vld [vmem:[#allocation49_spill] sm:$0xff] }
 0x34e   :  { %v2121_v10 = vadd.f32 %v4937_v42, %v2120_v25  ;;  %3523 = vmatprep.subr.bf16.mxu1 %v2351_v34  ;;  %v5068_v52 = vmul.f32 %v4410_v11, %v2118_v23  ;;  %v5077_v8 = vmul.f32 %v5873_v6, %v2126_v44  ;;  %v5874_v23 = vld [vmem:[#allocation19_spill] sm:$0xff]  ;;  %v5875_v44 = vld [vmem:[#allocation20_spill] sm:$0xff]  ;;  %v5878_v11 = vld [vmem:[#allocation53_spill] sm:$0xff] }
 0x34f   :  { %v5071_v30 = vmul.f32 %v5800_v13, %v2129_v63 }
 0x350   :  { %5870 = vst [vmem:[#allocation39_spill] sm:$0xff] %v5068_v52  ;;  %v5074_v1 = vmul.f32 %v5801_v49, %v2121_v10 }
 0x351   :  { %5871 = vst [vmem:[#allocation44_spill] sm:$0xff] %v5071_v30  ;;  %3524 = vmatpush3.bf16.msra.mxu1 %v2351_v34  ;;  %v2353_v63 = vpack.c.bf16 %v5071_v30, %v5077_v8 }
 0x352   :  { %5872 = vst [vmem:[#allocation45_spill] sm:$0xff] %v5074_v1  ;;  %v3451_v5 = vpop.f32.mrb[92].mxu0  ;;  %v2352_v45 = vpack.c.bf16 %v5074_v1, %v5068_v52  ;;  %v5876_v1 = vld [vmem:[#allocation51_spill] sm:$0xff] }
 0x353   :  { %v2133_v36 = vpop.f32.mrb[93].mxu0  ;;  %v2142_v49 = vadd.f32 %v3451_v5, %v4937_v42 }
 0x354   :  { %v2134_v25 = vadd.f32 %v4937_v42, %v2133_v36  ;;  %v3452_v37 = vpop.f32.mrb[94].mxu0  ;;  %3510 = vmatmul.mubr.bf16.gmra.mrb[72].mxu1 %v5874_v23  ;;  %3525 = vmatprep.subr.bf16.mxu1 %v2352_v45 }
 0x355   :  { %v2145_v10 = vadd.f32 %v3452_v37, %v4937_v42  ;;  %v2136_v34 = vpop.f32.mrb[95].mxu0  ;;  %3526 = vmatpush3.bf16.msra.mxu1 %v2352_v45  ;;  %3513 = vmatprep.mubr.bf16.mxu1 %v5875_v44  ;;  %v5881_v37 = vld [vmem:[#allocation54_spill] sm:$0xff] }
 0x356   :  { %v2137_v13 = vadd.f32 %v4937_v42, %v2136_v34  ;;  %3527 = vmatprep.subr.bf16.mxu1 %v2353_v63  ;;  %v5090_v36 = vmul.f32 %v5876_v1, %v2134_v25  ;;  %v5099_v30 = vmul.f32 %v5881_v37, %v2142_v49  ;;  %v5882_v25 = vld [vmem:[#allocation55_spill] sm:$0xff]  ;;  %v5886_v1 = vld [vmem:[#allocation62_spill] sm:$0xff] }
 0x357   :  { %v5093_v23 = vmul.f32 %v5878_v11, %v2145_v10  ;;  %v5883_v49 = vld [vmem:[#allocation59_spill] sm:$0xff] }
 0x358   :  { %5877 = vst [vmem:[#allocation50_spill] sm:$0xff] %v5090_v36  ;;  %v5096_v6 = vmul.f32 %v5808_v31, %v2137_v13 }
 0x359   :  { %5879 = vst [vmem:[#allocation56_spill] sm:$0xff] %v5093_v23  ;;  %3528 = vmatpush3.bf16.msra.mxu1 %v2353_v63  ;;  %v2355_v10 = vpack.c.bf16 %v5093_v23, %v5099_v30 }
 0x35a   :  { %5880 = vst [vmem:[#allocation57_spill] sm:$0xff] %v5096_v6  ;;  %v3455_v45 = vpop.f32.mrb[96].mxu0  ;;  %v2354_v5 = vpack.c.bf16 %v5096_v6, %v5090_v36  ;;  %v5884_v6 = vld [vmem:[#allocation60_spill] sm:$0xff] }
 0x35b   :  { %v2149_v44 = vpop.f32.mrb[97].mxu0  ;;  %v2158_v31 = vadd.f32 %v3455_v45, %v4937_v42 }
 0x35c   :  { %v2150_v34 = vadd.f32 %v4937_v42, %v2149_v44  ;;  %v3456_v52 = vpop.f32.mrb[98].mxu0  ;;  %3514 = vmatmul.mubr.bf16.gmra.mrb[76].mxu1 %v5882_v25  ;;  %3529 = vmatprep.subr.bf16.mxu1 %v2354_v5 }
 0x35d   :  { %v2161_v13 = vadd.f32 %v3456_v52, %v4937_v42  ;;  %v2152_v63 = vpop.f32.mrb[99].mxu0  ;;  %3530 = vmatpush3.bf16.msra.mxu1 %v2354_v5  ;;  %3533 = vmatprep.mubr.bf16.mxu1 %v5883_v49  ;;  %v5889_v52 = vld [vmem:[#allocation63_spill] sm:$0xff] }
 0x35e   :  { %v2153_v11 = vadd.f32 %v4937_v42, %v2152_v63  ;;  %3531 = vmatprep.subr.bf16.mxu1 %v2355_v10  ;;  %v5112_v44 = vmul.f32 %v5884_v6, %v2150_v34  ;;  %v5121_v23 = vmul.f32 %v5889_v52, %v2158_v31  ;;  %v5890_v34 = vld [vmem:[#allocation64_spill] sm:$0xff]  ;;  %v5894_v6 = vld [vmem:[#allocation71_spill] sm:$0xff] }
 0x35f   :  { %v5115_v25 = vmul.f32 %v5886_v1, %v2161_v13  ;;  %v5891_v31 = vld [vmem:[#allocation68_spill] sm:$0xff] }
 0x360   :  { %5885 = vst [vmem:[#allocation58_spill] sm:$0xff] %v5112_v44  ;;  %v5118_v37 = vmul.f32 %v5815_v55, %v2153_v11 }
 0x361   :  { %5887 = vst [vmem:[#allocation65_spill] sm:$0xff] %v5115_v25  ;;  %3532 = vmatpush3.bf16.msra.mxu1 %v2355_v10  ;;  %v2357_v13 = vpack.c.bf16 %v5115_v25, %v5121_v23 }
 0x362   :  { %5888 = vst [vmem:[#allocation66_spill] sm:$0xff] %v5118_v37  ;;  %v3459_v5 = vpop.f32.mrb[100].mxu0  ;;  %v2356_v45 = vpack.c.bf16 %v5118_v37, %v5112_v44  ;;  %v5892_v37 = vld [vmem:[#allocation69_spill] sm:$0xff] }
 0x363   :  { %v2165_v49 = vpop.f32.mrb[101].mxu0  ;;  %v2174_v55 = vadd.f32 %v3459_v5, %v4937_v42 }
 0x364   :  { %v2166_v63 = vadd.f32 %v4937_v42, %v2165_v49  ;;  %v3460_v36 = vpop.f32.mrb[102].mxu0  ;;  %3534 = vmatmul.mubr.bf16.vlgmr.msra.gmra.mrb[80].mxu1 %v5890_v34  ;;  %3549 = vmatprep.subr.bf16.mxu1 %v2356_v45 }
 0x365   :  { %v2177_v11 = vadd.f32 %v3460_v36, %v4937_v42  ;;  %v2168_v10 = vpop.f32.mrb[103].mxu0  ;;  %3550 = vmatpush3.bf16.msra.mxu1 %v2356_v45  ;;  %3537 = vmatprep.mubr.bf16.mxu1 %v5891_v31  ;;  %v5897_v36 = vld [vmem:[#allocation72_spill] sm:$0xff] }
 0x366   :  { %v2169_v1 = vadd.f32 %v4937_v42, %v2168_v10  ;;  %3551 = vmatprep.subr.bf16.mxu1 %v2357_v13  ;;  %v5134_v49 = vmul.f32 %v5892_v37, %v2166_v63  ;;  %v5143_v25 = vmul.f32 %v5897_v36, %v2174_v55  ;;  %v5898_v63 = vld [vmem:[#allocation73_spill] sm:$0xff]  ;;  %v5902_v37 = vld [vmem:[#allocation80_spill] sm:$0xff] }
 0x367   :  { %v5137_v34 = vmul.f32 %v5894_v6, %v2177_v11  ;;  %v5899_v55 = vld [vmem:[#allocation77_spill] sm:$0xff] }
 0x368   :  { %5893 = vst [vmem:[#allocation67_spill] sm:$0xff] %v5134_v49  ;;  %v5140_v52 = vmul.f32 %v5822_v46, %v2169_v1 }
 0x369   :  { %5895 = vst [vmem:[#allocation74_spill] sm:$0xff] %v5137_v34  ;;  %3552 = vmatpush3.bf16.msra.mxu1 %v2357_v13  ;;  %v2359_v11 = vpack.c.bf16 %v5137_v34, %v5143_v25 }
 0x36a   :  { %5896 = vst [vmem:[#allocation75_spill] sm:$0xff] %v5140_v52  ;;  %v3463_v45 = vpop.f32.mrb[104].mxu0  ;;  %v2358_v5 = vpack.c.bf16 %v5140_v52, %v5134_v49  ;;  %v5900_v52 = vld [vmem:[#allocation78_spill] sm:$0xff] }
 0x36b   :  { %v2181_v31 = vpop.f32.mrb[105].mxu0  ;;  %v2190_v46 = vadd.f32 %v3463_v45, %v4937_v42 }
 0x36c   :  { %v2182_v10 = vadd.f32 %v4937_v42, %v2181_v31  ;;  %v3464_v44 = vpop.f32.mrb[106].mxu0  ;;  %3538 = vmatmul.mubr.bf16.gmra.mrb[84].mxu1 %v5898_v63  ;;  %3553 = vmatprep.subr.bf16.mxu1 %v2358_v5 }
 0x36d   :  { %v2193_v1 = vadd.f32 %v3464_v44, %v4937_v42  ;;  %v2184_v13 = vpop.f32.mrb[107].mxu0  ;;  %3554 = vmatpush3.bf16.msra.mxu1 %v2358_v5  ;;  %3541 = vmatprep.mubr.bf16.mxu1 %v5899_v55  ;;  %v5905_v44 = vld [vmem:[#allocation81_spill] sm:$0xff] }
 0x36e   :  { %v2185_v6 = vadd.f32 %v4937_v42, %v2184_v13  ;;  %3555 = vmatprep.subr.bf16.mxu1 %v2359_v11  ;;  %v5156_v31 = vmul.f32 %v5900_v52, %v2182_v10  ;;  %v5165_v34 = vmul.f32 %v5905_v44, %v2190_v46  ;;  %v5906_v10 = vld [vmem:[#allocation82_spill] sm:$0xff]  ;;  %v5909_v52 = vld [vmem:[#allocation89_spill] sm:$0xff] }
 0x36f   :  { %v5159_v63 = vmul.f32 %v5902_v37, %v2193_v1  ;;  %v5907_v46 = vld [vmem:[#allocation86_spill] sm:$0xff] }
 0x370   :  { %5901 = vst [vmem:[#allocation76_spill] sm:$0xff] %v5156_v31  ;;  %v5162_v36 = vmul.f32 %v5829_v28, %v2185_v6 }
 0x371   :  { %5903 = vst [vmem:[#allocation83_spill] sm:$0xff] %v5159_v63  ;;  %3556 = vmatpush3.bf16.msra.mxu1 %v2359_v11  ;;  %v2361_v1 = vpack.c.bf16 %v5159_v63, %v5165_v34 }
 0x372   :  { %5904 = vst [vmem:[#allocation84_spill] sm:$0xff] %v5162_v36  ;;  %v3467_v5 = vpop.f32.mrb[108].mxu0  ;;  %v2360_v45 = vpack.c.bf16 %v5162_v36, %v5156_v31  ;;  %v5908_v36 = vld [vmem:[#allocation87_spill] sm:$0xff] }
 0x373   :  { %v2197_v55 = vpop.f32.mrb[109].mxu0  ;;  %v2206_v28 = vadd.f32 %v3467_v5, %v4937_v42 }
 0x374   :  { %v2198_v13 = vadd.f32 %v4937_v42, %v2197_v55  ;;  %v3468_v49 = vpop.f32.mrb[110].mxu0  ;;  %3542 = vmatmul.mubr.bf16.gmra.mrb[88].mxu1 %v5906_v10  ;;  %3557 = vmatprep.subr.bf16.mxu1 %v2360_v45 }
 0x375   :  { %v2209_v6 = vadd.f32 %v3468_v49, %v4937_v42  ;;  %v2200_v11 = vpop.f32.mrb[111].mxu0  ;;  %3558 = vmatpush3.bf16.msra.mxu1 %v2360_v45  ;;  %3545 = vmatprep.mubr.bf16.mxu1 %v5907_v46  ;;  %v5912_v49 = vld [vmem:[#allocation90_spill] sm:$0xff] }
 0x376   :  { %v2201_v37 = vadd.f32 %v4937_v42, %v2200_v11  ;;  %3559 = vmatprep.subr.bf16.mxu1 %v2361_v1  ;;  %v5178_v55 = vmul.f32 %v5908_v36, %v2198_v13  ;;  %v5187_v63 = vmul.f32 %v5912_v49, %v2206_v28  ;;  %v5913_v13 = vld [vmem:[#allocation91_spill] sm:$0xff] }
 0x377   :  { %v5181_v10 = vmul.f32 %v5909_v52, %v2209_v6  ;;  %v5914_v28 = vld [vmem:[#allocation95_spill] sm:$0xff] }
 0x378   :  { %v5184_v44 = vmul.f32 %v5836_v54, %v2201_v37 }
 0x379   :  { %5910 = vst [vmem:[#allocation85_spill] sm:$0xff] %v5181_v10  ;;  %3560 = vmatpush3.bf16.msra.mxu1 %v2361_v1  ;;  %v2363_v6 = vpack.c.bf16 %v5181_v10, %v5187_v63 }
 0x37a   :  { %5911 = vst [vmem:[#allocation92_spill] sm:$0xff] %v5184_v44  ;;  %v3471_v45 = vpop.f32.mrb[112].mxu0  ;;  %v2362_v5 = vpack.c.bf16 %v5184_v44, %v5178_v55 }
 0x37b   :  { %v2213_v46 = vpop.f32.mrb[113].mxu0  ;;  %v2222_v54 = vadd.f32 %v3471_v45, %v4937_v42 }
 0x37c   :  { %v2214_v11 = vadd.f32 %v4937_v42, %v2213_v46  ;;  %v3472_v31 = vpop.f32.mrb[114].mxu0  ;;  %3546 = vmatmul.mubr.bf16.gmra.mrb[92].mxu1 %v5913_v13  ;;  %3561 = vmatprep.subr.bf16.mxu1 %v2362_v5 }
 0x37d   :  { %v2225_v37 = vadd.f32 %v3472_v31, %v4937_v42  ;;  %v2216_v1 = vpop.f32.mrb[115].mxu0  ;;  %3562 = vmatpush3.bf16.msra.mxu1 %v2362_v5  ;;  %3565 = vmatprep.mubr.bf16.mxu1 %v5914_v28  ;;  %v5917_v31 = vld [vmem:[#allocation99_spill] sm:$0xff] }
 0x37e   :  { %v2217_v52 = vadd.f32 %v4937_v42, %v2216_v1  ;;  %3563 = vmatprep.subr.bf16.mxu1 %v2363_v6  ;;  %v5200_v46 = vmul.f32 %v5840_v17, %v2214_v11  ;;  %v5209_v36 = vmul.f32 %v5917_v31, %v2222_v54  ;;  %v5918_v11 = vld [vmem:[#allocation100_spill] sm:$0xff] }
 0x37f   :  { %v5203_v13 = vmul.f32 %v5842_v9, %v2225_v37  ;;  %v5919_v54 = vld [vmem:[#allocation104_spill] sm:$0xff] }
 0x380   :  { %v5206_v44 = vmul.f32 %v5843_v56, %v2217_v52 }
 0x381   :  { %5915 = vst [vmem:[#allocation93_spill] sm:$0xff] %v5203_v13  ;;  %3564 = vmatpush3.bf16.msra.mxu1 %v2363_v6  ;;  %v2365_v37 = vpack.c.bf16 %v5203_v13, %v5209_v36 }
 0x382   :  { %5916 = vst [vmem:[#allocation94_spill] sm:$0xff] %v5206_v44  ;;  %v3475_v5 = vpop.f32.mrb[116].mxu0  ;;  %v2364_v45 = vpack.c.bf16 %v5206_v44, %v5200_v46  ;;  %v5920_v44 = vld [vmem:[#allocation107_spill] sm:$0xff] }
 0x383   :  { %v2229_v28 = vpop.f32.mrb[117].mxu0  ;;  %v2238_v56 = vadd.f32 %v3475_v5, %v4937_v42 }
 0x384   :  { %v2230_v1 = vadd.f32 %v4937_v42, %v2229_v28  ;;  %v3476_v10 = vpop.f32.mrb[118].mxu0  ;;  %3566 = vmatmul.mubr.bf16.vlgmr.msra.gmra.mrb[96].mxu1 %v5918_v11  ;;  %3581 = vmatprep.subr.bf16.mxu1 %v2364_v45 }
 0x385   :  { %v2241_v52 = vadd.f32 %v3476_v10, %v4937_v42  ;;  %v2232_v6 = vpop.f32.mrb[119].mxu0  ;;  %3582 = vmatpush3.bf16.msra.mxu1 %v2364_v45  ;;  %3569 = vmatprep.mubr.bf16.mxu1 %v5919_v54  ;;  %v5923_v10 = vld [vmem:[#allocation108_spill] sm:$0xff] }
 0x386   :  { %v2233_v9 = vadd.f32 %v4937_v42, %v2232_v6  ;;  %3583 = vmatprep.subr.bf16.mxu1 %v2365_v37  ;;  %v5222_v28 = vmul.f32 %v5844_v35, %v2230_v1  ;;  %v5231_v13 = vmul.f32 %v5923_v10, %v2238_v56  ;;  %v5924_v1 = vld [vmem:[#allocation109_spill] sm:$0xff]  ;;  %v5925_v56 = vld [vmem:[#allocation111_spill] sm:$0xff] }
 0x387   :  { %v5225_v11 = vmul.f32 %v5920_v44, %v2241_v52 }
 0x388   :  { %v5228_v17 = vmul.f32 %v5847_v2, %v2233_v9 }
 0x389   :  { %5921 = vst [vmem:[#allocation101_spill] sm:$0xff] %v5225_v11  ;;  %3584 = vmatpush3.bf16.msra.mxu1 %v2365_v37  ;;  %v2367_v52 = vpack.c.bf16 %v5225_v11, %v5231_v13 }
 0x38a   :  { %5922 = vst [vmem:[#allocation102_spill] sm:$0xff] %v5228_v17  ;;  %v3479_v45 = vpop.f32.mrb[120].mxu0  ;;  %v2366_v5 = vpack.c.bf16 %v5228_v17, %v5222_v28 }
 0x38b   :  { %v2245_v54 = vpop.f32.mrb[121].mxu0  ;;  %v2254_v2 = vadd.f32 %v3479_v45, %v4937_v42 }
 0x38c   :  { %v2246_v6 = vadd.f32 %v4937_v42, %v2245_v54  ;;  %v3480_v31 = vpop.f32.mrb[122].mxu0  ;;  %3570 = vmatmul.mubr.bf16.gmra.mrb[100].mxu1 %v5924_v1  ;;  %3585 = vmatprep.subr.bf16.mxu1 %v2366_v5 }
 0x38d   :  { %v2257_v9 = vadd.f32 %v3480_v31, %v4937_v42  ;;  %v2248_v37 = vpop.f32.mrb[123].mxu0  ;;  %3586 = vmatpush3.bf16.msra.mxu1 %v2366_v5  ;;  %3573 = vmatprep.mubr.bf16.mxu1 %v5925_v56  ;;  %v5927_v31 = vld [vmem:[#allocation115_spill] sm:$0xff] }
 0x38e   :  { %v2249_v44 = vadd.f32 %v4937_v42, %v2248_v37  ;;  %3587 = vmatprep.subr.bf16.mxu1 %v2367_v52  ;;  %v5244_v54 = vmul.f32 %v5851_v51, %v2246_v6  ;;  %v5253_v35 = vmul.f32 %v5927_v31, %v2254_v2  ;;  %v5928_v6 = vld [vmem:[#allocation116_spill] sm:$0xff] }
 0x38f   :  { %v5247_v1 = vmul.f32 %v5853_v32, %v2257_v9  ;;  %v5929_v2 = vld [vmem:[#allocation120_spill] sm:$0xff] }
 0x390   :  { %v5250_v17 = vmul.f32 %v5854_v40, %v2249_v44 }
 0x391   :  { %3588 = vmatpush3.bf16.msra.mxu1 %v2367_v52  ;;  %v2369_v9 = vpack.c.bf16 %v5247_v1, %v5253_v35 }
 0x392   :  { %5926 = vst [vmem:[#allocation103_spill] sm:$0xff] %v5250_v17  ;;  %v3483_v5 = vpop.f32.mrb[124].mxu0  ;;  %v2368_v45 = vpack.c.bf16 %v5250_v17, %v5244_v54 }
 0x393   :  { %v2261_v56 = vpop.f32.mrb[125].mxu0  ;;  %v2270_v40 = vadd.f32 %v3483_v5, %v4937_v42  ;;  %v5930_v5 = vld [vmem:[#allocation123_spill] sm:$0xff] }
 0x394   :  { %v2262_v37 = vadd.f32 %v4937_v42, %v2261_v56  ;;  %v3484_v11 = vpop.f32.mrb[126].mxu0  ;;  %3574 = vmatmul.mubr.bf16.gmra.mrb[104].mxu1 %v5928_v6  ;;  %3589 = vmatprep.subr.bf16.mxu1 %v2368_v45 }
 0x395   :  { %v2273_v44 = vadd.f32 %v3484_v11, %v4937_v42  ;;  %v2264_v52 = vpop.f32.mrb[127].mxu0  ;;  %3590 = vmatpush3.bf16.msra.mxu1 %v2368_v45  ;;  %3577 = vmatprep.mubr.bf16.mxu1 %v5929_v2  ;;  %v5275_v11 = vmul.f32 %v4760_v41, %v2270_v40  ;;  %v5934_v40 = vld [vmem:[#allocation128_spill] sm:$0xff]  ;;  %v5937_v2 = vld [vmem:[#allocation131_spill] sm:$0xff] }
 0x396   :  { %v2265_v32 = vadd.f32 %v4937_v42, %v2264_v52  ;;  %3591 = vmatprep.subr.bf16.mxu1 %v2369_v9  ;;  %v5266_v56 = vmul.f32 %v4750_v18, %v2262_v37  ;;  %v5931_v37 = vld [vmem:[#allocation125_spill] sm:$0xff]  ;;  %v5936_v52 = vld [vmem:[#allocation130_spill] sm:$0xff] }
 0x397   :  { %v5269_v6 = vmul.f32 %v5856_v21, %v2273_v44  ;;  %v5935_v44 = vld [vmem:[#allocation129_spill] sm:$0xff] }
 0x398   :  { %v5272_v17 = vmul.f32 %v5857_v20, %v2265_v32  ;;  %v5932_v32 = vld [vmem:[#allocation126_spill] sm:$0xff] }
 0x399   :  { %3592 = vmatpush3.bf16.msra.mxu1 %v2369_v9  ;;  %v2371_v42 = vpack.c.bf16 %v5269_v6, %v5275_v11  ;;  %v5933_v9 = vld [vmem:[#allocation127_spill] sm:$0xff] }
 0x39a   :  { %v2370_v45 = vpack.c.bf16 %v5272_v17, %v5266_v56 }
 0x39c   :  { %3578 = vmatmul.mubr.bf16.gmra.mrb[108].mxu1 %v5930_v5  ;;  %3593 = vmatprep.subr.bf16.mxu1 %v2370_v45  ;;  %v5938_v5 = vld [vmem:[#allocation132_spill] sm:$0xff] }
 0x39d   :  { %3594 = vmatpush3.bf16.msra.mxu1 %v2370_v45  ;;  %3597 = vmatprep.mubr.bf16.mxu1 %v5931_v37 }
 0x39e   :  { %3595 = vmatprep.subr.bf16.mxu1 %v2371_v42 }
 0x3a1   :  { %3596 = vmatpush3.bf16.msra.mxu1 %v2371_v42 }
 0x3a4   :  { %3598 = vmatmul.mubr.bf16.vlgmr.msra.gmra.mrb[112].mxu1 %v5932_v32 }
 0x3a5   :  { %3601 = vmatprep.mubr.bf16.mxu1 %v5933_v9 }
 0x3ac   :  { %3602 = vmatmul.mubr.bf16.gmra.mrb[116].mxu1 %v5934_v40 }
 0x3ad   :  { %3605 = vmatprep.mubr.bf16.mxu1 %v5935_v44 }
 0x3b4   :  { %3606 = vmatmul.mubr.bf16.gmra.mrb[120].mxu1 %v5936_v52 }
 0x3b5   :  { %3609 = vmatprep.mubr.bf16.mxu1 %v5937_v2 }
 0x3bc   :  { %3610 = vmatmul.mubr.bf16.gmra.mrb[124].mxu1 %v5938_v5 }
 0x417   :  { %v3503_v20 = vpop.f32.mrb[64].mxu1 }
 0x418   :  { %v2415_v45 = vadd.f32 %v3503_v20, %v4953_v16  ;;  %v2406_v37 = vpop.f32.mrb[65].mxu1 }
 0x419   :  { %v2407_v42 = vadd.f32 %v2406_v37, %v4944_v50  ;;  %v3504_v21 = vpop.f32.mrb[66].mxu1 }
 0x41a   :  { %v2762_v32 = vmul.f32 %v5858_v60, %v2415_v45  ;;  %v2418_v9 = vadd.f32 %v3504_v21, %v4947_v3  ;;  %v2409_v40 = vpop.f32.mrb[67].mxu1 }
 0x41b   :  { %v2760_v44 = vmul.f32 %v4196_v4, %v2407_v42  ;;  %v2410_v52 = vadd.f32 %v2409_v40, %v4950_v39  ;;  %v5940_v42 = vld [vmem:[#allocation22_spill] sm:$0xff] }
 0x41c   :  { %2826 = vst [vmem:[#allocation10 + $0x10] sm:$0xff] %v2762_v32  ;;  %v2763_v2 = vmul.f32 %v4193_v0, %v2418_v9 }
 0x41d   :  { %2824 = vst [vmem:[#allocation10] sm:$0xff] %v2760_v44  ;;  %v2761_v5 = vmul.f32 %v4190_v61, %v2410_v52  ;;  %v5939_v61 = vld [vmem:[#allocation23_spill] sm:$0xff]  ;;  %v5941_v44 = vld [vmem:[#allocation24_spill] sm:$0xff] }
 0x41e   :  { %2827 = vst [vmem:[#allocation10 + $0x18] sm:$0xff] %v2763_v2  ;;  %v5942_v2 = vld [vmem:[#allocation34_spill] sm:$0xff] }
 0x41f   :  { %2825 = vst [vmem:[#allocation10 + $0x8] sm:$0xff] %v2761_v5  ;;  %v3507_v20 = vpop.f32.mrb[68].mxu1 }
 0x420   :  { %v2431_v50 = vadd.f32 %v3507_v20, %v4973_v14  ;;  %v2422_v16 = vpop.f32.mrb[69].mxu1  ;;  %v5943_v20 = vld [vmem:[#allocation26_spill] sm:$0xff] }
 0x421   :  { %v2423_v60 = vadd.f32 %v2422_v16, %v4964_v22  ;;  %v3508_v21 = vpop.f32.mrb[70].mxu1  ;;  %v5944_v16 = vld [vmem:[#allocation25_spill] sm:$0xff] }
 0x422   :  { %v2766_v3 = vmul.f32 %v4238_v58, %v2431_v50  ;;  %v2434_v4 = vadd.f32 %v3508_v21, %v4967_v12  ;;  %v2425_v39 = vpop.f32.mrb[71].mxu1 }
 0x423   :  { %v2764_v45 = vmul.f32 %v4220_v24, %v2423_v60  ;;  %v2426_v0 = vadd.f32 %v2425_v39, %v4970_v29 }
 0x424   :  { %2830 = vst [vmem:[#allocation10 + $0x30] sm:$0xff] %v2766_v3  ;;  %v2767_v37 = vmul.f32 %v5939_v61, %v2434_v4  ;;  %v5946_v61 = vld [vmem:[#allocation31_spill] sm:$0xff] }
 0x425   :  { %2828 = vst [vmem:[#allocation10 + $0x20] sm:$0xff] %v2764_v45  ;;  %v2765_v32 = vmul.f32 %v5940_v42, %v2426_v0  ;;  %v5945_v45 = vld [vmem:[#allocation27_spill] sm:$0xff]  ;;  %v5947_v42 = vld [vmem:[#allocation29_spill] sm:$0xff] }
 0x426   :  { %2831 = vst [vmem:[#allocation10 + $0x38] sm:$0xff] %v2767_v37 }
 0x427   :  { %2829 = vst [vmem:[#allocation10 + $0x28] sm:$0xff] %v2765_v32  ;;  %v3511_v14 = vpop.f32.mrb[72].mxu1 }
 0x428   :  { %v2447_v22 = vadd.f32 %v3511_v14, %v4993_v26  ;;  %v2438_v9 = vpop.f32.mrb[73].mxu1  ;;  %v5948_v14 = vld [vmem:[#allocation28_spill] sm:$0xff] }
 0x429   :  { %v2439_v58 = vadd.f32 %v2438_v9, %v4984_v7  ;;  %v3512_v12 = vpop.f32.mrb[74].mxu1 }
 0x42a   :  { %v2770_v40 = vmul.f32 %v4274_v48, %v2447_v22  ;;  %v2450_v24 = vadd.f32 %v3512_v12, %v4987_v47  ;;  %v2441_v29 = vpop.f32.mrb[75].mxu1  ;;  %v5949_v12 = vld [vmem:[#allocation30_spill] sm:$0xff] }
 0x42b   :  { %v2768_v52 = vmul.f32 %v5941_v44, %v2439_v58  ;;  %v2442_v5 = vadd.f32 %v2441_v29, %v5942_v2  ;;  %v5950_v29 = vld [vmem:[#allocation35_spill] sm:$0xff] }
 0x42c   :  { %2834 = vst [vmem:[#allocation10 + $0x50] sm:$0xff] %v2770_v40  ;;  %v2771_v50 = vmul.f32 %v5943_v20, %v2450_v24 }
 0x42d   :  { %2832 = vst [vmem:[#allocation10 + $0x40] sm:$0xff] %v2768_v52  ;;  %v2769_v60 = vmul.f32 %v5944_v16, %v2442_v5  ;;  %v5951_v52 = vld [vmem:[#allocation32_spill] sm:$0xff]  ;;  %v5952_v5 = vld [vmem:[#allocation37_spill] sm:$0xff] }
 0x42e   :  { %2835 = vst [vmem:[#allocation10 + $0x58] sm:$0xff] %v2771_v50  ;;  %v5953_v50 = vld [vmem:[#allocation36_spill] sm:$0xff] }
 0x42f   :  { %2833 = vst [vmem:[#allocation10 + $0x48] sm:$0xff] %v2769_v60  ;;  %v3515_v26 = vpop.f32.mrb[76].mxu1 }
 0x430   :  { %v2463_v7 = vadd.f32 %v3515_v26, %v5013_v15  ;;  %v2454_v21 = vpop.f32.mrb[77].mxu1 }
 0x431   :  { %v2455_v48 = vadd.f32 %v2454_v21, %v5004_v38  ;;  %v3516_v47 = vpop.f32.mrb[78].mxu1  ;;  %v5954_v21 = vld [vmem:[#allocation33_spill] sm:$0xff] }
 0x432   :  { %v2774_v3 = vmul.f32 %v5783_v53, %v2463_v7  ;;  %v2466_v4 = vadd.f32 %v3516_v47, %v5007_v59  ;;  %v2457_v39 = vpop.f32.mrb[79].mxu1 }
 0x433   :  { %v2772_v0 = vmul.f32 %v5945_v45, %v2455_v48  ;;  %v2458_v37 = vadd.f32 %v2457_v39, %v5946_v61  ;;  %v5956_v39 = vld [vmem:[#allocation38_spill] sm:$0xff] }
 0x434   :  { %2838 = vst [vmem:[#allocation10 + $0x70] sm:$0xff] %v2774_v3  ;;  %v2775_v32 = vmul.f32 %v5947_v42, %v2466_v4  ;;  %v5955_v3 = vld [vmem:[#allocation40_spill] sm:$0xff] }
 0x435   :  { %2836 = vst [vmem:[#allocation10 + $0x60] sm:$0xff] %v2772_v0  ;;  %v2773_v22 = vmul.f32 %v5948_v14, %v2458_v37  ;;  %v5957_v0 = vld [vmem:[#allocation42_spill] sm:$0xff]  ;;  %v5958_v37 = vld [vmem:[#allocation41_spill] sm:$0xff] }
 0x436   :  { %2839 = vst [vmem:[#allocation10 + $0x78] sm:$0xff] %v2775_v32 }
 0x437   :  { %2837 = vst [vmem:[#allocation10 + $0x68] sm:$0xff] %v2773_v22  ;;  %v3535_v15 = vpop.f32.mrb[80].mxu1 }
 0x438   :  { %v2512_v38 = vadd.f32 %v3535_v15, %v5033_v27  ;;  %v2503_v9 = vpop.f32.mrb[81].mxu1  ;;  %v5960_v15 = vld [vmem:[#allocation49_spill] sm:$0xff] }
 0x439   :  { %v2504_v53 = vadd.f32 %v2503_v9, %v5024_v43  ;;  %v3536_v59 = vpop.f32.mrb[82].mxu1  ;;  %v5961_v9 = vld [vmem:[#allocation44_spill] sm:$0xff] }
 0x43a   :  { %v2778_v58 = vmul.f32 %v4350_v33, %v2512_v38  ;;  %v2515_v40 = vadd.f32 %v3536_v59, %v5949_v12  ;;  %v2506_v24 = vpop.f32.mrb[83].mxu1 }
 0x43b   :  { %v2776_v44 = vmul.f32 %v5950_v29, %v2504_v53  ;;  %v2507_v2 = vadd.f32 %v2506_v24, %v5951_v52  ;;  %v5964_v29 = vld [vmem:[#allocation48_spill] sm:$0xff]  ;;  %v5965_v52 = vld [vmem:[#allocation47_spill] sm:$0xff] }
 0x43c   :  { %2842 = vst [vmem:[#allocation10 + $0x90] sm:$0xff] %v2778_v58  ;;  %v2779_v20 = vmul.f32 %v5952_v5, %v2515_v40  ;;  %v5962_v58 = vld [vmem:[#allocation46_spill] sm:$0xff]  ;;  %v5963_v40 = vld [vmem:[#allocation45_spill] sm:$0xff] }
 0x43d   :  { %2840 = vst [vmem:[#allocation10 + $0x80] sm:$0xff] %v2776_v44  ;;  %v2777_v16 = vmul.f32 %v5953_v50, %v2507_v2  ;;  %v5966_v50 = vld [vmem:[#allocation50_spill] sm:$0xff] }
 0x43e   :  { %2843 = vst [vmem:[#allocation10 + $0x98] sm:$0xff] %v2779_v20 }
 0x43f   :  { %2841 = vst [vmem:[#allocation10 + $0x88] sm:$0xff] %v2777_v16  ;;  %v3539_v27 = vpop.f32.mrb[84].mxu1 }
 0x440   :  { %v2528_v43 = vadd.f32 %v3539_v27, %v5055_v62  ;;  %v2519_v60 = vpop.f32.mrb[85].mxu1 }
 0x441   :  { %v2520_v33 = vadd.f32 %v2519_v60, %v5046_v19  ;;  %v3540_v26 = vpop.f32.mrb[86].mxu1 }
 0x442   :  { %v2782_v7 = vmul.f32 %v5867_v57, %v2528_v43  ;;  %v2531_v48 = vadd.f32 %v3540_v26, %v5954_v21  ;;  %v2522_v47 = vpop.f32.mrb[87].mxu1  ;;  %v5959_v57 = vld [vmem:[#allocation39_spill] sm:$0xff]  ;;  %v5967_v43 = vld [vmem:[#allocation54_spill] sm:$0xff] }
 0x443   :  { %v2780_v4 = vmul.f32 %v5955_v3, %v2520_v33  ;;  %v2523_v45 = vadd.f32 %v2522_v47, %v5956_v39  ;;  %v5968_v33 = vld [vmem:[#allocation56_spill] sm:$0xff]  ;;  %v5969_v21 = vld [vmem:[#allocation51_spill] sm:$0xff]  ;;  %v5970_v47 = vld [vmem:[#allocation57_spill] sm:$0xff] }
 0x444   :  { %2846 = vst [vmem:[#allocation10 + $0xb0] sm:$0xff] %v2782_v7  ;;  %v2783_v61 = vmul.f32 %v5957_v0, %v2531_v48 }
 0x445   :  { %2844 = vst [vmem:[#allocation10 + $0xa0] sm:$0xff] %v2780_v4  ;;  %v2781_v42 = vmul.f32 %v5958_v37, %v2523_v45  ;;  %v5971_v4 = vld [vmem:[#allocation53_spill] sm:$0xff]  ;;  %v5972_v45 = vld [vmem:[#allocation52_spill] sm:$0xff] }
 0x446   :  { %2847 = vst [vmem:[#allocation10 + $0xb8] sm:$0xff] %v2783_v61 }
 0x447   :  { %2845 = vst [vmem:[#allocation10 + $0xa8] sm:$0xff] %v2781_v42  ;;  %v3543_v62 = vpop.f32.mrb[88].mxu1  ;;  %v5973_v42 = vld [vmem:[#allocation58_spill] sm:$0xff] }
 0x448   :  { %v2544_v19 = vadd.f32 %v3543_v62, %v5077_v8  ;;  %v2535_v32 = vpop.f32.mrb[89].mxu1 }
 0x449   :  { %v2536_v14 = vadd.f32 %v2535_v32, %v5959_v57  ;;  %v3544_v22 = vpop.f32.mrb[90].mxu1  ;;  %v5974_v32 = vld [vmem:[#allocation63_spill] sm:$0xff] }
 0x44a   :  { %v2786_v38 = vmul.f32 %v5960_v15, %v2544_v19  ;;  %v2547_v53 = vadd.f32 %v3544_v22, %v5961_v9  ;;  %v2538_v59 = vpop.f32.mrb[91].mxu1 }
 0x44b   :  { %v2784_v12 = vmul.f32 %v5962_v58, %v2536_v14  ;;  %v2539_v24 = vadd.f32 %v2538_v59, %v5963_v40  ;;  %v5975_v14 = vld [vmem:[#allocation65_spill] sm:$0xff]  ;;  %v5978_v58 = vld [vmem:[#allocation62_spill] sm:$0xff] }
 0x44c   :  { %2850 = vst [vmem:[#allocation10 + $0xd0] sm:$0xff] %v2786_v38  ;;  %v2787_v44 = vmul.f32 %v5964_v29, %v2547_v53  ;;  %v5976_v38 = vld [vmem:[#allocation60_spill] sm:$0xff]  ;;  %v5977_v53 = vld [vmem:[#allocation66_spill] sm:$0xff]  ;;  %v5979_v40 = vld [vmem:[#allocation61_spill] sm:$0xff] }
 0x44d   :  { %2848 = vst [vmem:[#allocation10 + $0xc0] sm:$0xff] %v2784_v12  ;;  %v2785_v2 = vmul.f32 %v5965_v52, %v2539_v24  ;;  %v5980_v52 = vld [vmem:[#allocation67_spill] sm:$0xff] }
 0x44e   :  { %2851 = vst [vmem:[#allocation10 + $0xd8] sm:$0xff] %v2787_v44 }
 0x44f   :  { %2849 = vst [vmem:[#allocation10 + $0xc8] sm:$0xff] %v2785_v2  ;;  %v3547_v8 = vpop.f32.mrb[92].mxu1 }
 0x450   :  { %v2560_v5 = vadd.f32 %v3547_v8, %v5099_v30  ;;  %v2551_v20 = vpop.f32.mrb[93].mxu1 }
 0x451   :  { %v2552_v16 = vadd.f32 %v2551_v20, %v5966_v50  ;;  %v3548_v27 = vpop.f32.mrb[94].mxu1  ;;  %v5982_v50 = vld [vmem:[#allocation74_spill] sm:$0xff] }
 0x452   :  { %v2790_v60 = vmul.f32 %v5967_v43, %v2560_v5  ;;  %v2563_v26 = vadd.f32 %v3548_v27, %v5968_v33  ;;  %v2554_v7 = vpop.f32.mrb[95].mxu1  ;;  %v5981_v5 = vld [vmem:[#allocation72_spill] sm:$0xff]  ;;  %v5983_v43 = vld [vmem:[#allocation69_spill] sm:$0xff]  ;;  %v5984_v33 = vld [vmem:[#allocation75_spill] sm:$0xff] }
 0x453   :  { %v2788_v48 = vmul.f32 %v5969_v21, %v2552_v16  ;;  %v2555_v3 = vadd.f32 %v2554_v7, %v5970_v47  ;;  %v5985_v7 = vld [vmem:[#allocation71_spill] sm:$0xff] }
 0x454   :  { %2854 = vst [vmem:[#allocation10 + $0xf0] sm:$0xff] %v2790_v60  ;;  %v2791_v39 = vmul.f32 %v5971_v4, %v2563_v26 }
 0x455   :  { %2852 = vst [vmem:[#allocation10 + $0xe0] sm:$0xff] %v2788_v48  ;;  %v2789_v0 = vmul.f32 %v5972_v45, %v2555_v3  ;;  %v5986_v48 = vld [vmem:[#allocation70_spill] sm:$0xff] }
 0x456   :  { %2855 = vst [vmem:[#allocation10 + $0xf8] sm:$0xff] %v2791_v39  ;;  %v5987_v39 = vld [vmem:[#allocation76_spill] sm:$0xff] }
 0x457   :  { %2853 = vst [vmem:[#allocation10 + $0xe8] sm:$0xff] %v2789_v0  ;;  %v3567_v30 = vpop.f32.mrb[96].mxu1 }
 0x458   :  { %v2609_v61 = vadd.f32 %v3567_v30, %v5121_v23  ;;  %v2600_v37 = vpop.f32.mrb[97].mxu1  ;;  %v5988_v30 = vld [vmem:[#allocation81_spill] sm:$0xff] }
 0x459   :  { %v2601_v62 = vadd.f32 %v2600_v37, %v5973_v42  ;;  %v3568_v19 = vpop.f32.mrb[98].mxu1  ;;  %v5989_v37 = vld [vmem:[#allocation83_spill] sm:$0xff] }
 0x45a   :  { %v2794_v57 = vmul.f32 %v5974_v32, %v2609_v61  ;;  %v2612_v22 = vadd.f32 %v3568_v19, %v5975_v14  ;;  %v2603_v15 = vpop.f32.mrb[99].mxu1  ;;  %v5990_v19 = vld [vmem:[#allocation78_spill] sm:$0xff] }
 0x45b   :  { %v2792_v9 = vmul.f32 %v5976_v38, %v2601_v62  ;;  %v2604_v59 = vadd.f32 %v2603_v15, %v5977_v53  ;;  %v5993_v38 = vld [vmem:[#allocation79_spill] sm:$0xff] }
 0x45c   :  { %2858 = vst [vmem:[#allocation10 + $0x110] sm:$0xff] %v2794_v57  ;;  %v2795_v12 = vmul.f32 %v5978_v58, %v2612_v22  ;;  %v5991_v57 = vld [vmem:[#allocation84_spill] sm:$0xff] }
 0x45d   :  { %2856 = vst [vmem:[#allocation10 + $0x100] sm:$0xff] %v2792_v9  ;;  %v2793_v24 = vmul.f32 %v5979_v40, %v2604_v59  ;;  %v5992_v22 = vld [vmem:[#allocation80_spill] sm:$0xff] }
 0x45e   :  { %2859 = vst [vmem:[#allocation10 + $0x118] sm:$0xff] %v2795_v12 }
 0x45f   :  { %2857 = vst [vmem:[#allocation10 + $0x108] sm:$0xff] %v2793_v24  ;;  %v3571_v23 = vpop.f32.mrb[100].mxu1  ;;  %v5994_v24 = vld [vmem:[#allocation85_spill] sm:$0xff] }
 0x460   :  { %v2625_v29 = vadd.f32 %v3571_v23, %v5143_v25  ;;  %v2616_v44 = vpop.f32.mrb[101].mxu1 }
 0x461   :  { %v2617_v2 = vadd.f32 %v2616_v44, %v5980_v52  ;;  %v3572_v8 = vpop.f32.mrb[102].mxu1  ;;  %v5995_v44 = vld [vmem:[#allocation87_spill] sm:$0xff] }
 0x462   :  { %v2798_v20 = vmul.f32 %v5981_v5, %v2625_v29  ;;  %v2628_v16 = vadd.f32 %v3572_v8, %v5982_v50  ;;  %v2619_v27 = vpop.f32.mrb[103].mxu1  ;;  %v5997_v5 = vld [vmem:[#allocation89_spill] sm:$0xff]  ;;  %v5998_v50 = vld [vmem:[#allocation88_spill] sm:$0xff] }
 0x463   :  { %v2796_v60 = vmul.f32 %v5983_v43, %v2617_v2  ;;  %v2620_v26 = vadd.f32 %v2619_v27, %v5984_v33  ;;  %v5996_v2 = vld [vmem:[#allocation92_spill] sm:$0xff] }
 0x464   :  { %2862 = vst [vmem:[#allocation10 + $0x130] sm:$0xff] %v2798_v20  ;;  %v2799_v21 = vmul.f32 %v5985_v7, %v2628_v16 }
 0x465   :  { %2860 = vst [vmem:[#allocation10 + $0x120] sm:$0xff] %v2796_v60  ;;  %v2797_v47 = vmul.f32 %v5986_v48, %v2620_v26  ;;  %v5999_v60 = vld [vmem:[#allocation99_spill] sm:$0xff]  ;;  %v6000_v26 = vld [vmem:[#allocation93_spill] sm:$0xff]  ;;  %v6001_v48 = vld [vmem:[#allocation96_spill] sm:$0xff] }
 0x466   :  { %2863 = vst [vmem:[#allocation10 + $0x138] sm:$0xff] %v2799_v21 }
 0x467   :  { %2861 = vst [vmem:[#allocation10 + $0x128] sm:$0xff] %v2797_v47  ;;  %v3575_v25 = vpop.f32.mrb[104].mxu1 }
 0x468   :  { %v2641_v3 = vadd.f32 %v3575_v25, %v5165_v34  ;;  %v2632_v4 = vpop.f32.mrb[105].mxu1  ;;  %v6002_v25 = vld [vmem:[#allocation94_spill] sm:$0xff] }
 0x469   :  { %v2633_v45 = vadd.f32 %v2632_v4, %v5987_v39  ;;  %v3576_v0 = vpop.f32.mrb[106].mxu1  ;;  %v6003_v4 = vld [vmem:[#allocation98_spill] sm:$0xff] }
 0x46a   :  { %v2802_v61 = vmul.f32 %v5988_v30, %v2641_v3  ;;  %v2644_v42 = vadd.f32 %v3576_v0, %v5989_v37  ;;  %v2635_v62 = vpop.f32.mrb[107].mxu1 }
 0x46b   :  { %v2800_v32 = vmul.f32 %v5990_v19, %v2633_v45  ;;  %v2636_v14 = vadd.f32 %v2635_v62, %v5991_v57  ;;  %v6004_v45 = vld [vmem:[#allocation97_spill] sm:$0xff] }
 0x46c   :  { %2866 = vst [vmem:[#allocation10 + $0x150] sm:$0xff] %v2802_v61  ;;  %v2803_v15 = vmul.f32 %v5992_v22, %v2644_v42  ;;  %v6005_v62 = vld [vmem:[#allocation101_spill] sm:$0xff]  ;;  %v6007_v22 = vld [vmem:[#allocation102_spill] sm:$0xff] }
 0x46d   :  { %2864 = vst [vmem:[#allocation10 + $0x140] sm:$0xff] %v2800_v32  ;;  %v2801_v9 = vmul.f32 %v5993_v38, %v2636_v14  ;;  %v6006_v57 = vld [vmem:[#allocation105_spill] sm:$0xff]  ;;  %v6008_v38 = vld [vmem:[#allocation107_spill] sm:$0xff] }
 0x46e   :  { %2867 = vst [vmem:[#allocation10 + $0x158] sm:$0xff] %v2803_v15 }
 0x46f   :  { %2865 = vst [vmem:[#allocation10 + $0x148] sm:$0xff] %v2801_v9  ;;  %v3579_v34 = vpop.f32.mrb[108].mxu1 }
 0x470   :  { %v2657_v53 = vadd.f32 %v3579_v34, %v5187_v63  ;;  %v2648_v59 = vpop.f32.mrb[109].mxu1  ;;  %v6009_v34 = vld [vmem:[#allocation106_spill] sm:$0xff] }
 0x471   :  { %v2649_v58 = vadd.f32 %v2648_v59, %v5178_v55  ;;  %v3580_v12 = vpop.f32.mrb[110].mxu1 }
 0x472   :  { %v2806_v40 = vmul.f32 %v5912_v49, %v2657_v53  ;;  %v2660_v23 = vadd.f32 %v3580_v12, %v5994_v24  ;;  %v2651_v29 = vpop.f32.mrb[111].mxu1 }
 0x473   :  { %v2804_v52 = vmul.f32 %v5995_v44, %v2649_v58  ;;  %v2652_v8 = vadd.f32 %v2651_v29, %v5996_v2  ;;  %v6010_v29 = vld [vmem:[#allocation103_spill] sm:$0xff] }
 0x474   :  { %2870 = vst [vmem:[#allocation10 + $0x170] sm:$0xff] %v2806_v40  ;;  %v2807_v20 = vmul.f32 %v5997_v5, %v2660_v23 }
 0x475   :  { %2868 = vst [vmem:[#allocation10 + $0x160] sm:$0xff] %v2804_v52  ;;  %v2805_v16 = vmul.f32 %v5998_v50, %v2652_v8  ;;  %v6011_v52 = vld [vmem:[#allocation114_spill] sm:$0xff]  ;;  %v6012_v8 = vld [vmem:[#allocation113_spill] sm:$0xff] }
 0x476   :  { %2871 = vst [vmem:[#allocation10 + $0x178] sm:$0xff] %v2807_v20 }
 0x477   :  { %2869 = vst [vmem:[#allocation10 + $0x168] sm:$0xff] %v2805_v16  ;;  %v3599_v63 = vpop.f32.mrb[112].mxu1 }
 0x478   :  { %v2706_v55 = vadd.f32 %v3599_v63, %v5209_v36  ;;  %v2697_v27 = vpop.f32.mrb[113].mxu1 }
 0x479   :  { %v2698_v49 = vadd.f32 %v2697_v27, %v5200_v46  ;;  %v3600_v43 = vpop.f32.mrb[114].mxu1  ;;  %v6013_v27 = vld [vmem:[#allocation122_spill] sm:$0xff] }
 0x47a   :  { %v2810_v33 = vmul.f32 %v5999_v60, %v2706_v55  ;;  %v2709_v7 = vadd.f32 %v3600_v43, %v6000_v26  ;;  %v2700_v21 = vpop.f32.mrb[115].mxu1 }
 0x47b   :  { %v2808_v47 = vmul.f32 %v6001_v48, %v2698_v49  ;;  %v2701_v3 = vadd.f32 %v2700_v21, %v6002_v25 }
 0x47c   :  { %2874 = vst [vmem:[#allocation10 + $0x190] sm:$0xff] %v2810_v33  ;;  %v2811_v39 = vmul.f32 %v6003_v4, %v2709_v7 }
 0x47d   :  { %2872 = vst [vmem:[#allocation10 + $0x180] sm:$0xff] %v2808_v47  ;;  %v2809_v0 = vmul.f32 %v6004_v45, %v2701_v3 }
 0x47e   :  { %2875 = vst [vmem:[#allocation10 + $0x198] sm:$0xff] %v2811_v39 }
 0x47f   :  { %2873 = vst [vmem:[#allocation10 + $0x188] sm:$0xff] %v2809_v0  ;;  %v3603_v36 = vpop.f32.mrb[116].mxu1 }
 0x480   :  { %v2722_v46 = vadd.f32 %v3603_v36, %v5231_v13  ;;  %v2713_v30 = vpop.f32.mrb[117].mxu1 }
 0x481   :  { %v2714_v61 = vadd.f32 %v2713_v30, %v5222_v28  ;;  %v3604_v37 = vpop.f32.mrb[118].mxu1 }
 0x482   :  { %v2814_v42 = vmul.f32 %v5923_v10, %v2722_v46  ;;  %v2725_v19 = vadd.f32 %v3604_v37, %v6005_v62  ;;  %v2716_v32 = vpop.f32.mrb[119].mxu1 }
 0x483   :  { %v2812_v14 = vmul.f32 %v6006_v57, %v2714_v61  ;;  %v2717_v15 = vadd.f32 %v2716_v32, %v6007_v22 }
 0x484   :  { %2878 = vst [vmem:[#allocation10 + $0x1b0] sm:$0xff] %v2814_v42  ;;  %v2815_v9 = vmul.f32 %v6008_v38, %v2725_v19 }
 0x485   :  { %2876 = vst [vmem:[#allocation10 + $0x1a0] sm:$0xff] %v2812_v14  ;;  %v2813_v53 = vmul.f32 %v6009_v34, %v2717_v15 }
 0x486   :  { %2879 = vst [vmem:[#allocation10 + $0x1b8] sm:$0xff] %v2815_v9 }
 0x487   :  { %2877 = vst [vmem:[#allocation10 + $0x1a8] sm:$0xff] %v2813_v53  ;;  %v3607_v13 = vpop.f32.mrb[120].mxu1 }
 0x488   :  { %v2738_v28 = vadd.f32 %v3607_v13, %v5253_v35  ;;  %v2729_v59 = vpop.f32.mrb[121].mxu1 }
 0x489   :  { %v2730_v10 = vadd.f32 %v2729_v59, %v5244_v54  ;;  %v3608_v58 = vpop.f32.mrb[122].mxu1 }
 0x48a   :  { %v2818_v12 = vmul.f32 %v5927_v31, %v2738_v28  ;;  %v2741_v40 = vadd.f32 %v3608_v58, %v5247_v1  ;;  %v2732_v24 = vpop.f32.mrb[123].mxu1 }
 0x48b   :  { %v2816_v23 = vmul.f32 %v5851_v51, %v2730_v10  ;;  %v2733_v44 = vadd.f32 %v2732_v24, %v6010_v29 }
 0x48c   :  { %2882 = vst [vmem:[#allocation10 + $0x1d0] sm:$0xff] %v2818_v12  ;;  %v2819_v2 = vmul.f32 %v6011_v52, %v2741_v40 }
 0x48d   :  { %2880 = vst [vmem:[#allocation10 + $0x1c0] sm:$0xff] %v2816_v23  ;;  %v2817_v5 = vmul.f32 %v6012_v8, %v2733_v44 }
 0x48e   :  { %2883 = vst [vmem:[#allocation10 + $0x1d8] sm:$0xff] %v2819_v2 }
 0x48f   :  { %2881 = vst [vmem:[#allocation10 + $0x1c8] sm:$0xff] %v2817_v5  ;;  %v3611_v35 = vpop.f32.mrb[124].mxu1 }
 0x490   :  { %v2754_v54 = vadd.f32 %v3611_v35, %v5275_v11  ;;  %v2745_v20 = vpop.f32.mrb[125].mxu1  ;;  %v6014_v11 = vld [vmem:[#allocation121_spill] sm:$0xff] }
 0x491   :  { %v2746_v31 = vadd.f32 %v2745_v20, %v5266_v56  ;;  %v3612_v1 = vpop.f32.mrb[126].mxu1 }
 0x492   :  { %v2822_v51 = vmul.f32 %v4760_v41, %v2754_v54  ;;  %v2757_v50 = vadd.f32 %v3612_v1, %v5269_v6  ;;  %v2748_v16 = vpop.f32.mrb[127].mxu1 }
 0x493   :  { %v2820_v63 = vmul.f32 %v4750_v18, %v2746_v31  ;;  %v2749_v55 = vadd.f32 %v2748_v16, %v5272_v17 }
 0x494   :  { %2886 = vst [vmem:[#allocation10 + $0x1f0] sm:$0xff] %v2822_v51  ;;  %v2823_v49 = vmul.f32 %v6013_v27, %v2757_v50 }
 0x495   :  { %2884 = vst [vmem:[#allocation10 + $0x1e0] sm:$0xff] %v2820_v63  ;;  %v2821_v43 = vmul.f32 %v6014_v11, %v2749_v55 }
 0x496   :  { %2887 = vst [vmem:[#allocation10 + $0x1f8] sm:$0xff] %v2823_v49 }
 0x497   :  { %2885 = vst [vmem:[#allocation10 + $0x1e8] sm:$0xff] %v2821_v43 }
 0x498   :  { %3987 = shalt.err (!%p3984_p8)
}
 0x499   :  { %s3988_s28 = scalar_lea.hbm %s5436_s6, 8192 }
 0x49a   :  { %p3989_p9 = scmp.ne.s32.totalorder %s5436_s6, %s3988_s28  ;;  %p3992_p10 = scmp.lt.u32.totalorder %s3988_s28, %s5436_s6 }
 0x49c   :  { %p3994_p11 = pnand %p3992_p10, %p3989_p9 }
 0x49e   :  { %3997 = shalt.err (!%p3994_p11)
}
 0x49f   :  { %s4013_s11 = smov 128   ;;  %s4014_s0 = smov 8  }
 0x4a0   :  { %2899 = dma.vmem_to_hbm [thread:$0]  %s2894_s23, 8192, %s5436_s6, [#allocation4], %s4013_s11, %s4013_s11, %s4014_s0  }
 0x4a1   :  { %4004 = dma.done.wait [#allocation4], 8192  }
 0x4a2   :  { %4005 = vsyncadd [#allocation4], 4294959104 }
 0x4a3   :  { %2903 = vsyncpa [#allocation3], 1 }
 0x4a4   :  { %2904 = vsyncpa [#allocation6], 1 }
 0x4a5   :  { %2905 = vsyncpa [#allocation9], 1 }
 0x4a6   :  { %2906 = vsyncpa [#allocation4], 1 }

</bundles_post_ra>
